<compile_context>
chip_gen: v7x
topology: tpu7x:2x2x1
jax: 0.10.0
libtpu: 0.0.40
codegen_flags: <defaults>
</compile_context>

<pallas_src>
import math
import jax
import jax.numpy as jnp
from jax.experimental import pallas as pl
from jax.experimental.pallas import tpu as pltpu

# ---------------- problem configuration (small, module-consistent) ----------
N, LT, LV = 2, 8, 8          # batch, decoder length, encoder length
D, H = 32, 4                 # hidden size, attention heads (intermediate==hidden)
DH = D // H                  # head dim
NUM_LAYERS = 2               # config.num_hidden_layers
EPS = 1e-12                  # layer_norm_eps
NEG = -10000.0


# ----------------------------- kernel helpers --------------------------------
def _layer_norm(x, g, b):
    # TF-style layernorm (eps inside the sqrt), matches BertLayerNorm.
    u = jnp.mean(x, axis=-1, keepdims=True)
    s = jnp.mean((x - u) ** 2, axis=-1, keepdims=True)
    return g * ((x - u) / jnp.sqrt(s + EPS)) + b


def _mha(q, k, v, add_mask):
    # q: (N*LT, D), k/v: (N*Lk, D).
    # add_mask: (N*LT, N*Lk) block-diagonal additive mask; cross-batch entries
    # are -1e4, so their softmax weights underflow to exactly 0 and the whole
    # batch rides through a single set of matmuls.  1/sqrt(DH) is pre-folded
    # into q.  Static head loop; K-transpose folded into the contraction.
    ctx = []
    for h in range(H):
        sl = slice(h * DH, (h + 1) * DH)
        qh, kh, vh = q[:, sl], k[:, sl], v[:, sl]
        s = jnp.einsum('qd,kd->qk', qh, kh,
                       preferred_element_type=jnp.float32) + add_mask
        m = jnp.max(s, axis=-1, keepdims=True)
        e = jnp.exp(s - m)
        p = e / jnp.sum(e, axis=-1, keepdims=True)
        ctx.append(jnp.dot(p, vh, preferred_element_type=jnp.float32))
    return jnp.concatenate(ctx, axis=-1)                 # (N*LT, D)


# -------------------------------- the kernel ----------------------------------
def decoder_kernel(dec_ref, enc_ref, smask_ref, cmask_ref,
                   wqkv_ref, wcross_ref, wout_ref, bqkv_ref, vec_ref,
                   out_ref):
    x = dec_ref[...]                                     # (N*LT, D)
    enc = enc_ref[...]                                   # (N*LV, D)
    smask = smask_ref[...]                               # (N*LT, N*LT) additive
    cmask = cmask_ref[...]                               # (N*LT, N*LV) additive

    for l in range(NUM_LAYERS):                          # static layer loop
        w_qkv = wqkv_ref[l]                              # (D, 3D) [q|k|v], q pre-scaled
        w_cr = wcross_ref[l]                             # (D, 3D) [q|k|v], q pre-scaled
        w_out = wout_ref[l]                              # (D, D)
        b2 = bqkv_ref[l]                                 # (2, 3D)
        b_self, b_cross = b2[0:1, :], b2[1:2, :]
        vec = vec_ref[l]                                 # (7, D)
        b_out = vec[0:1]
        g1, be1 = vec[1:2], vec[2:3]
        g2, be2 = vec[3:4], vec[4:5]
        g3, be3 = vec[5:6], vec[6:7]

        # masked self-attention (fused QKV) + residual + norm1
        qkv = jnp.dot(x, w_qkv, preferred_element_type=jnp.float32) + b_self
        att1 = _mha(qkv[:, :D], qkv[:, D:2 * D], qkv[:, 2 * D:], smask)
        att1 = _layer_norm(att1 + x, g1, be1)

        # decoder-encoder cross attention (fused KV projection) + residual + norm2
        q2 = jnp.dot(att1, w_cr[:, :D],
                     preferred_element_type=jnp.float32) + b_cross[:, :D]
        kv = jnp.dot(enc, w_cr[:, D:],
                     preferred_element_type=jnp.float32) + b_cross[:, D:]
        att2 = _mha(q2, kv[:, :D], kv[:, D:], cmask)
        h = _layer_norm(att1 + att2, g2, be2)

        # BertOutput(h, h): dense + residual + layernorm (dropout = identity)
        d = jnp.dot(h, w_out, preferred_element_type=jnp.float32) + b_out
        x = _layer_norm(d + h, g3, be3)

    out_ref[...] = x


# --------------------------------- wrapper ------------------------------------
def decoder_forward(dec, dec_mask, enc, enc_mask, packed_params):
    """Full decoder stack; returns the final layer's hidden states (N, LT, D)."""
    wqkv, wcross, wout, bqkv, vecs = packed_params

    # Block-diagonal additive masks (shared by all layers; diagonal_mask=True,
    # as the module's forward always passes).
    eye = jnp.eye(N, dtype=jnp.float32)
    tril = jnp.tril(jnp.ones((LT, LT), jnp.float32))
    self_m = dec_mask[:, None, :] * tril                              # (N,LT,LT)
    self_bd = eye[:, None, :, None] * self_m[:, :, None, :]           # (N,LT,N,LT)
    self_add = (1.0 - self_bd.reshape(N * LT, N * LT)) * NEG
    cross_bd = jnp.broadcast_to(
        eye[:, None, :, None] * enc_mask[None, None, :, :], (N, LT, N, LV))
    cross_add = (1.0 - cross_bd.reshape(N * LT, N * LV)) * NEG

    inputs = [dec.reshape(N * LT, D), enc.reshape(N * LV, D),
              self_add, cross_add, wqkv, wcross, wout, bqkv, vecs]

    def vmem():
        return pl.BlockSpec(memory_space=pltpu.MemorySpace.VMEM)

    out = pl.pallas_call(
        decoder_kernel,
        out_shape=jax.ShapeDtypeStruct((N * LT, D), jnp.float32),
        in_specs=[vmem() for _ in inputs],
        out_specs=vmem(),
    )(*inputs)
    return out.reshape(N, LT, D)


# --------------------------- deterministic params ------------------------------
def init_raw_params(key):
    """Per-layer params in y = x @ W + b layout: W (in,out), b (1,out)."""
    layers = []
    for l in range(NUM_LAYERS):
        ks = jax.random.split(jax.random.fold_in(key, l), 10)

        def lin(k):
            w = jax.random.normal(k, (D, D), jnp.float32) * 0.05
            b = jax.random.normal(jax.random.fold_in(k, 1), (1, D), jnp.float32) * 0.05
            return w, b

        def ln(k):
            g = 1.0 + 0.1 * jax.random.normal(k, (1, D), jnp.float32)
            b = 0.1 * jax.random.normal(jax.random.fold_in(k, 1), (1, D), jnp.float32)
            return g, b

        wq1, bq1 = lin(ks[0]); wk1, bk1 = lin(ks[1]); wv1, bv1 = lin(ks[2])
        wq2, bq2 = lin(ks[3]); wk2, bk2 = lin(ks[4]); wv2, bv2 = lin(ks[5])
        wo, bo = lin(ks[6])
        g1, be1 = ln(ks[7]); g2, be2 = ln(ks[8]); g3, be3 = ln(ks[9])
        layers.append((wq1, bq1, wk1, bk1, wv1, bv1,
                       wq2, bq2, wk2, bk2, wv2, bv2,
                       wo, bo, g1, be1, g2, be2, g3, be3))
    return layers


def pack_params(raw_layers):
    """Pack per-layer params into 5 stacked tensors; fold 1/sqrt(DH) into Q."""
    scale = 1.0 / math.sqrt(DH)
    wqkv, wcross, wout, bqkv, vecs = [], [], [], [], []
    for (wq1, bq1, wk1, bk1, wv1, bv1,
         wq2, bq2, wk2, bk2, wv2, bv2,
         wo, bo, g1, be1, g2, be2, g3, be3) in raw_layers:
        wqkv.append(jnp.concatenate([wq1 * scale, wk1, wv1], axis=1))   # (D, 3D)
        wcross.append(jnp.concatenate([wq2 * scale, wk2, wv2], axis=1)) # (D, 3D)
        wout.append(wo)                                                 # (D, D)
        b_self = jnp.concatenate([bq1 * scale, bk1, bv1], axis=1)       # (1, 3D)
        b_cross = jnp.concatenate([bq2 * scale, bk2, bv2], axis=1)      # (1, 3D)
        bqkv.append(jnp.concatenate([b_self, b_cross], axis=0))         # (2, 3D)
        vecs.append(jnp.concatenate([bo, g1, be1, g2, be2, g3, be3], axis=0))  # (7, D)
    return (jnp.stack(wqkv), jnp.stack(wcross), jnp.stack(wout),
            jnp.stack(bqkv), jnp.stack(vecs))


# ----------------------- plain-JAX reference (checker) --------------------------
def reference(dec, dec_mask, enc, enc_mask, raw_layers):
    HI = jax.lax.Precision.HIGHEST

    def ln(x, g, b):
        u = jnp.mean(x, axis=-1, keepdims=True)
        s = jnp.mean((x - u) ** 2, axis=-1, keepdims=True)
        return g * ((x - u) / jnp.sqrt(s + EPS)) + b

    def attn(q_in, kv_in, mask, wq, bq, wk, bk, wv, bv):
        Lq, Lk = q_in.shape[1], kv_in.shape[1]
        add = (1.0 - mask[:, None]) * NEG
        q = (jnp.matmul(q_in, wq, precision=HI) + bq).reshape(N, Lq, H, DH).transpose(0, 2, 1, 3)
        k = (jnp.matmul(kv_in, wk, precision=HI) + bk).reshape(N, Lk, H, DH).transpose(0, 2, 1, 3)
        v = (jnp.matmul(kv_in, wv, precision=HI) + bv).reshape(N, Lk, H, DH).transpose(0, 2, 1, 3)
        s = jnp.einsum('bhqd,bhkd->bhqk', q, k, precision=HI) / math.sqrt(DH) + add
        p = jax.nn.softmax(s, axis=-1)
        c = jnp.einsum('bhqk,bhkd->bhqd', p, v, precision=HI)
        return c.transpose(0, 2, 1, 3).reshape(N, Lq, D)

    tril = jnp.tril(jnp.ones((LT, LT), jnp.float32))
    self_mask = dec_mask[:, None, :] * tril          # (N, LT, LT)
    cross_mask = enc_mask[:, None, :]                # (N, 1, LV)
    x = dec
    for (wq1, bq1, wk1, bk1, wv1, bv1,
         wq2, bq2, wk2, bk2, wv2, bv2,
         wo, bo, g1, be1, g2, be2, g3, be3) in raw_layers:
        a1 = attn(x, x, self_mask, wq1, bq1, wk1, bk1, wv1, bv1)
        a1 = ln(a1 + x, g1, be1)
        a2 = attn(a1, enc, cross_mask, wq2, bq2, wk2, bk2, wv2, bv2)
        h = ln(a1 + a2, g2, be2)
        d = jnp.matmul(h, wo, precision=HI) + bo
        x = ln(d + h, g3, be3)
    return x


# ------------------------------------ main --------------------------------------
if __name__ == "__main__":
    key = jax.random.PRNGKey(0)
    kd, ke, kp = jax.random.split(key, 3)
    dec = jax.random.normal(kd, (N, LT, D), jnp.float32)
    enc = jax.random.normal(ke, (N, LV, D), jnp.float32)
    # masks: batch 1 has last 2 decoder tokens padded; batch 0 has last enc token padded
    dec_mask = jnp.ones((N, LT), jnp.float32).at[1, LT - 2:].set(0.0)
    enc_mask = jnp.ones((N, LV), jnp.float32).at[0, LV - 1:].set(0.0)

    raw = init_raw_params(kp)
    packed = pack_params(raw)

    out = decoder_forward(dec, dec_mask, enc, enc_mask, packed)
    out = jax.block_until_ready(out)

    ref = reference(dec, dec_mask, enc, enc_mask, raw)
    assert out.shape == (N, LT, D)
    err = float(jnp.max(jnp.abs(out - ref)))
    assert jnp.allclose(out, ref, atol=1e-4, rtol=1e-4), err
    print("KERNEL_OK")
</pallas_src>

<mosaic_0001>
module attributes {stable_mosaic.version = 11 : i64} {
  func.func @decoder_kernel(%arg0: memref<16x32xf32, #tpu.memory_space<vmem>>, %arg1: memref<16x32xf32, #tpu.memory_space<vmem>>, %arg2: memref<16x16xf32, #tpu.memory_space<vmem>>, %arg3: memref<16x16xf32, #tpu.memory_space<vmem>>, %arg4: memref<2x32x96xf32, #tpu.memory_space<vmem>>, %arg5: memref<2x32x96xf32, #tpu.memory_space<vmem>>, %arg6: memref<2x32x32xf32, #tpu.memory_space<vmem>>, %arg7: memref<2x2x96xf32, #tpu.memory_space<vmem>>, %arg8: memref<2x7x32xf32, #tpu.memory_space<vmem>>, %arg9: memref<16x32xf32, #tpu.memory_space<vmem>>) attributes {dimension_semantics = [], scalar_prefetch = 0 : i64, scratch_operands = 0 : i64, tpu.core_type = #tpu.core_type<tc>} {
    %c0 = arith.constant 0 : index
    %c0_0 = arith.constant 0 : index
    %0 = vector.load %arg0[%c0, %c0_0] : memref<16x32xf32, #tpu.memory_space<vmem>>, vector<16x32xf32>
    %c0_1 = arith.constant 0 : index
    %c0_2 = arith.constant 0 : index
    %1 = vector.load %arg1[%c0_1, %c0_2] : memref<16x32xf32, #tpu.memory_space<vmem>>, vector<16x32xf32>
    %c0_3 = arith.constant 0 : index
    %c0_4 = arith.constant 0 : index
    %2 = vector.load %arg2[%c0_3, %c0_4] : memref<16x16xf32, #tpu.memory_space<vmem>>, vector<16x16xf32>
    %c0_5 = arith.constant 0 : index
    %c0_6 = arith.constant 0 : index
    %3 = vector.load %arg3[%c0_5, %c0_6] : memref<16x16xf32, #tpu.memory_space<vmem>>, vector<16x16xf32>
    %c0_7 = arith.constant 0 : index
    %c0_8 = arith.constant 0 : index
    %c0_9 = arith.constant 0 : index
    %4 = vector.load %arg4[%c0_7, %c0_8, %c0_9] : memref<2x32x96xf32, #tpu.memory_space<vmem>>, vector<1x32x96xf32>
    %5 = vector.shape_cast %4 : vector<1x32x96xf32> to vector<32x96xf32>
    %c0_10 = arith.constant 0 : index
    %c0_11 = arith.constant 0 : index
    %c0_12 = arith.constant 0 : index
    %6 = vector.load %arg5[%c0_10, %c0_11, %c0_12] : memref<2x32x96xf32, #tpu.memory_space<vmem>>, vector<1x32x96xf32>
    %7 = vector.shape_cast %6 : vector<1x32x96xf32> to vector<32x96xf32>
    %c0_13 = arith.constant 0 : index
    %c0_14 = arith.constant 0 : index
    %c0_15 = arith.constant 0 : index
    %8 = vector.load %arg6[%c0_13, %c0_14, %c0_15] : memref<2x32x32xf32, #tpu.memory_space<vmem>>, vector<1x32x32xf32>
    %9 = vector.shape_cast %8 : vector<1x32x32xf32> to vector<32x32xf32>
    %c0_16 = arith.constant 0 : index
    %c0_17 = arith.constant 0 : index
    %c0_18 = arith.constant 0 : index
    %10 = vector.load %arg7[%c0_16, %c0_17, %c0_18] : memref<2x2x96xf32, #tpu.memory_space<vmem>>, vector<1x2x96xf32>
    %11 = vector.shape_cast %10 : vector<1x2x96xf32> to vector<2x96xf32>
    %12 = vector.extract_strided_slice %11 {offsets = [0, 0], sizes = [1, 96], strides = [1, 1]} : vector<2x96xf32> to vector<1x96xf32>
    %13 = vector.extract_strided_slice %11 {offsets = [1, 0], sizes = [1, 96], strides = [1, 1]} : vector<2x96xf32> to vector<1x96xf32>
    %c0_19 = arith.constant 0 : index
    %c0_20 = arith.constant 0 : index
    %c0_21 = arith.constant 0 : index
    %14 = vector.load %arg8[%c0_19, %c0_20, %c0_21] : memref<2x7x32xf32, #tpu.memory_space<vmem>>, vector<1x7x32xf32>
    %15 = vector.shape_cast %14 : vector<1x7x32xf32> to vector<7x32xf32>
    %16 = vector.extract_strided_slice %15 {offsets = [0, 0], sizes = [1, 32], strides = [1, 1]} : vector<7x32xf32> to vector<1x32xf32>
    %17 = vector.extract_strided_slice %15 {offsets = [1, 0], sizes = [1, 32], strides = [1, 1]} : vector<7x32xf32> to vector<1x32xf32>
    %18 = vector.extract_strided_slice %15 {offsets = [2, 0], sizes = [1, 32], strides = [1, 1]} : vector<7x32xf32> to vector<1x32xf32>
    %19 = vector.extract_strided_slice %15 {offsets = [3, 0], sizes = [1, 32], strides = [1, 1]} : vector<7x32xf32> to vector<1x32xf32>
    %20 = vector.extract_strided_slice %15 {offsets = [4, 0], sizes = [1, 32], strides = [1, 1]} : vector<7x32xf32> to vector<1x32xf32>
    %21 = vector.extract_strided_slice %15 {offsets = [5, 0], sizes = [1, 32], strides = [1, 1]} : vector<7x32xf32> to vector<1x32xf32>
    %22 = vector.extract_strided_slice %15 {offsets = [6, 0], sizes = [1, 32], strides = [1, 1]} : vector<7x32xf32> to vector<1x32xf32>
    %cst = arith.constant dense<0.000000e+00> : vector<16x96xf32>
    %23 = tpu.matmul %0, %5, %cst {dimension_numbers = #tpu.dot_dimension_numbers<[1], [0], [0], [1], [0, 0, 1, 1], [], []>} : vector<16x32xf32>, vector<32x96xf32>, vector<16x96xf32> -> vector<16x96xf32>
    %24 = vector.broadcast %12 : vector<1x96xf32> to vector<16x96xf32>
    %25 = arith.addf %23, %24 : vector<16x96xf32>
    %26 = vector.extract_strided_slice %25 {offsets = [0, 0], sizes = [16, 32], strides = [1, 1]} : vector<16x96xf32> to vector<16x32xf32>
    %27 = vector.extract_strided_slice %25 {offsets = [0, 32], sizes = [16, 32], strides = [1, 1]} : vector<16x96xf32> to vector<16x32xf32>
    %28 = vector.extract_strided_slice %25 {offsets = [0, 64], sizes = [16, 32], strides = [1, 1]} : vector<16x96xf32> to vector<16x32xf32>
    %29 = vector.extract_strided_slice %26 {offsets = [0, 0], sizes = [16, 8], strides = [1, 1]} : vector<16x32xf32> to vector<16x8xf32>
    %30 = vector.extract_strided_slice %27 {offsets = [0, 0], sizes = [16, 8], strides = [1, 1]} : vector<16x32xf32> to vector<16x8xf32>
    %31 = vector.extract_strided_slice %28 {offsets = [0, 0], sizes = [16, 8], strides = [1, 1]} : vector<16x32xf32> to vector<16x8xf32>
    "tpu.trace_start"() <{level = 10 : i32, message = "qd,kd->qk"}> : () -> ()
    %cst_22 = arith.constant dense<0.000000e+00> : vector<16x16xf32>
    %32 = tpu.matmul %29, %30, %cst_22 {dimension_numbers = #tpu.dot_dimension_numbers<[1], [1], [0], [0], [0, 0, 1, 0], [], []>} : vector<16x8xf32>, vector<16x8xf32>, vector<16x16xf32> -> vector<16x16xf32>
    "tpu.trace_stop"() : () -> ()
    %33 = arith.addf %32, %2 : vector<16x16xf32>
    %cst_23 = arith.constant dense<0xFF800000> : vector<16xf32>
    %34 = vector.multi_reduction <maximumf>, %33, %cst_23 [1] : vector<16x16xf32> to vector<16xf32>
    %35 = vector.shape_cast %34 : vector<16xf32> to vector<16x1xf32>
    %36 = vector.broadcast %35 : vector<16x1xf32> to vector<16x16xf32>
    %37 = arith.subf %33, %36 : vector<16x16xf32>
    %38 = math.exp %37 : vector<16x16xf32>
    %cst_24 = arith.constant dense<0.000000e+00> : vector<16xf32>
    %39 = vector.multi_reduction <add>, %38, %cst_24 [1] : vector<16x16xf32> to vector<16xf32>
    %40 = vector.shape_cast %39 : vector<16xf32> to vector<16x1xf32>
    %41 = vector.broadcast %40 : vector<16x1xf32> to vector<16x16xf32>
    %42 = arith.divf %38, %41 : vector<16x16xf32>
    %cst_25 = arith.constant dense<0.000000e+00> : vector<16x8xf32>
    %43 = tpu.matmul %42, %31, %cst_25 {dimension_numbers = #tpu.dot_dimension_numbers<[1], [0], [0], [1], [0, 0, 1, 1], [], []>} : vector<16x16xf32>, vector<16x8xf32>, vector<16x8xf32> -> vector<16x8xf32>
    %44 = vector.extract_strided_slice %26 {offsets = [0, 8], sizes = [16, 8], strides = [1, 1]} : vector<16x32xf32> to vector<16x8xf32>
    %45 = vector.extract_strided_slice %27 {offsets = [0, 8], sizes = [16, 8], strides = [1, 1]} : vector<16x32xf32> to vector<16x8xf32>
    %46 = vector.extract_strided_slice %28 {offsets = [0, 8], sizes = [16, 8], strides = [1, 1]} : vector<16x32xf32> to vector<16x8xf32>
    "tpu.trace_start"() <{level = 10 : i32, message = "qd,kd->qk"}> : () -> ()
    %cst_26 = arith.constant dense<0.000000e+00> : vector<16x16xf32>
    %47 = tpu.matmul %44, %45, %cst_26 {dimension_numbers = #tpu.dot_dimension_numbers<[1], [1], [0], [0], [0, 0, 1, 0], [], []>} : vector<16x8xf32>, vector<16x8xf32>, vector<16x16xf32> -> vector<16x16xf32>
    "tpu.trace_stop"() : () -> ()
    %48 = arith.addf %47, %2 : vector<16x16xf32>
    %cst_27 = arith.constant dense<0xFF800000> : vector<16xf32>
    %49 = vector.multi_reduction <maximumf>, %48, %cst_27 [1] : vector<16x16xf32> to vector<16xf32>
    %50 = vector.shape_cast %49 : vector<16xf32> to vector<16x1xf32>
    %51 = vector.broadcast %50 : vector<16x1xf32> to vector<16x16xf32>
    %52 = arith.subf %48, %51 : vector<16x16xf32>
    %53 = math.exp %52 : vector<16x16xf32>
    %cst_28 = arith.constant dense<0.000000e+00> : vector<16xf32>
    %54 = vector.multi_reduction <add>, %53, %cst_28 [1] : vector<16x16xf32> to vector<16xf32>
    %55 = vector.shape_cast %54 : vector<16xf32> to vector<16x1xf32>
    %56 = vector.broadcast %55 : vector<16x1xf32> to vector<16x16xf32>
    %57 = arith.divf %53, %56 : vector<16x16xf32>
    %cst_29 = arith.constant dense<0.000000e+00> : vector<16x8xf32>
    %58 = tpu.matmul %57, %46, %cst_29 {dimension_numbers = #tpu.dot_dimension_numbers<[1], [0], [0], [1], [0, 0, 1, 1], [], []>} : vector<16x16xf32>, vector<16x8xf32>, vector<16x8xf32> -> vector<16x8xf32>
    %59 = vector.extract_strided_slice %26 {offsets = [0, 16], sizes = [16, 8], strides = [1, 1]} : vector<16x32xf32> to vector<16x8xf32>
    %60 = vector.extract_strided_slice %27 {offsets = [0, 16], sizes = [16, 8], strides = [1, 1]} : vector<16x32xf32> to vector<16x8xf32>
    %61 = vector.extract_strided_slice %28 {offsets = [0, 16], sizes = [16, 8], strides = [1, 1]} : vector<16x32xf32> to vector<16x8xf32>
    "tpu.trace_start"() <{level = 10 : i32, message = "qd,kd->qk"}> : () -> ()
    %cst_30 = arith.constant dense<0.000000e+00> : vector<16x16xf32>
    %62 = tpu.matmul %59, %60, %cst_30 {dimension_numbers = #tpu.dot_dimension_numbers<[1], [1], [0], [0], [0, 0, 1, 0], [], []>} : vector<16x8xf32>, vector<16x8xf32>, vector<16x16xf32> -> vector<16x16xf32>
    "tpu.trace_stop"() : () -> ()
    %63 = arith.addf %62, %2 : vector<16x16xf32>
    %cst_31 = arith.constant dense<0xFF800000> : vector<16xf32>
    %64 = vector.multi_reduction <maximumf>, %63, %cst_31 [1] : vector<16x16xf32> to vector<16xf32>
    %65 = vector.shape_cast %64 : vector<16xf32> to vector<16x1xf32>
    %66 = vector.broadcast %65 : vector<16x1xf32> to vector<16x16xf32>
    %67 = arith.subf %63, %66 : vector<16x16xf32>
    %68 = math.exp %67 : vector<16x16xf32>
    %cst_32 = arith.constant dense<0.000000e+00> : vector<16xf32>
    %69 = vector.multi_reduction <add>, %68, %cst_32 [1] : vector<16x16xf32> to vector<16xf32>
    %70 = vector.shape_cast %69 : vector<16xf32> to vector<16x1xf32>
    %71 = vector.broadcast %70 : vector<16x1xf32> to vector<16x16xf32>
    %72 = arith.divf %68, %71 : vector<16x16xf32>
    %cst_33 = arith.constant dense<0.000000e+00> : vector<16x8xf32>
    %73 = tpu.matmul %72, %61, %cst_33 {dimension_numbers = #tpu.dot_dimension_numbers<[1], [0], [0], [1], [0, 0, 1, 1], [], []>} : vector<16x16xf32>, vector<16x8xf32>, vector<16x8xf32> -> vector<16x8xf32>
    %74 = vector.extract_strided_slice %26 {offsets = [0, 24], sizes = [16, 8], strides = [1, 1]} : vector<16x32xf32> to vector<16x8xf32>
    %75 = vector.extract_strided_slice %27 {offsets = [0, 24], sizes = [16, 8], strides = [1, 1]} : vector<16x32xf32> to vector<16x8xf32>
    %76 = vector.extract_strided_slice %28 {offsets = [0, 24], sizes = [16, 8], strides = [1, 1]} : vector<16x32xf32> to vector<16x8xf32>
    "tpu.trace_start"() <{level = 10 : i32, message = "qd,kd->qk"}> : () -> ()
    %cst_34 = arith.constant dense<0.000000e+00> : vector<16x16xf32>
    %77 = tpu.matmul %74, %75, %cst_34 {dimension_numbers = #tpu.dot_dimension_numbers<[1], [1], [0], [0], [0, 0, 1, 0], [], []>} : vector<16x8xf32>, vector<16x8xf32>, vector<16x16xf32> -> vector<16x16xf32>
    "tpu.trace_stop"() : () -> ()
    %78 = arith.addf %77, %2 : vector<16x16xf32>
    %cst_35 = arith.constant dense<0xFF800000> : vector<16xf32>
    %79 = vector.multi_reduction <maximumf>, %78, %cst_35 [1] : vector<16x16xf32> to vector<16xf32>
    %80 = vector.shape_cast %79 : vector<16xf32> to vector<16x1xf32>
    %81 = vector.broadcast %80 : vector<16x1xf32> to vector<16x16xf32>
    %82 = arith.subf %78, %81 : vector<16x16xf32>
    %83 = math.exp %82 : vector<16x16xf32>
    %cst_36 = arith.constant dense<0.000000e+00> : vector<16xf32>
    %84 = vector.multi_reduction <add>, %83, %cst_36 [1] : vector<16x16xf32> to vector<16xf32>
    %85 = vector.shape_cast %84 : vector<16xf32> to vector<16x1xf32>
    %86 = vector.broadcast %85 : vector<16x1xf32> to vector<16x16xf32>
    %87 = arith.divf %83, %86 : vector<16x16xf32>
    %cst_37 = arith.constant dense<0.000000e+00> : vector<16x8xf32>
    %88 = tpu.matmul %87, %76, %cst_37 {dimension_numbers = #tpu.dot_dimension_numbers<[1], [0], [0], [1], [0, 0, 1, 1], [], []>} : vector<16x16xf32>, vector<16x8xf32>, vector<16x8xf32> -> vector<16x8xf32>
    %89 = tpu.concatenate %43, %58, %73, %88 in 1 : vector<16x8xf32>, vector<16x8xf32>, vector<16x8xf32>, vector<16x8xf32> -> vector<16x32xf32>
    %90 = arith.addf %89, %0 : vector<16x32xf32>
    %cst_38 = arith.constant dense<0.000000e+00> : vector<16xf32>
    %91 = vector.multi_reduction <add>, %90, %cst_38 [1] : vector<16x32xf32> to vector<16xf32>
    %92 = vector.shape_cast %91 : vector<16xf32> to vector<16x1xf32>
    %cst_39 = arith.constant 3.200000e+01 : f32
    %93 = vector.broadcast %cst_39 : f32 to vector<16x1xf32>
    %94 = arith.divf %92, %93 : vector<16x1xf32>
    %95 = vector.broadcast %94 : vector<16x1xf32> to vector<16x32xf32>
    %96 = arith.subf %90, %95 : vector<16x32xf32>
    %97 = arith.mulf %96, %96 : vector<16x32xf32>
    %cst_40 = arith.constant dense<0.000000e+00> : vector<16xf32>
    %98 = vector.multi_reduction <add>, %97, %cst_40 [1] : vector<16x32xf32> to vector<16xf32>
    %99 = vector.shape_cast %98 : vector<16xf32> to vector<16x1xf32>
    %cst_41 = arith.constant 3.200000e+01 : f32
    %100 = vector.broadcast %cst_41 : f32 to vector<16x1xf32>
    %101 = arith.divf %99, %100 : vector<16x1xf32>
    %102 = vector.broadcast %94 : vector<16x1xf32> to vector<16x32xf32>
    %103 = arith.subf %90, %102 : vector<16x32xf32>
    %cst_42 = arith.constant 9.99999996E-13 : f32
    %104 = vector.broadcast %cst_42 : f32 to vector<16x1xf32>
    %105 = arith.addf %101, %104 : vector<16x1xf32>
    %106 = math.sqrt %105 : vector<16x1xf32>
    %107 = vector.broadcast %106 : vector<16x1xf32> to vector<16x32xf32>
    %108 = arith.divf %103, %107 : vector<16x32xf32>
    %109 = vector.broadcast %17 : vector<1x32xf32> to vector<16x32xf32>
    %110 = arith.mulf %109, %108 : vector<16x32xf32>
    %111 = vector.broadcast %18 : vector<1x32xf32> to vector<16x32xf32>
    %112 = arith.addf %110, %111 : vector<16x32xf32>
    %113 = vector.extract_strided_slice %7 {offsets = [0, 0], sizes = [32, 32], strides = [1, 1]} : vector<32x96xf32> to vector<32x32xf32>
    %cst_43 = arith.constant dense<0.000000e+00> : vector<16x32xf32>
    %114 = tpu.matmul %112, %113, %cst_43 {dimension_numbers = #tpu.dot_dimension_numbers<[1], [0], [0], [1], [0, 0, 1, 1], [], []>} : vector<16x32xf32>, vector<32x32xf32>, vector<16x32xf32> -> vector<16x32xf32>
    %115 = vector.extract_strided_slice %13 {offsets = [0, 0], sizes = [1, 32], strides = [1, 1]} : vector<1x96xf32> to vector<1x32xf32>
    %116 = vector.broadcast %115 : vector<1x32xf32> to vector<16x32xf32>
    %117 = arith.addf %114, %116 : vector<16x32xf32>
    %118 = vector.extract_strided_slice %7 {offsets = [0, 32], sizes = [32, 64], strides = [1, 1]} : vector<32x96xf32> to vector<32x64xf32>
    %cst_44 = arith.constant dense<0.000000e+00> : vector<16x64xf32>
    %119 = tpu.matmul %1, %118, %cst_44 {dimension_numbers = #tpu.dot_dimension_numbers<[1], [0], [0], [1], [0, 0, 1, 1], [], []>} : vector<16x32xf32>, vector<32x64xf32>, vector<16x64xf32> -> vector<16x64xf32>
    %120 = vector.extract_strided_slice %13 {offsets = [0, 32], sizes = [1, 64], strides = [1, 1]} : vector<1x96xf32> to vector<1x64xf32>
    %121 = vector.broadcast %120 : vector<1x64xf32> to vector<16x64xf32>
    %122 = arith.addf %119, %121 : vector<16x64xf32>
    %123 = vector.extract_strided_slice %122 {offsets = [0, 0], sizes = [16, 32], strides = [1, 1]} : vector<16x64xf32> to vector<16x32xf32>
    %124 = vector.extract_strided_slice %122 {offsets = [0, 32], sizes = [16, 32], strides = [1, 1]} : vector<16x64xf32> to vector<16x32xf32>
    %125 = vector.extract_strided_slice %117 {offsets = [0, 0], sizes = [16, 8], strides = [1, 1]} : vector<16x32xf32> to vector<16x8xf32>
    %126 = vector.extract_strided_slice %123 {offsets = [0, 0], sizes = [16, 8], strides = [1, 1]} : vector<16x32xf32> to vector<16x8xf32>
    %127 = vector.extract_strided_slice %124 {offsets = [0, 0], sizes = [16, 8], strides = [1, 1]} : vector<16x32xf32> to vector<16x8xf32>
    "tpu.trace_start"() <{level = 10 : i32, message = "qd,kd->qk"}> : () -> ()
    %cst_45 = arith.constant dense<0.000000e+00> : vector<16x16xf32>
    %128 = tpu.matmul %125, %126, %cst_45 {dimension_numbers = #tpu.dot_dimension_numbers<[1], [1], [0], [0], [0, 0, 1, 0], [], []>} : vector<16x8xf32>, vector<16x8xf32>, vector<16x16xf32> -> vector<16x16xf32>
    "tpu.trace_stop"() : () -> ()
    %129 = arith.addf %128, %3 : vector<16x16xf32>
    %cst_46 = arith.constant dense<0xFF800000> : vector<16xf32>
    %130 = vector.multi_reduction <maximumf>, %129, %cst_46 [1] : vector<16x16xf32> to vector<16xf32>
    %131 = vector.shape_cast %130 : vector<16xf32> to vector<16x1xf32>
    %132 = vector.broadcast %131 : vector<16x1xf32> to vector<16x16xf32>
    %133 = arith.subf %129, %132 : vector<16x16xf32>
    %134 = math.exp %133 : vector<16x16xf32>
    %cst_47 = arith.constant dense<0.000000e+00> : vector<16xf32>
    %135 = vector.multi_reduction <add>, %134, %cst_47 [1] : vector<16x16xf32> to vector<16xf32>
    %136 = vector.shape_cast %135 : vector<16xf32> to vector<16x1xf32>
    %137 = vector.broadcast %136 : vector<16x1xf32> to vector<16x16xf32>
    %138 = arith.divf %134, %137 : vector<16x16xf32>
    %cst_48 = arith.constant dense<0.000000e+00> : vector<16x8xf32>
    %139 = tpu.matmul %138, %127, %cst_48 {dimension_numbers = #tpu.dot_dimension_numbers<[1], [0], [0], [1], [0, 0, 1, 1], [], []>} : vector<16x16xf32>, vector<16x8xf32>, vector<16x8xf32> -> vector<16x8xf32>
    %140 = vector.extract_strided_slice %117 {offsets = [0, 8], sizes = [16, 8], strides = [1, 1]} : vector<16x32xf32> to vector<16x8xf32>
    %141 = vector.extract_strided_slice %123 {offsets = [0, 8], sizes = [16, 8], strides = [1, 1]} : vector<16x32xf32> to vector<16x8xf32>
    %142 = vector.extract_strided_slice %124 {offsets = [0, 8], sizes = [16, 8], strides = [1, 1]} : vector<16x32xf32> to vector<16x8xf32>
    "tpu.trace_start"() <{level = 10 : i32, message = "qd,kd->qk"}> : () -> ()
    %cst_49 = arith.constant dense<0.000000e+00> : vector<16x16xf32>
    %143 = tpu.matmul %140, %141, %cst_49 {dimension_numbers = #tpu.dot_dimension_numbers<[1], [1], [0], [0], [0, 0, 1, 0], [], []>} : vector<16x8xf32>, vector<16x8xf32>, vector<16x16xf32> -> vector<16x16xf32>
    "tpu.trace_stop"() : () -> ()
    %144 = arith.addf %143, %3 : vector<16x16xf32>
    %cst_50 = arith.constant dense<0xFF800000> : vector<16xf32>
    %145 = vector.multi_reduction <maximumf>, %144, %cst_50 [1] : vector<16x16xf32> to vector<16xf32>
    %146 = vector.shape_cast %145 : vector<16xf32> to vector<16x1xf32>
    %147 = vector.broadcast %146 : vector<16x1xf32> to vector<16x16xf32>
    %148 = arith.subf %144, %147 : vector<16x16xf32>
    %149 = math.exp %148 : vector<16x16xf32>
    %cst_51 = arith.constant dense<0.000000e+00> : vector<16xf32>
    %150 = vector.multi_reduction <add>, %149, %cst_51 [1] : vector<16x16xf32> to vector<16xf32>
    %151 = vector.shape_cast %150 : vector<16xf32> to vector<16x1xf32>
    %152 = vector.broadcast %151 : vector<16x1xf32> to vector<16x16xf32>
    %153 = arith.divf %149, %152 : vector<16x16xf32>
    %cst_52 = arith.constant dense<0.000000e+00> : vector<16x8xf32>
    %154 = tpu.matmul %153, %142, %cst_52 {dimension_numbers = #tpu.dot_dimension_numbers<[1], [0], [0], [1], [0, 0, 1, 1], [], []>} : vector<16x16xf32>, vector<16x8xf32>, vector<16x8xf32> -> vector<16x8xf32>
    %155 = vector.extract_strided_slice %117 {offsets = [0, 16], sizes = [16, 8], strides = [1, 1]} : vector<16x32xf32> to vector<16x8xf32>
    %156 = vector.extract_strided_slice %123 {offsets = [0, 16], sizes = [16, 8], strides = [1, 1]} : vector<16x32xf32> to vector<16x8xf32>
    %157 = vector.extract_strided_slice %124 {offsets = [0, 16], sizes = [16, 8], strides = [1, 1]} : vector<16x32xf32> to vector<16x8xf32>
    "tpu.trace_start"() <{level = 10 : i32, message = "qd,kd->qk"}> : () -> ()
    %cst_53 = arith.constant dense<0.000000e+00> : vector<16x16xf32>
    %158 = tpu.matmul %155, %156, %cst_53 {dimension_numbers = #tpu.dot_dimension_numbers<[1], [1], [0], [0], [0, 0, 1, 0], [], []>} : vector<16x8xf32>, vector<16x8xf32>, vector<16x16xf32> -> vector<16x16xf32>
    "tpu.trace_stop"() : () -> ()
    %159 = arith.addf %158, %3 : vector<16x16xf32>
    %cst_54 = arith.constant dense<0xFF800000> : vector<16xf32>
    %160 = vector.multi_reduction <maximumf>, %159, %cst_54 [1] : vector<16x16xf32> to vector<16xf32>
    %161 = vector.shape_cast %160 : vector<16xf32> to vector<16x1xf32>
    %162 = vector.broadcast %161 : vector<16x1xf32> to vector<16x16xf32>
    %163 = arith.subf %159, %162 : vector<16x16xf32>
    %164 = math.exp %163 : vector<16x16xf32>
    %cst_55 = arith.constant dense<0.000000e+00> : vector<16xf32>
    %165 = vector.multi_reduction <add>, %164, %cst_55 [1] : vector<16x16xf32> to vector<16xf32>
    %166 = vector.shape_cast %165 : vector<16xf32> to vector<16x1xf32>
    %167 = vector.broadcast %166 : vector<16x1xf32> to vector<16x16xf32>
    %168 = arith.divf %164, %167 : vector<16x16xf32>
    %cst_56 = arith.constant dense<0.000000e+00> : vector<16x8xf32>
    %169 = tpu.matmul %168, %157, %cst_56 {dimension_numbers = #tpu.dot_dimension_numbers<[1], [0], [0], [1], [0, 0, 1, 1], [], []>} : vector<16x16xf32>, vector<16x8xf32>, vector<16x8xf32> -> vector<16x8xf32>
    %170 = vector.extract_strided_slice %117 {offsets = [0, 24], sizes = [16, 8], strides = [1, 1]} : vector<16x32xf32> to vector<16x8xf32>
    %171 = vector.extract_strided_slice %123 {offsets = [0, 24], sizes = [16, 8], strides = [1, 1]} : vector<16x32xf32> to vector<16x8xf32>
    %172 = vector.extract_strided_slice %124 {offsets = [0, 24], sizes = [16, 8], strides = [1, 1]} : vector<16x32xf32> to vector<16x8xf32>
    "tpu.trace_start"() <{level = 10 : i32, message = "qd,kd->qk"}> : () -> ()
    %cst_57 = arith.constant dense<0.000000e+00> : vector<16x16xf32>
    %173 = tpu.matmul %170, %171, %cst_57 {dimension_numbers = #tpu.dot_dimension_numbers<[1], [1], [0], [0], [0, 0, 1, 0], [], []>} : vector<16x8xf32>, vector<16x8xf32>, vector<16x16xf32> -> vector<16x16xf32>
    "tpu.trace_stop"() : () -> ()
    %174 = arith.addf %173, %3 : vector<16x16xf32>
    %cst_58 = arith.constant dense<0xFF800000> : vector<16xf32>
    %175 = vector.multi_reduction <maximumf>, %174, %cst_58 [1] : vector<16x16xf32> to vector<16xf32>
    %176 = vector.shape_cast %175 : vector<16xf32> to vector<16x1xf32>
    %177 = vector.broadcast %176 : vector<16x1xf32> to vector<16x16xf32>
    %178 = arith.subf %174, %177 : vector<16x16xf32>
    %179 = math.exp %178 : vector<16x16xf32>
    %cst_59 = arith.constant dense<0.000000e+00> : vector<16xf32>
    %180 = vector.multi_reduction <add>, %179, %cst_59 [1] : vector<16x16xf32> to vector<16xf32>
    %181 = vector.shape_cast %180 : vector<16xf32> to vector<16x1xf32>
    %182 = vector.broadcast %181 : vector<16x1xf32> to vector<16x16xf32>
    %183 = arith.divf %179, %182 : vector<16x16xf32>
    %cst_60 = arith.constant dense<0.000000e+00> : vector<16x8xf32>
    %184 = tpu.matmul %183, %172, %cst_60 {dimension_numbers = #tpu.dot_dimension_numbers<[1], [0], [0], [1], [0, 0, 1, 1], [], []>} : vector<16x16xf32>, vector<16x8xf32>, vector<16x8xf32> -> vector<16x8xf32>
    %185 = tpu.concatenate %139, %154, %169, %184 in 1 : vector<16x8xf32>, vector<16x8xf32>, vector<16x8xf32>, vector<16x8xf32> -> vector<16x32xf32>
    %186 = arith.addf %112, %185 : vector<16x32xf32>
    %cst_61 = arith.constant dense<0.000000e+00> : vector<16xf32>
    %187 = vector.multi_reduction <add>, %186, %cst_61 [1] : vector<16x32xf32> to vector<16xf32>
    %188 = vector.shape_cast %187 : vector<16xf32> to vector<16x1xf32>
    %cst_62 = arith.constant 3.200000e+01 : f32
    %189 = vector.broadcast %cst_62 : f32 to vector<16x1xf32>
    %190 = arith.divf %188, %189 : vector<16x1xf32>
    %191 = vector.broadcast %190 : vector<16x1xf32> to vector<16x32xf32>
    %192 = arith.subf %186, %191 : vector<16x32xf32>
    %193 = arith.mulf %192, %192 : vector<16x32xf32>
    %cst_63 = arith.constant dense<0.000000e+00> : vector<16xf32>
    %194 = vector.multi_reduction <add>, %193, %cst_63 [1] : vector<16x32xf32> to vector<16xf32>
    %195 = vector.shape_cast %194 : vector<16xf32> to vector<16x1xf32>
    %cst_64 = arith.constant 3.200000e+01 : f32
    %196 = vector.broadcast %cst_64 : f32 to vector<16x1xf32>
    %197 = arith.divf %195, %196 : vector<16x1xf32>
    %198 = vector.broadcast %190 : vector<16x1xf32> to vector<16x32xf32>
    %199 = arith.subf %186, %198 : vector<16x32xf32>
    %cst_65 = arith.constant 9.99999996E-13 : f32
    %200 = vector.broadcast %cst_65 : f32 to vector<16x1xf32>
    %201 = arith.addf %197, %200 : vector<16x1xf32>
    %202 = math.sqrt %201 : vector<16x1xf32>
    %203 = vector.broadcast %202 : vector<16x1xf32> to vector<16x32xf32>
    %204 = arith.divf %199, %203 : vector<16x32xf32>
    %205 = vector.broadcast %19 : vector<1x32xf32> to vector<16x32xf32>
    %206 = arith.mulf %205, %204 : vector<16x32xf32>
    %207 = vector.broadcast %20 : vector<1x32xf32> to vector<16x32xf32>
    %208 = arith.addf %206, %207 : vector<16x32xf32>
    %cst_66 = arith.constant dense<0.000000e+00> : vector<16x32xf32>
    %209 = tpu.matmul %208, %9, %cst_66 {dimension_numbers = #tpu.dot_dimension_numbers<[1], [0], [0], [1], [0, 0, 1, 1], [], []>} : vector<16x32xf32>, vector<32x32xf32>, vector<16x32xf32> -> vector<16x32xf32>
    %210 = vector.broadcast %16 : vector<1x32xf32> to vector<16x32xf32>
    %211 = arith.addf %209, %210 : vector<16x32xf32>
    %212 = arith.addf %211, %208 : vector<16x32xf32>
    %cst_67 = arith.constant dense<0.000000e+00> : vector<16xf32>
    %213 = vector.multi_reduction <add>, %212, %cst_67 [1] : vector<16x32xf32> to vector<16xf32>
    %214 = vector.shape_cast %213 : vector<16xf32> to vector<16x1xf32>
    %cst_68 = arith.constant 3.200000e+01 : f32
    %215 = vector.broadcast %cst_68 : f32 to vector<16x1xf32>
    %216 = arith.divf %214, %215 : vector<16x1xf32>
    %217 = vector.broadcast %216 : vector<16x1xf32> to vector<16x32xf32>
    %218 = arith.subf %212, %217 : vector<16x32xf32>
    %219 = arith.mulf %218, %218 : vector<16x32xf32>
    %cst_69 = arith.constant dense<0.000000e+00> : vector<16xf32>
    %220 = vector.multi_reduction <add>, %219, %cst_69 [1] : vector<16x32xf32> to vector<16xf32>
    %221 = vector.shape_cast %220 : vector<16xf32> to vector<16x1xf32>
    %cst_70 = arith.constant 3.200000e+01 : f32
    %222 = vector.broadcast %cst_70 : f32 to vector<16x1xf32>
    %223 = arith.divf %221, %222 : vector<16x1xf32>
    %224 = vector.broadcast %216 : vector<16x1xf32> to vector<16x32xf32>
    %225 = arith.subf %212, %224 : vector<16x32xf32>
    %cst_71 = arith.constant 9.99999996E-13 : f32
    %226 = vector.broadcast %cst_71 : f32 to vector<16x1xf32>
    %227 = arith.addf %223, %226 : vector<16x1xf32>
    %228 = math.sqrt %227 : vector<16x1xf32>
    %229 = vector.broadcast %228 : vector<16x1xf32> to vector<16x32xf32>
    %230 = arith.divf %225, %229 : vector<16x32xf32>
    %231 = vector.broadcast %21 : vector<1x32xf32> to vector<16x32xf32>
    %232 = arith.mulf %231, %230 : vector<16x32xf32>
    %233 = vector.broadcast %22 : vector<1x32xf32> to vector<16x32xf32>
    %234 = arith.addf %232, %233 : vector<16x32xf32>
    %c1 = arith.constant 1 : index
    %c0_72 = arith.constant 0 : index
    %c0_73 = arith.constant 0 : index
    %235 = vector.load %arg4[%c1, %c0_72, %c0_73] : memref<2x32x96xf32, #tpu.memory_space<vmem>>, vector<1x32x96xf32>
    %236 = vector.shape_cast %235 : vector<1x32x96xf32> to vector<32x96xf32>
    %c1_74 = arith.constant 1 : index
    %c0_75 = arith.constant 0 : index
    %c0_76 = arith.constant 0 : index
    %237 = vector.load %arg5[%c1_74, %c0_75, %c0_76] : memref<2x32x96xf32, #tpu.memory_space<vmem>>, vector<1x32x96xf32>
    %238 = vector.shape_cast %237 : vector<1x32x96xf32> to vector<32x96xf32>
    %c1_77 = arith.constant 1 : index
    %c0_78 = arith.constant 0 : index
    %c0_79 = arith.constant 0 : index
    %239 = vector.load %arg6[%c1_77, %c0_78, %c0_79] : memref<2x32x32xf32, #tpu.memory_space<vmem>>, vector<1x32x32xf32>
    %240 = vector.shape_cast %239 : vector<1x32x32xf32> to vector<32x32xf32>
    %c1_80 = arith.constant 1 : index
    %c0_81 = arith.constant 0 : index
    %c0_82 = arith.constant 0 : index
    %241 = vector.load %arg7[%c1_80, %c0_81, %c0_82] : memref<2x2x96xf32, #tpu.memory_space<vmem>>, vector<1x2x96xf32>
    %242 = vector.shape_cast %241 : vector<1x2x96xf32> to vector<2x96xf32>
    %243 = vector.extract_strided_slice %242 {offsets = [0, 0], sizes = [1, 96], strides = [1, 1]} : vector<2x96xf32> to vector<1x96xf32>
    %244 = vector.extract_strided_slice %242 {offsets = [1, 0], sizes = [1, 96], strides = [1, 1]} : vector<2x96xf32> to vector<1x96xf32>
    %c1_83 = arith.constant 1 : index
    %c0_84 = arith.constant 0 : index
    %c0_85 = arith.constant 0 : index
    %245 = vector.load %arg8[%c1_83, %c0_84, %c0_85] : memref<2x7x32xf32, #tpu.memory_space<vmem>>, vector<1x7x32xf32>
    %246 = vector.shape_cast %245 : vector<1x7x32xf32> to vector<7x32xf32>
    %247 = vector.extract_strided_slice %246 {offsets = [0, 0], sizes = [1, 32], strides = [1, 1]} : vector<7x32xf32> to vector<1x32xf32>
    %248 = vector.extract_strided_slice %246 {offsets = [1, 0], sizes = [1, 32], strides = [1, 1]} : vector<7x32xf32> to vector<1x32xf32>
    %249 = vector.extract_strided_slice %246 {offsets = [2, 0], sizes = [1, 32], strides = [1, 1]} : vector<7x32xf32> to vector<1x32xf32>
    %250 = vector.extract_strided_slice %246 {offsets = [3, 0], sizes = [1, 32], strides = [1, 1]} : vector<7x32xf32> to vector<1x32xf32>
    %251 = vector.extract_strided_slice %246 {offsets = [4, 0], sizes = [1, 32], strides = [1, 1]} : vector<7x32xf32> to vector<1x32xf32>
    %252 = vector.extract_strided_slice %246 {offsets = [5, 0], sizes = [1, 32], strides = [1, 1]} : vector<7x32xf32> to vector<1x32xf32>
    %253 = vector.extract_strided_slice %246 {offsets = [6, 0], sizes = [1, 32], strides = [1, 1]} : vector<7x32xf32> to vector<1x32xf32>
    %cst_86 = arith.constant dense<0.000000e+00> : vector<16x96xf32>
    %254 = tpu.matmul %234, %236, %cst_86 {dimension_numbers = #tpu.dot_dimension_numbers<[1], [0], [0], [1], [0, 0, 1, 1], [], []>} : vector<16x32xf32>, vector<32x96xf32>, vector<16x96xf32> -> vector<16x96xf32>
    %255 = vector.broadcast %243 : vector<1x96xf32> to vector<16x96xf32>
    %256 = arith.addf %254, %255 : vector<16x96xf32>
    %257 = vector.extract_strided_slice %256 {offsets = [0, 0], sizes = [16, 32], strides = [1, 1]} : vector<16x96xf32> to vector<16x32xf32>
    %258 = vector.extract_strided_slice %256 {offsets = [0, 32], sizes = [16, 32], strides = [1, 1]} : vector<16x96xf32> to vector<16x32xf32>
    %259 = vector.extract_strided_slice %256 {offsets = [0, 64], sizes = [16, 32], strides = [1, 1]} : vector<16x96xf32> to vector<16x32xf32>
    %260 = vector.extract_strided_slice %257 {offsets = [0, 0], sizes = [16, 8], strides = [1, 1]} : vector<16x32xf32> to vector<16x8xf32>
    %261 = vector.extract_strided_slice %258 {offsets = [0, 0], sizes = [16, 8], strides = [1, 1]} : vector<16x32xf32> to vector<16x8xf32>
    %262 = vector.extract_strided_slice %259 {offsets = [0, 0], sizes = [16, 8], strides = [1, 1]} : vector<16x32xf32> to vector<16x8xf32>
    "tpu.trace_start"() <{level = 10 : i32, message = "qd,kd->qk"}> : () -> ()
    %cst_87 = arith.constant dense<0.000000e+00> : vector<16x16xf32>
    %263 = tpu.matmul %260, %261, %cst_87 {dimension_numbers = #tpu.dot_dimension_numbers<[1], [1], [0], [0], [0, 0, 1, 0], [], []>} : vector<16x8xf32>, vector<16x8xf32>, vector<16x16xf32> -> vector<16x16xf32>
    "tpu.trace_stop"() : () -> ()
    %264 = arith.addf %263, %2 : vector<16x16xf32>
    %cst_88 = arith.constant dense<0xFF800000> : vector<16xf32>
    %265 = vector.multi_reduction <maximumf>, %264, %cst_88 [1] : vector<16x16xf32> to vector<16xf32>
    %266 = vector.shape_cast %265 : vector<16xf32> to vector<16x1xf32>
    %267 = vector.broadcast %266 : vector<16x1xf32> to vector<16x16xf32>
    %268 = arith.subf %264, %267 : vector<16x16xf32>
    %269 = math.exp %268 : vector<16x16xf32>
    %cst_89 = arith.constant dense<0.000000e+00> : vector<16xf32>
    %270 = vector.multi_reduction <add>, %269, %cst_89 [1] : vector<16x16xf32> to vector<16xf32>
    %271 = vector.shape_cast %270 : vector<16xf32> to vector<16x1xf32>
    %272 = vector.broadcast %271 : vector<16x1xf32> to vector<16x16xf32>
    %273 = arith.divf %269, %272 : vector<16x16xf32>
    %cst_90 = arith.constant dense<0.000000e+00> : vector<16x8xf32>
    %274 = tpu.matmul %273, %262, %cst_90 {dimension_numbers = #tpu.dot_dimension_numbers<[1], [0], [0], [1], [0, 0, 1, 1], [], []>} : vector<16x16xf32>, vector<16x8xf32>, vector<16x8xf32> -> vector<16x8xf32>
    %275 = vector.extract_strided_slice %257 {offsets = [0, 8], sizes = [16, 8], strides = [1, 1]} : vector<16x32xf32> to vector<16x8xf32>
    %276 = vector.extract_strided_slice %258 {offsets = [0, 8], sizes = [16, 8], strides = [1, 1]} : vector<16x32xf32> to vector<16x8xf32>
    %277 = vector.extract_strided_slice %259 {offsets = [0, 8], sizes = [16, 8], strides = [1, 1]} : vector<16x32xf32> to vector<16x8xf32>
    "tpu.trace_start"() <{level = 10 : i32, message = "qd,kd->qk"}> : () -> ()
    %cst_91 = arith.constant dense<0.000000e+00> : vector<16x16xf32>
    %278 = tpu.matmul %275, %276, %cst_91 {dimension_numbers = #tpu.dot_dimension_numbers<[1], [1], [0], [0], [0, 0, 1, 0], [], []>} : vector<16x8xf32>, vector<16x8xf32>, vector<16x16xf32> -> vector<16x16xf32>
    "tpu.trace_stop"() : () -> ()
    %279 = arith.addf %278, %2 : vector<16x16xf32>
    %cst_92 = arith.constant dense<0xFF800000> : vector<16xf32>
    %280 = vector.multi_reduction <maximumf>, %279, %cst_92 [1] : vector<16x16xf32> to vector<16xf32>
    %281 = vector.shape_cast %280 : vector<16xf32> to vector<16x1xf32>
    %282 = vector.broadcast %281 : vector<16x1xf32> to vector<16x16xf32>
    %283 = arith.subf %279, %282 : vector<16x16xf32>
    %284 = math.exp %283 : vector<16x16xf32>
    %cst_93 = arith.constant dense<0.000000e+00> : vector<16xf32>
    %285 = vector.multi_reduction <add>, %284, %cst_93 [1] : vector<16x16xf32> to vector<16xf32>
    %286 = vector.shape_cast %285 : vector<16xf32> to vector<16x1xf32>
    %287 = vector.broadcast %286 : vector<16x1xf32> to vector<16x16xf32>
    %288 = arith.divf %284, %287 : vector<16x16xf32>
    %cst_94 = arith.constant dense<0.000000e+00> : vector<16x8xf32>
    %289 = tpu.matmul %288, %277, %cst_94 {dimension_numbers = #tpu.dot_dimension_numbers<[1], [0], [0], [1], [0, 0, 1, 1], [], []>} : vector<16x16xf32>, vector<16x8xf32>, vector<16x8xf32> -> vector<16x8xf32>
    %290 = vector.extract_strided_slice %257 {offsets = [0, 16], sizes = [16, 8], strides = [1, 1]} : vector<16x32xf32> to vector<16x8xf32>
    %291 = vector.extract_strided_slice %258 {offsets = [0, 16], sizes = [16, 8], strides = [1, 1]} : vector<16x32xf32> to vector<16x8xf32>
    %292 = vector.extract_strided_slice %259 {offsets = [0, 16], sizes = [16, 8], strides = [1, 1]} : vector<16x32xf32> to vector<16x8xf32>
    "tpu.trace_start"() <{level = 10 : i32, message = "qd,kd->qk"}> : () -> ()
    %cst_95 = arith.constant dense<0.000000e+00> : vector<16x16xf32>
    %293 = tpu.matmul %290, %291, %cst_95 {dimension_numbers = #tpu.dot_dimension_numbers<[1], [1], [0], [0], [0, 0, 1, 0], [], []>} : vector<16x8xf32>, vector<16x8xf32>, vector<16x16xf32> -> vector<16x16xf32>
    "tpu.trace_stop"() : () -> ()
    %294 = arith.addf %293, %2 : vector<16x16xf32>
    %cst_96 = arith.constant dense<0xFF800000> : vector<16xf32>
    %295 = vector.multi_reduction <maximumf>, %294, %cst_96 [1] : vector<16x16xf32> to vector<16xf32>
    %296 = vector.shape_cast %295 : vector<16xf32> to vector<16x1xf32>
    %297 = vector.broadcast %296 : vector<16x1xf32> to vector<16x16xf32>
    %298 = arith.subf %294, %297 : vector<16x16xf32>
    %299 = math.exp %298 : vector<16x16xf32>
    %cst_97 = arith.constant dense<0.000000e+00> : vector<16xf32>
    %300 = vector.multi_reduction <add>, %299, %cst_97 [1] : vector<16x16xf32> to vector<16xf32>
    %301 = vector.shape_cast %300 : vector<16xf32> to vector<16x1xf32>
    %302 = vector.broadcast %301 : vector<16x1xf32> to vector<16x16xf32>
    %303 = arith.divf %299, %302 : vector<16x16xf32>
    %cst_98 = arith.constant dense<0.000000e+00> : vector<16x8xf32>
    %304 = tpu.matmul %303, %292, %cst_98 {dimension_numbers = #tpu.dot_dimension_numbers<[1], [0], [0], [1], [0, 0, 1, 1], [], []>} : vector<16x16xf32>, vector<16x8xf32>, vector<16x8xf32> -> vector<16x8xf32>
    %305 = vector.extract_strided_slice %257 {offsets = [0, 24], sizes = [16, 8], strides = [1, 1]} : vector<16x32xf32> to vector<16x8xf32>
    %306 = vector.extract_strided_slice %258 {offsets = [0, 24], sizes = [16, 8], strides = [1, 1]} : vector<16x32xf32> to vector<16x8xf32>
    %307 = vector.extract_strided_slice %259 {offsets = [0, 24], sizes = [16, 8], strides = [1, 1]} : vector<16x32xf32> to vector<16x8xf32>
    "tpu.trace_start"() <{level = 10 : i32, message = "qd,kd->qk"}> : () -> ()
    %cst_99 = arith.constant dense<0.000000e+00> : vector<16x16xf32>
    %308 = tpu.matmul %305, %306, %cst_99 {dimension_numbers = #tpu.dot_dimension_numbers<[1], [1], [0], [0], [0, 0, 1, 0], [], []>} : vector<16x8xf32>, vector<16x8xf32>, vector<16x16xf32> -> vector<16x16xf32>
    "tpu.trace_stop"() : () -> ()
    %309 = arith.addf %308, %2 : vector<16x16xf32>
    %cst_100 = arith.constant dense<0xFF800000> : vector<16xf32>
    %310 = vector.multi_reduction <maximumf>, %309, %cst_100 [1] : vector<16x16xf32> to vector<16xf32>
    %311 = vector.shape_cast %310 : vector<16xf32> to vector<16x1xf32>
    %312 = vector.broadcast %311 : vector<16x1xf32> to vector<16x16xf32>
    %313 = arith.subf %309, %312 : vector<16x16xf32>
    %314 = math.exp %313 : vector<16x16xf32>
    %cst_101 = arith.constant dense<0.000000e+00> : vector<16xf32>
    %315 = vector.multi_reduction <add>, %314, %cst_101 [1] : vector<16x16xf32> to vector<16xf32>
    %316 = vector.shape_cast %315 : vector<16xf32> to vector<16x1xf32>
    %317 = vector.broadcast %316 : vector<16x1xf32> to vector<16x16xf32>
    %318 = arith.divf %314, %317 : vector<16x16xf32>
    %cst_102 = arith.constant dense<0.000000e+00> : vector<16x8xf32>
    %319 = tpu.matmul %318, %307, %cst_102 {dimension_numbers = #tpu.dot_dimension_numbers<[1], [0], [0], [1], [0, 0, 1, 1], [], []>} : vector<16x16xf32>, vector<16x8xf32>, vector<16x8xf32> -> vector<16x8xf32>
    %320 = tpu.concatenate %274, %289, %304, %319 in 1 : vector<16x8xf32>, vector<16x8xf32>, vector<16x8xf32>, vector<16x8xf32> -> vector<16x32xf32>
    %321 = arith.addf %320, %234 : vector<16x32xf32>
    %cst_103 = arith.constant dense<0.000000e+00> : vector<16xf32>
    %322 = vector.multi_reduction <add>, %321, %cst_103 [1] : vector<16x32xf32> to vector<16xf32>
    %323 = vector.shape_cast %322 : vector<16xf32> to vector<16x1xf32>
    %cst_104 = arith.constant 3.200000e+01 : f32
    %324 = vector.broadcast %cst_104 : f32 to vector<16x1xf32>
    %325 = arith.divf %323, %324 : vector<16x1xf32>
    %326 = vector.broadcast %325 : vector<16x1xf32> to vector<16x32xf32>
    %327 = arith.subf %321, %326 : vector<16x32xf32>
    %328 = arith.mulf %327, %327 : vector<16x32xf32>
    %cst_105 = arith.constant dense<0.000000e+00> : vector<16xf32>
    %329 = vector.multi_reduction <add>, %328, %cst_105 [1] : vector<16x32xf32> to vector<16xf32>
    %330 = vector.shape_cast %329 : vector<16xf32> to vector<16x1xf32>
    %cst_106 = arith.constant 3.200000e+01 : f32
    %331 = vector.broadcast %cst_106 : f32 to vector<16x1xf32>
    %332 = arith.divf %330, %331 : vector<16x1xf32>
    %333 = vector.broadcast %325 : vector<16x1xf32> to vector<16x32xf32>
    %334 = arith.subf %321, %333 : vector<16x32xf32>
    %cst_107 = arith.constant 9.99999996E-13 : f32
    %335 = vector.broadcast %cst_107 : f32 to vector<16x1xf32>
    %336 = arith.addf %332, %335 : vector<16x1xf32>
    %337 = math.sqrt %336 : vector<16x1xf32>
    %338 = vector.broadcast %337 : vector<16x1xf32> to vector<16x32xf32>
    %339 = arith.divf %334, %338 : vector<16x32xf32>
    %340 = vector.broadcast %248 : vector<1x32xf32> to vector<16x32xf32>
    %341 = arith.mulf %340, %339 : vector<16x32xf32>
    %342 = vector.broadcast %249 : vector<1x32xf32> to vector<16x32xf32>
    %343 = arith.addf %341, %342 : vector<16x32xf32>
    %344 = vector.extract_strided_slice %238 {offsets = [0, 0], sizes = [32, 32], strides = [1, 1]} : vector<32x96xf32> to vector<32x32xf32>
    %cst_108 = arith.constant dense<0.000000e+00> : vector<16x32xf32>
    %345 = tpu.matmul %343, %344, %cst_108 {dimension_numbers = #tpu.dot_dimension_numbers<[1], [0], [0], [1], [0, 0, 1, 1], [], []>} : vector<16x32xf32>, vector<32x32xf32>, vector<16x32xf32> -> vector<16x32xf32>
    %346 = vector.extract_strided_slice %244 {offsets = [0, 0], sizes = [1, 32], strides = [1, 1]} : vector<1x96xf32> to vector<1x32xf32>
    %347 = vector.broadcast %346 : vector<1x32xf32> to vector<16x32xf32>
    %348 = arith.addf %345, %347 : vector<16x32xf32>
    %349 = vector.extract_strided_slice %238 {offsets = [0, 32], sizes = [32, 64], strides = [1, 1]} : vector<32x96xf32> to vector<32x64xf32>
    %cst_109 = arith.constant dense<0.000000e+00> : vector<16x64xf32>
    %350 = tpu.matmul %1, %349, %cst_109 {dimension_numbers = #tpu.dot_dimension_numbers<[1], [0], [0], [1], [0, 0, 1, 1], [], []>} : vector<16x32xf32>, vector<32x64xf32>, vector<16x64xf32> -> vector<16x64xf32>
    %351 = vector.extract_strided_slice %244 {offsets = [0, 32], sizes = [1, 64], strides = [1, 1]} : vector<1x96xf32> to vector<1x64xf32>
    %352 = vector.broadcast %351 : vector<1x64xf32> to vector<16x64xf32>
    %353 = arith.addf %350, %352 : vector<16x64xf32>
    %354 = vector.extract_strided_slice %353 {offsets = [0, 0], sizes = [16, 32], strides = [1, 1]} : vector<16x64xf32> to vector<16x32xf32>
    %355 = vector.extract_strided_slice %353 {offsets = [0, 32], sizes = [16, 32], strides = [1, 1]} : vector<16x64xf32> to vector<16x32xf32>
    %356 = vector.extract_strided_slice %348 {offsets = [0, 0], sizes = [16, 8], strides = [1, 1]} : vector<16x32xf32> to vector<16x8xf32>
    %357 = vector.extract_strided_slice %354 {offsets = [0, 0], sizes = [16, 8], strides = [1, 1]} : vector<16x32xf32> to vector<16x8xf32>
    %358 = vector.extract_strided_slice %355 {offsets = [0, 0], sizes = [16, 8], strides = [1, 1]} : vector<16x32xf32> to vector<16x8xf32>
    "tpu.trace_start"() <{level = 10 : i32, message = "qd,kd->qk"}> : () -> ()
    %cst_110 = arith.constant dense<0.000000e+00> : vector<16x16xf32>
    %359 = tpu.matmul %356, %357, %cst_110 {dimension_numbers = #tpu.dot_dimension_numbers<[1], [1], [0], [0], [0, 0, 1, 0], [], []>} : vector<16x8xf32>, vector<16x8xf32>, vector<16x16xf32> -> vector<16x16xf32>
    "tpu.trace_stop"() : () -> ()
    %360 = arith.addf %359, %3 : vector<16x16xf32>
    %cst_111 = arith.constant dense<0xFF800000> : vector<16xf32>
    %361 = vector.multi_reduction <maximumf>, %360, %cst_111 [1] : vector<16x16xf32> to vector<16xf32>
    %362 = vector.shape_cast %361 : vector<16xf32> to vector<16x1xf32>
    %363 = vector.broadcast %362 : vector<16x1xf32> to vector<16x16xf32>
    %364 = arith.subf %360, %363 : vector<16x16xf32>
    %365 = math.exp %364 : vector<16x16xf32>
    %cst_112 = arith.constant dense<0.000000e+00> : vector<16xf32>
    %366 = vector.multi_reduction <add>, %365, %cst_112 [1] : vector<16x16xf32> to vector<16xf32>
    %367 = vector.shape_cast %366 : vector<16xf32> to vector<16x1xf32>
    %368 = vector.broadcast %367 : vector<16x1xf32> to vector<16x16xf32>
    %369 = arith.divf %365, %368 : vector<16x16xf32>
    %cst_113 = arith.constant dense<0.000000e+00> : vector<16x8xf32>
    %370 = tpu.matmul %369, %358, %cst_113 {dimension_numbers = #tpu.dot_dimension_numbers<[1], [0], [0], [1], [0, 0, 1, 1], [], []>} : vector<16x16xf32>, vector<16x8xf32>, vector<16x8xf32> -> vector<16x8xf32>
    %371 = vector.extract_strided_slice %348 {offsets = [0, 8], sizes = [16, 8], strides = [1, 1]} : vector<16x32xf32> to vector<16x8xf32>
    %372 = vector.extract_strided_slice %354 {offsets = [0, 8], sizes = [16, 8], strides = [1, 1]} : vector<16x32xf32> to vector<16x8xf32>
    %373 = vector.extract_strided_slice %355 {offsets = [0, 8], sizes = [16, 8], strides = [1, 1]} : vector<16x32xf32> to vector<16x8xf32>
    "tpu.trace_start"() <{level = 10 : i32, message = "qd,kd->qk"}> : () -> ()
    %cst_114 = arith.constant dense<0.000000e+00> : vector<16x16xf32>
    %374 = tpu.matmul %371, %372, %cst_114 {dimension_numbers = #tpu.dot_dimension_numbers<[1], [1], [0], [0], [0, 0, 1, 0], [], []>} : vector<16x8xf32>, vector<16x8xf32>, vector<16x16xf32> -> vector<16x16xf32>
    "tpu.trace_stop"() : () -> ()
    %375 = arith.addf %374, %3 : vector<16x16xf32>
    %cst_115 = arith.constant dense<0xFF800000> : vector<16xf32>
    %376 = vector.multi_reduction <maximumf>, %375, %cst_115 [1] : vector<16x16xf32> to vector<16xf32>
    %377 = vector.shape_cast %376 : vector<16xf32> to vector<16x1xf32>
    %378 = vector.broadcast %377 : vector<16x1xf32> to vector<16x16xf32>
    %379 = arith.subf %375, %378 : vector<16x16xf32>
    %380 = math.exp %379 : vector<16x16xf32>
    %cst_116 = arith.constant dense<0.000000e+00> : vector<16xf32>
    %381 = vector.multi_reduction <add>, %380, %cst_116 [1] : vector<16x16xf32> to vector<16xf32>
    %382 = vector.shape_cast %381 : vector<16xf32> to vector<16x1xf32>
    %383 = vector.broadcast %382 : vector<16x1xf32> to vector<16x16xf32>
    %384 = arith.divf %380, %383 : vector<16x16xf32>
    %cst_117 = arith.constant dense<0.000000e+00> : vector<16x8xf32>
    %385 = tpu.matmul %384, %373, %cst_117 {dimension_numbers = #tpu.dot_dimension_numbers<[1], [0], [0], [1], [0, 0, 1, 1], [], []>} : vector<16x16xf32>, vector<16x8xf32>, vector<16x8xf32> -> vector<16x8xf32>
    %386 = vector.extract_strided_slice %348 {offsets = [0, 16], sizes = [16, 8], strides = [1, 1]} : vector<16x32xf32> to vector<16x8xf32>
    %387 = vector.extract_strided_slice %354 {offsets = [0, 16], sizes = [16, 8], strides = [1, 1]} : vector<16x32xf32> to vector<16x8xf32>
    %388 = vector.extract_strided_slice %355 {offsets = [0, 16], sizes = [16, 8], strides = [1, 1]} : vector<16x32xf32> to vector<16x8xf32>
    "tpu.trace_start"() <{level = 10 : i32, message = "qd,kd->qk"}> : () -> ()
    %cst_118 = arith.constant dense<0.000000e+00> : vector<16x16xf32>
    %389 = tpu.matmul %386, %387, %cst_118 {dimension_numbers = #tpu.dot_dimension_numbers<[1], [1], [0], [0], [0, 0, 1, 0], [], []>} : vector<16x8xf32>, vector<16x8xf32>, vector<16x16xf32> -> vector<16x16xf32>
    "tpu.trace_stop"() : () -> ()
    %390 = arith.addf %389, %3 : vector<16x16xf32>
    %cst_119 = arith.constant dense<0xFF800000> : vector<16xf32>
    %391 = vector.multi_reduction <maximumf>, %390, %cst_119 [1] : vector<16x16xf32> to vector<16xf32>
    %392 = vector.shape_cast %391 : vector<16xf32> to vector<16x1xf32>
    %393 = vector.broadcast %392 : vector<16x1xf32> to vector<16x16xf32>
    %394 = arith.subf %390, %393 : vector<16x16xf32>
    %395 = math.exp %394 : vector<16x16xf32>
    %cst_120 = arith.constant dense<0.000000e+00> : vector<16xf32>
    %396 = vector.multi_reduction <add>, %395, %cst_120 [1] : vector<16x16xf32> to vector<16xf32>
    %397 = vector.shape_cast %396 : vector<16xf32> to vector<16x1xf32>
    %398 = vector.broadcast %397 : vector<16x1xf32> to vector<16x16xf32>
    %399 = arith.divf %395, %398 : vector<16x16xf32>
    %cst_121 = arith.constant dense<0.000000e+00> : vector<16x8xf32>
    %400 = tpu.matmul %399, %388, %cst_121 {dimension_numbers = #tpu.dot_dimension_numbers<[1], [0], [0], [1], [0, 0, 1, 1], [], []>} : vector<16x16xf32>, vector<16x8xf32>, vector<16x8xf32> -> vector<16x8xf32>
    %401 = vector.extract_strided_slice %348 {offsets = [0, 24], sizes = [16, 8], strides = [1, 1]} : vector<16x32xf32> to vector<16x8xf32>
    %402 = vector.extract_strided_slice %354 {offsets = [0, 24], sizes = [16, 8], strides = [1, 1]} : vector<16x32xf32> to vector<16x8xf32>
    %403 = vector.extract_strided_slice %355 {offsets = [0, 24], sizes = [16, 8], strides = [1, 1]} : vector<16x32xf32> to vector<16x8xf32>
    "tpu.trace_start"() <{level = 10 : i32, message = "qd,kd->qk"}> : () -> ()
    %cst_122 = arith.constant dense<0.000000e+00> : vector<16x16xf32>
    %404 = tpu.matmul %401, %402, %cst_122 {dimension_numbers = #tpu.dot_dimension_numbers<[1], [1], [0], [0], [0, 0, 1, 0], [], []>} : vector<16x8xf32>, vector<16x8xf32>, vector<16x16xf32> -> vector<16x16xf32>
    "tpu.trace_stop"() : () -> ()
    %405 = arith.addf %404, %3 : vector<16x16xf32>
    %cst_123 = arith.constant dense<0xFF800000> : vector<16xf32>
    %406 = vector.multi_reduction <maximumf>, %405, %cst_123 [1] : vector<16x16xf32> to vector<16xf32>
    %407 = vector.shape_cast %406 : vector<16xf32> to vector<16x1xf32>
    %408 = vector.broadcast %407 : vector<16x1xf32> to vector<16x16xf32>
    %409 = arith.subf %405, %408 : vector<16x16xf32>
    %410 = math.exp %409 : vector<16x16xf32>
    %cst_124 = arith.constant dense<0.000000e+00> : vector<16xf32>
    %411 = vector.multi_reduction <add>, %410, %cst_124 [1] : vector<16x16xf32> to vector<16xf32>
    %412 = vector.shape_cast %411 : vector<16xf32> to vector<16x1xf32>
    %413 = vector.broadcast %412 : vector<16x1xf32> to vector<16x16xf32>
    %414 = arith.divf %410, %413 : vector<16x16xf32>
    %cst_125 = arith.constant dense<0.000000e+00> : vector<16x8xf32>
    %415 = tpu.matmul %414, %403, %cst_125 {dimension_numbers = #tpu.dot_dimension_numbers<[1], [0], [0], [1], [0, 0, 1, 1], [], []>} : vector<16x16xf32>, vector<16x8xf32>, vector<16x8xf32> -> vector<16x8xf32>
    %416 = tpu.concatenate %370, %385, %400, %415 in 1 : vector<16x8xf32>, vector<16x8xf32>, vector<16x8xf32>, vector<16x8xf32> -> vector<16x32xf32>
    %417 = arith.addf %343, %416 : vector<16x32xf32>
    %cst_126 = arith.constant dense<0.000000e+00> : vector<16xf32>
    %418 = vector.multi_reduction <add>, %417, %cst_126 [1] : vector<16x32xf32> to vector<16xf32>
    %419 = vector.shape_cast %418 : vector<16xf32> to vector<16x1xf32>
    %cst_127 = arith.constant 3.200000e+01 : f32
    %420 = vector.broadcast %cst_127 : f32 to vector<16x1xf32>
    %421 = arith.divf %419, %420 : vector<16x1xf32>
    %422 = vector.broadcast %421 : vector<16x1xf32> to vector<16x32xf32>
    %423 = arith.subf %417, %422 : vector<16x32xf32>
    %424 = arith.mulf %423, %423 : vector<16x32xf32>
    %cst_128 = arith.constant dense<0.000000e+00> : vector<16xf32>
    %425 = vector.multi_reduction <add>, %424, %cst_128 [1] : vector<16x32xf32> to vector<16xf32>
    %426 = vector.shape_cast %425 : vector<16xf32> to vector<16x1xf32>
    %cst_129 = arith.constant 3.200000e+01 : f32
    %427 = vector.broadcast %cst_129 : f32 to vector<16x1xf32>
    %428 = arith.divf %426, %427 : vector<16x1xf32>
    %429 = vector.broadcast %421 : vector<16x1xf32> to vector<16x32xf32>
    %430 = arith.subf %417, %429 : vector<16x32xf32>
    %cst_130 = arith.constant 9.99999996E-13 : f32
    %431 = vector.broadcast %cst_130 : f32 to vector<16x1xf32>
    %432 = arith.addf %428, %431 : vector<16x1xf32>
    %433 = math.sqrt %432 : vector<16x1xf32>
    %434 = vector.broadcast %433 : vector<16x1xf32> to vector<16x32xf32>
    %435 = arith.divf %430, %434 : vector<16x32xf32>
    %436 = vector.broadcast %250 : vector<1x32xf32> to vector<16x32xf32>
    %437 = arith.mulf %436, %435 : vector<16x32xf32>
    %438 = vector.broadcast %251 : vector<1x32xf32> to vector<16x32xf32>
    %439 = arith.addf %437, %438 : vector<16x32xf32>
    %cst_131 = arith.constant dense<0.000000e+00> : vector<16x32xf32>
    %440 = tpu.matmul %439, %240, %cst_131 {dimension_numbers = #tpu.dot_dimension_numbers<[1], [0], [0], [1], [0, 0, 1, 1], [], []>} : vector<16x32xf32>, vector<32x32xf32>, vector<16x32xf32> -> vector<16x32xf32>
    %441 = vector.broadcast %247 : vector<1x32xf32> to vector<16x32xf32>
    %442 = arith.addf %440, %441 : vector<16x32xf32>
    %443 = arith.addf %442, %439 : vector<16x32xf32>
    %cst_132 = arith.constant dense<0.000000e+00> : vector<16xf32>
    %444 = vector.multi_reduction <add>, %443, %cst_132 [1] : vector<16x32xf32> to vector<16xf32>
    %445 = vector.shape_cast %444 : vector<16xf32> to vector<16x1xf32>
    %cst_133 = arith.constant 3.200000e+01 : f32
    %446 = vector.broadcast %cst_133 : f32 to vector<16x1xf32>
    %447 = arith.divf %445, %446 : vector<16x1xf32>
    %448 = vector.broadcast %447 : vector<16x1xf32> to vector<16x32xf32>
    %449 = arith.subf %443, %448 : vector<16x32xf32>
    %450 = arith.mulf %449, %449 : vector<16x32xf32>
    %cst_134 = arith.constant dense<0.000000e+00> : vector<16xf32>
    %451 = vector.multi_reduction <add>, %450, %cst_134 [1] : vector<16x32xf32> to vector<16xf32>
    %452 = vector.shape_cast %451 : vector<16xf32> to vector<16x1xf32>
    %cst_135 = arith.constant 3.200000e+01 : f32
    %453 = vector.broadcast %cst_135 : f32 to vector<16x1xf32>
    %454 = arith.divf %452, %453 : vector<16x1xf32>
    %455 = vector.broadcast %447 : vector<16x1xf32> to vector<16x32xf32>
    %456 = arith.subf %443, %455 : vector<16x32xf32>
    %cst_136 = arith.constant 9.99999996E-13 : f32
    %457 = vector.broadcast %cst_136 : f32 to vector<16x1xf32>
    %458 = arith.addf %454, %457 : vector<16x1xf32>
    %459 = math.sqrt %458 : vector<16x1xf32>
    %460 = vector.broadcast %459 : vector<16x1xf32> to vector<16x32xf32>
    %461 = arith.divf %456, %460 : vector<16x32xf32>
    %462 = vector.broadcast %252 : vector<1x32xf32> to vector<16x32xf32>
    %463 = arith.mulf %462, %461 : vector<16x32xf32>
    %464 = vector.broadcast %253 : vector<1x32xf32> to vector<16x32xf32>
    %465 = arith.addf %463, %464 : vector<16x32xf32>
    %c0_137 = arith.constant 0 : index
    %c0_138 = arith.constant 0 : index
    %466 = vector.load %arg9[%c0_137, %c0_138] : memref<16x32xf32, #tpu.memory_space<vmem>>, vector<16x32xf32>
    tpu.vector_store %arg9[%c0_137, %c0_138], %465 {strides = array<i32>} : memref<16x32xf32, #tpu.memory_space<vmem>>, vector<16x32xf32>,
    return
  }
}

</mosaic_0001>

<bundles_post_ra>
// kernel: tpu_custom_call.1
= control target key start
LH: loop header
LB: loop body
LE: loop exit
PB: predicated region body
PF: predicated region fallthrough
CT: control target
= control target key end

     0   :  { %14 = vsyncpa [#allocation3], 0  ;;  %s6703_s0 = inlined_call_operand.vmem [shape: f32[16,32], index: 0, kind: input, shape index: {}]   ;;  %s6704_s1 = inlined_call_operand.vmem [shape: f32[16,32], index: 1, kind: input, shape index: {}]   ;;  %s6705_s2 = inlined_call_operand.hbm [shape: f32[16,16], index: 2, kind: input, shape index: {}]   ;;  %s6706_s3 = inlined_call_operand.hbm [shape: f32[16,16], index: 3, kind: input, shape index: {}]   ;;  %s6707_s4 = inlined_call_operand.hbm [shape: f32[2,32,96], index: 4, kind: input, shape index: {}]   ;;  %s6708_s5 = inlined_call_operand.hbm [shape: f32[2,32,96], index: 5, kind: input, shape index: {}]   ;;  %s6709_s6 = inlined_call_operand.hbm [shape: f32[2,32,32], index: 6, kind: input, shape index: {}]   ;;  %s6710_s7 = inlined_call_operand.vmem [shape: f32[2,2,96], index: 7, kind: input, shape index: {}]   ;;  %s6711_s8 = inlined_call_operand.vmem [shape: f32[2,7,32], index: 8, kind: input, shape index: {}]   ;;  %s6712_s9 = inlined_call_operand.hbm [shape: f32[16,32], index: 9, kind: output, shape index: {}]  }
   0x1   :  { %15 = vsyncpa [#allocation6], 0 }
   0x2   :  { %16 = vsyncpa [#allocation9], 0 }
   0x3   :  { %17 = vsyncpa [#allocation4], 0  ;;  %s5845_s30 = smov [#allocation5]   ;;  %s5846_s11 = smov [#allocation8]  }
   0x4   :  { %s39_s10 = sshll.u32 %s5845_s30, 4  ;;  %s63_s12 = sshll.u32 %s5846_s11, 4  ;;  %s40_s10 = int_to_ptr.vmem [resolvable:$true] %s39_s10  ;;  %s5916_s12 = int_to_ptr.vmem [resolvable:$true] %s63_s12 }
   0x5   :  { %s5705_s15 = scalar_lea.hbm %s6706_s3, 256 }
   0x6   :  { %p5706_p0 = scmp.ne.s32.totalorder %s6706_s3, %s5705_s15  ;;  %p5709_p1 = scmp.lt.u32.totalorder %s5705_s15, %s6706_s3 }
   0x8   :  { %p5711_p2 = pnand %p5709_p1, %p5706_p0 }
   0xa   :  { %5714 = shalt.err (!%p5711_p2)
}
   0xb   :  { %s5715_s20 = scalar_lea.vmem %s40_s10, 256  ;;  %p5720_p4 = scmp.lt.s32.totalorder %s40_s10, %s40_s10 }
   0xc   :  { %p5716_p3 = scmp.ne.s32.totalorder %s40_s10, %s5715_s20  ;;  %p5721_p5 = scmp.lt.s32.totalorder %s5715_s20, %s5715_s20 }
   0xe   :  { %p5722_p6 = por %p5721_p5, %p5720_p4 }
  0x10   :  { %p5723_p7 = pnand %p5722_p6, %p5716_p3 }
  0x12   :  { %5726 = shalt.err (!%p5723_p7)
}
  0x13   :  { %s5847_s21 = smov 128   ;;  %s5848_s22 = smov 8  }
  0x14   :  { %45 = dma.hbm_to_vmem [thread:$0]  %s6706_s3, 256, %s40_s10, [#allocation6], %s5847_s21, %s5847_s21, %s5848_s22  }
  0x15   :  { %s5727_s27 = scalar_lea.hbm %s6708_s5, 1024 }
  0x16   :  { %p5728_p8 = scmp.ne.s32.totalorder %s6708_s5, %s5727_s27  ;;  %p5731_p9 = scmp.lt.u32.totalorder %s5727_s27, %s6708_s5 }
  0x18   :  { %p5733_p10 = pnand %p5731_p9, %p5728_p8 }
  0x1a   :  { %5736 = shalt.err (!%p5733_p10)
}
  0x1b   :  { %s5737_s13 = scalar_lea.vmem %s5916_s12, 1024  ;;  %p5742_p12 = scmp.lt.s32.totalorder %s5916_s12, %s5916_s12 }
  0x1c   :  { %p5738_p11 = scmp.ne.s32.totalorder %s5916_s12, %s5737_s13  ;;  %p5743_p13 = scmp.lt.s32.totalorder %s5737_s13, %s5737_s13 }
  0x1e   :  { %p5744_p0 = por %p5743_p13, %p5742_p12 }
  0x20   :  { %p5745_p1 = pnand %p5744_p0, %p5738_p11 }
  0x22   :  { %5748 = shalt.err (!%p5745_p1)
}
  0x23   :  { %69 = dma.hbm_to_vmem [thread:$0]  %s6708_s5, 1024, %s5916_s12, [#allocation9], %s5847_s21, %s5847_s21, %s5848_s22  }
  0x24   :  { %s5849_s14 = smov [#allocation2]   ;;  %s5850_s16 = smov [#allocation7]  }
  0x25   :  { %s27_s15 = sshll.u32 %s5849_s14, 4  ;;  %s51_s17 = sshll.u32 %s5850_s16, 4  ;;  %s28_s15 = int_to_ptr.vmem [resolvable:$true] %s27_s15  ;;  %s5953_s17 = int_to_ptr.vmem [resolvable:$true] %s51_s17 }
  0x26   :  { %s5749_s20 = scalar_lea.hbm %s6705_s2, 256 }
  0x27   :  { %p5750_p2 = scmp.ne.s32.totalorder %s6705_s2, %s5749_s20  ;;  %p5753_p3 = scmp.lt.u32.totalorder %s5749_s20, %s6705_s2 }
  0x29   :  { %p5755_p4 = pnand %p5753_p3, %p5750_p2 }
  0x2b   :  { %5758 = shalt.err (!%p5755_p4)
}
  0x2c   :  { %s5759_s5 = scalar_lea.vmem %s28_s15, 256  ;;  %p5764_p6 = scmp.lt.s32.totalorder %s28_s15, %s28_s15 }
  0x2d   :  { %p5760_p5 = scmp.ne.s32.totalorder %s28_s15, %s5759_s5  ;;  %p5765_p7 = scmp.lt.s32.totalorder %s5759_s5, %s5759_s5 }
  0x2f   :  { %p5766_p8 = por %p5765_p7, %p5764_p6 }
  0x31   :  { %p5767_p9 = pnand %p5766_p8, %p5760_p5 }
  0x33   :  { %5770 = shalt.err (!%p5767_p9)
}
  0x34   :  { %33 = dma.hbm_to_vmem [thread:$0]  %s6705_s2, 256, %s28_s15, [#allocation3], %s5847_s21, %s5847_s21, %s5848_s22  }
  0x35   :  { %s5771_s30 = scalar_lea.hbm %s6707_s4, 1024 }
  0x36   :  { %p5772_p10 = scmp.ne.s32.totalorder %s6707_s4, %s5771_s30  ;;  %p5775_p11 = scmp.lt.u32.totalorder %s5771_s30, %s6707_s4 }
  0x38   :  { %p5777_p12 = pnand %p5775_p11, %p5772_p10 }
  0x3a   :  { %5780 = shalt.err (!%p5777_p12)
}
  0x3b   :  { %s5781_s14 = scalar_lea.vmem %s5953_s17, 1024  ;;  %p5786_p0 = scmp.lt.s32.totalorder %s5953_s17, %s5953_s17 }
  0x3c   :  { %p5782_p13 = scmp.ne.s32.totalorder %s5953_s17, %s5781_s14  ;;  %p5787_p1 = scmp.lt.s32.totalorder %s5781_s14, %s5781_s14 }
  0x3e   :  { %p5788_p2 = por %p5787_p1, %p5786_p0 }
  0x40   :  { %p5789_p3 = pnand %p5788_p2, %p5782_p13 }
  0x42   :  { %5792 = shalt.err (!%p5789_p3)
}
  0x43   :  { %57 = dma.hbm_to_vmem [thread:$0]  %s6707_s4, 1024, %s5953_s17, [#allocation6], %s5847_s21, %s5847_s21, %s5848_s22  }
  0x44   :  { %s5851_s16 = smov [#allocation10]   ;;  %s5793_s23 = scalar_lea.hbm %s6709_s6, 1024 }
  0x45   :  { %s75_s18 = sshll.u32 %s5851_s16, 4  ;;  %p5794_p4 = scmp.ne.s32.totalorder %s6709_s6, %s5793_s23  ;;  %s76_s18 = int_to_ptr.vmem [resolvable:$true] %s75_s18 }
  0x46   :  { %p5797_p5 = scmp.lt.u32.totalorder %s5793_s23, %s6709_s6 }
  0x48   :  { %p5799_p6 = pnand %p5797_p5, %p5794_p4 }
  0x4a   :  { %5802 = shalt.err (!%p5799_p6)
}
  0x4b   :  { %s5803_s12 = scalar_lea.vmem %s76_s18, 1024  ;;  %p5808_p8 = scmp.lt.s32.totalorder %s76_s18, %s76_s18 }
  0x4c   :  { %p5804_p7 = scmp.ne.s32.totalorder %s76_s18, %s5803_s12  ;;  %p5809_p9 = scmp.lt.s32.totalorder %s5803_s12, %s5803_s12 }
  0x4e   :  { %p5810_p10 = por %p5809_p9, %p5808_p8 }
  0x50   :  { %p5811_p11 = pnand %p5810_p10, %p5804_p7 }
  0x52   :  { %5814 = shalt.err (!%p5811_p11)
}
  0x53   :  { %81 = dma.hbm_to_vmem [thread:$0]  %s6709_s6, 1024, %s76_s18, [#allocation9], %s5847_s21, %s5847_s21, %s5848_s22  }
  0x54   :  { %5837 = dma.done.wait [#allocation3], 256  }
  0x55   :  { %5838 = vsyncadd [#allocation3], 4294967040 }
  0x56   :  { %5839 = dma.done.wait [#allocation6], 1280  }
  0x57   :  { %5840 = vsyncadd [#allocation6], 4294966016 }
  0x58   :  { %5841 = dma.done.wait [#allocation9], 2048  }
  0x59   :  { %5842 = vsyncadd [#allocation9], 4294965248  ;;  %vm127_vm0 = vcmask 261120   ;;  %v109_v0 = vld [vmem:[#allocation7] sm:$0xff]  ;;  %v110_v1 = vld [vmem:[#allocation7 + $0x8] sm:$0xff]  ;;  %v123_v8 = vlaneseq  ;;  %vm215_vm1 = vcmask 64512  }
  0x5a   :  { %v111_v2 = vld [vmem:[#allocation7 + $0x10] sm:$0xff]  ;;  %v5108_v3 = vpack.c.bf16 %v110_v1, %v109_v0  ;;  %v112_v4 = vld [vmem:[#allocation7 + $0x18] sm:$0xff]  ;;  %v6008_v5 = vld [vmem:[%s6703_s0] sm:$0xff]  ;;  %vm299_vm3 = vcmask 130048   ;;  %s5853_s13 = smov 64   ;;  %s5854_s3 = smov 88  }
  0x5b   :  { %v5112_v6 = vpack.c.bf16 %v112_v4, %v111_v2  ;;  %4804 = vmatprep.mubr.msk.f32.mxu0 %vm127_vm0, %v6008_v5  ;;  %v6015_v7 = vld [vmem:[%s6703_s0 + $0x8] sm:$0xff]  ;;  %v6019_v9 = vshrl.u32 %v123_v8, 7  ;;  %v6027_v11 = vld [vmem:[%s6710_s7] sm:$0x3]  ;;  %s5852_s0 = smov 96   ;;  %vm6045_vm2 = vmpackc.low %vm215_vm1, %vm215_vm1  ;;  %s5855_s10 = smov 120  }
  0x5c   :  { %5109 = vmatprep.subr.bf16.mxu0 %v5108_v3  ;;  %v6055_v23 = vld [vmem:[#allocation2 + $0x8] sm:$0xff]  ;;  %v6057_v24 = vld [vmem:[#allocation2] sm:$0xff]  ;;  %s5856_s14 = smov 56   ;;  %s5857_s2 = smov 80   ;;  %vm1037_vm4 = vcmask 195584  }
  0x5d   :  { %5111 = vmatpush3.bf16.msra.mxu0 %v5108_v3  ;;  %v6022_v10 = vsub.s32 0, %v6019_v9  ;;  %s5858_s15 = smov 112   ;;  %s5859_s16 = smov 72  }
  0x5e   :  { %5113 = vmatprep.subr.bf16.mxu0 %v5112_v6  ;;  %s5860_s18 = smov 104   ;;  %s5861_s19 = smov 48  }
  0x5f   :  { %v126_v12 = vrot.slane %v6027_v11, %v6022_v10  ;;  %s5862_s20 = smov 40   ;;  %s5863_s23 = smov 16  }
  0x60   :  { %s5864_s24 = smov 24  }
  0x61   :  { %5115 = vmatpush3.bf16.msra.mxu0 %v5112_v6 }
  0x64   :  { %4805 = vmatmul.mubr.msk.f32.vlgmr.msra.gmra.mrb[0].mxu0 %vm127_vm0, %v6015_v7 }
 0x137   :  { %v4806_v13 = vpop.f32.mrb[0].mxu0 }
 0x138   :  { %v6031_v14 = vadd.f32 %v4806_v13, %v126_v12  ;;  %v200_v15 = vpop.f32.mrb[1].mxu0 }
 0x139   :  { %v6033_v16 = vadd.f32 %v200_v15, %v126_v12 }
 0x13b   :  { %4811 = vmatprep.mubr.msk.f32.mxu1 %vm215_vm1, %v6033_v16  ;;  %v6039_v17 = vpack.i.bf16 %v6031_v14, %v6033_v16 }
 0x13d   :  { %5354 = vrot.lane.b32.xlu0 %v6039_v17, %s5852_s0 }
 0x1af   :  { %v5355_v18 = vpop.permute.xlu0 %5354 }
 0x1b0   :  { %v5357_v19 = vunpack.i.h.bf16 %v5355_v18  ;;  %v5356_v20 = vunpack.i.l.bf16 %v5355_v18 }
 0x1b2   :  { %v5116_v22 = vpack.c.bf16 %v5357_v19, %v5356_v20 }
 0x1b4   :  { %5118 = vmatprep.subr.msk.bf16.mxu1 %vm6045_vm2, %v5116_v22 }
 0x1b5   :  { %5121 = vmatpush3.bf16.xpose.msk.msra.mxu1 %vm6045_vm2, %v5116_v22 }
 0x1bc   :  { %4812 = vmatmul.mubr.msk.f32.vlgmr.msra.gmra.mrb[0].mxu1 %vm215_vm1, %v6031_v14 }
 0x28f   :  { %v4813_v25 = vpop.f32.mrb[0].mxu1 }
 0x290   :  { %v296_v26 = vadd.f32 %v4813_v25, %v6055_v23  ;;  %v290_v27 = vpop.f32.mrb[1].mxu1 }
 0x291   :  { %v291_v28 = vadd.f32 %v290_v27, %v6057_v24 }
 0x292   :  { %v303_v29 = vsel %vm299_vm3, %v296_v26, -inf }
 0x293   :  { %304 = vmax.xlane.f32.xlu1 %v303_v29  ;;  %v300_v30 = vsel %vm299_vm3, %v291_v28, -inf }
 0x294   :  { %301 = vmax.xlane.f32.xlu0 %v300_v30 }
 0x2a4   :  { %5359 = vrot.lane.b32.xlu1 %v6039_v17, %s5853_s13 }
 0x2a8   :  { %5364 = vrot.lane.b32.xlu1 %v6039_v17, %s5854_s3 }
 0x2aa   :  { %411 = vrot.lane.b32.xlu0 %v6031_v14, %s5855_s10 }
 0x320   :  { %v305_v31 = vpop.xlane.xlu1 %304 }
 0x321   :  { %v307_v32 = vsub.f32 %v296_v26, %v305_v31  ;;  %v302_v33 = vpop.xlane.xlu0 %301 }
 0x322   :  { %v306_v34 = vsub.f32 %v291_v28, %v302_v33 }
 0x323   :  { %v310_v35 = vmul.f32 1.442695, %v307_v32 }
 0x324   :  { %v308_v36 = vmul.f32 1.442695, %v306_v34  ;;  %v5360_v37 = vpop.permute.xlu1 %5359 }
 0x325   :  { %5523 = vpow2.f32 %v310_v35  ;;  %v5362_v38 = vunpack.i.h.bf16 %v5360_v37  ;;  %v5361_v39 = vunpack.i.l.bf16 %v5360_v37  ;;  %v412_v56 = vpop.permute.xlu0 %411 }
 0x326   :  { %5525 = vpow2.f32 %v308_v36 }
 0x327   :  { %v5122_v40 = vpack.c.bf16 %v5362_v38, %v5361_v39 }
 0x328   :  { %v5365_v41 = vpop.permute.xlu1 %5364 }
 0x329   :  { %v5367_v42 = vunpack.i.h.bf16 %v5365_v41  ;;  %v5366_v43 = vunpack.i.l.bf16 %v5365_v41  ;;  %5123 = vmatprep.subr.bf16.mxu1 %v5122_v40 }
 0x32a   :  { %5125 = vmatpush3.bf16.msra.mxu1 %v5122_v40 }
 0x32b   :  { %v5126_v44 = vpack.c.bf16 %v5367_v42, %v5366_v43 }
 0x32d   :  { %5128 = vmatprep.subr.msk.bf16.mxu1 %vm6045_vm2, %v5126_v44 }
 0x32f   :  { %v5524_v45 = vpop.eup %5523 }
 0x330   :  { %v315_v46 = vsel %vm299_vm3, %v5524_v45, 0.0  ;;  %v5526_v47 = vpop.eup %5525 }
 0x331   :  { %316 = vadd.xlane.f32.xlu1 %v315_v46  ;;  %v312_v48 = vsel %vm299_vm3, %v5526_v47, 0.0 }
 0x335   :  { %313 = vadd.xlane.f32.xlu1 %v312_v48 }
 0x346   :  { %409 = vrot.lane.b32.xlu1 %v6033_v16, %s5855_s10 }
 0x3be   :  { %v317_v49 = vpop.xlane.xlu1 %316 }
 0x3bf   :  { %5527 = vrcp.f32 %v317_v49 }
 0x3c2   :  { %v314_v50 = vpop.xlane.xlu1 %313 }
 0x3c3   :  { %5529 = vrcp.f32 %v314_v50 }
 0x3c6   :  { %v410_v55 = vpop.permute.xlu1 %409 }
 0x3c9   :  { %v5528_v51 = vpop.eup %5527 }
 0x3ca   :  { %v321_v54 = vmul.f32 %v5528_v51, %v5524_v45 }
 0x3cd   :  { %v5530_v52 = vpop.eup %5529 }
 0x3ce   :  { %v319_v53 = vmul.f32 %v5530_v52, %v5526_v47 }
 0x3d0   :  { %4818 = vmatprep.mubr.msk.f32.mxu1 %vm299_vm3, %v319_v53 }
 0x3d1   :  { %4819 = vmatmul.mubr.msk.f32.vlgmr.msra.gmra.mrb[2].mxu1 %vm299_vm3, %v321_v54 }
 0x3d2   :  { %5131 = vmatpush3.bf16.xpose.msk.msra.mxu1 %vm6045_vm2, %v5126_v44  ;;  %4825 = vmatprep.mubr.msk.f32.mxu1 %vm215_vm1, %v410_v55 }
 0x3d9   :  { %4826 = vmatmul.mubr.msk.f32.vlgmr.msra.gmra.mrb[4].mxu1 %vm215_vm1, %v412_v56 }
 0x4a4   :  { %v6081_v57 = vpop.f32.mrb[2].mxu1 }
 0x4a5   :  { %v6083_v58 = vpop.f32.mrb[3].mxu1 }
 0x4ac   :  { %v4827_v59 = vpop.f32.mrb[4].mxu1 }
 0x4ad   :  { %v497_v60 = vadd.f32 %v4827_v59, %v6055_v23  ;;  %v491_v61 = vpop.f32.mrb[5].mxu1 }
 0x4ae   :  { %v492_v62 = vadd.f32 %v491_v61, %v6057_v24 }
 0x4af   :  { %v503_v63 = vsel %vm299_vm3, %v497_v60, -inf }
 0x4b0   :  { %504 = vmax.xlane.f32.xlu0 %v503_v63  ;;  %v500_v0 = vsel %vm299_vm3, %v492_v62, -inf }
 0x4b1   :  { %501 = vmax.xlane.f32.xlu1 %v500_v0 }
 0x4c2   :  { %5369 = vrot.lane.b32.xlu1 %v6039_v17, %s5856_s14 }
 0x4c6   :  { %5374 = vrot.lane.b32.xlu0 %v6039_v17, %s5857_s2  ;;  %609 = vrot.lane.b32.xlu1 %v6033_v16, %s5858_s15 }
 0x53d   :  { %v505_v1 = vpop.xlane.xlu0 %504 }
 0x53e   :  { %v507_v2 = vsub.f32 %v497_v60, %v505_v1  ;;  %v502_v3 = vpop.xlane.xlu1 %501 }
 0x53f   :  { %v506_v4 = vsub.f32 %v492_v62, %v502_v3 }
 0x540   :  { %v510_v6 = vmul.f32 1.442695, %v507_v2 }
 0x541   :  { %v508_v8 = vmul.f32 1.442695, %v506_v4  ;;  %v5375_v12 = vpop.permute.xlu0 %5374 }
 0x542   :  { %5531 = vpow2.f32 %v510_v6  ;;  %v5370_v13 = vpop.permute.xlu1 %5369  ;;  %v5377_v15 = vunpack.i.h.bf16 %v5375_v12  ;;  %v5376_v18 = vunpack.i.l.bf16 %v5375_v12 }
 0x543   :  { %v5372_v19 = vunpack.i.h.bf16 %v5370_v13  ;;  %v5371_v20 = vunpack.i.l.bf16 %v5370_v13  ;;  %5533 = vpow2.f32 %v508_v8 }
 0x544   :  { %v5136_v25 = vpack.c.bf16 %v5377_v15, %v5376_v18 }
 0x545   :  { %v5132_v22 = vpack.c.bf16 %v5372_v19, %v5371_v20 }
 0x546   :  { %v610_v30 = vpop.permute.xlu1 %609 }
 0x547   :  { %5133 = vmatprep.subr.bf16.mxu0 %v5132_v22 }
 0x548   :  { %5135 = vmatpush3.bf16.msra.mxu0 %v5132_v22 }
 0x549   :  { %5138 = vmatprep.subr.msk.bf16.mxu0 %vm6045_vm2, %v5136_v25 }
 0x54c   :  { %v5532_v26 = vpop.eup %5531 }
 0x54d   :  { %v515_v27 = vsel %vm299_vm3, %v5532_v26, 0.0  ;;  %v5534_v28 = vpop.eup %5533 }
 0x54e   :  { %516 = vadd.xlane.f32.xlu1 %v515_v27  ;;  %v512_v29 = vsel %vm299_vm3, %v5534_v28, 0.0 }
 0x552   :  { %513 = vadd.xlane.f32.xlu1 %v512_v29 }
 0x563   :  { %611 = vrot.lane.b32.xlu1 %v6031_v14, %s5858_s15 }
 0x5db   :  { %v517_v31 = vpop.xlane.xlu1 %516 }
 0x5dc   :  { %5535 = vrcp.f32 %v517_v31 }
 0x5df   :  { %v514_v32 = vpop.xlane.xlu1 %513 }
 0x5e0   :  { %5537 = vrcp.f32 %v514_v32 }
 0x5e3   :  { %v612_v37 = vpop.permute.xlu1 %611 }
 0x5e6   :  { %v5536_v33 = vpop.eup %5535 }
 0x5e7   :  { %v521_v36 = vmul.f32 %v5536_v33, %v5532_v26 }
 0x5ea   :  { %v5538_v34 = vpop.eup %5537 }
 0x5eb   :  { %v519_v35 = vmul.f32 %v5538_v34, %v5534_v28 }
 0x5ed   :  { %4832 = vmatprep.mubr.msk.f32.mxu0 %vm299_vm3, %v519_v35 }
 0x5ee   :  { %4833 = vmatmul.mubr.msk.f32.vlgmr.msra.gmra.mrb[2].mxu0 %vm299_vm3, %v521_v36 }
 0x5ef   :  { %5141 = vmatpush3.bf16.xpose.msk.msra.mxu0 %vm6045_vm2, %v5136_v25  ;;  %4839 = vmatprep.mubr.msk.f32.mxu0 %vm215_vm1, %v610_v30 }
 0x5f6   :  { %4840 = vmatmul.mubr.msk.f32.vlgmr.msra.gmra.mrb[4].mxu0 %vm215_vm1, %v612_v37 }
 0x6c1   :  { %v6107_v38 = vpop.f32.mrb[2].mxu0 }
 0x6c2   :  { %v6109_v39 = vpop.f32.mrb[3].mxu0 }
 0x6c9   :  { %v4841_v40 = vpop.f32.mrb[4].mxu0 }
 0x6ca   :  { %v697_v41 = vadd.f32 %v4841_v40, %v6055_v23  ;;  %v691_v42 = vpop.f32.mrb[5].mxu0 }
 0x6cb   :  { %v692_v43 = vadd.f32 %v691_v42, %v6057_v24 }
 0x6cc   :  { %v703_v44 = vsel %vm299_vm3, %v697_v41, -inf }
 0x6cd   :  { %704 = vmax.xlane.f32.xlu0 %v703_v44  ;;  %v700_v45 = vsel %vm299_vm3, %v692_v43, -inf }
 0x6ce   :  { %701 = vmax.xlane.f32.xlu1 %v700_v45 }
 0x75a   :  { %v705_v46 = vpop.xlane.xlu0 %704 }
 0x75b   :  { %v707_v47 = vsub.f32 %v697_v41, %v705_v46  ;;  %v702_v48 = vpop.xlane.xlu1 %701 }
 0x75c   :  { %v706_v49 = vsub.f32 %v692_v43, %v702_v48 }
 0x75d   :  { %v710_v50 = vmul.f32 1.442695, %v707_v47 }
 0x75e   :  { %v708_v51 = vmul.f32 1.442695, %v706_v49 }
 0x75f   :  { %5539 = vpow2.f32 %v710_v50 }
 0x760   :  { %5541 = vpow2.f32 %v708_v51 }
 0x769   :  { %v5540_v52 = vpop.eup %5539 }
 0x76a   :  { %v5542_v53 = vpop.eup %5541  ;;  %v715_v54 = vsel %vm299_vm3, %v5540_v52, 0.0 }
 0x76b   :  { %716 = vadd.xlane.f32.xlu1 %v715_v54  ;;  %v712_v55 = vsel %vm299_vm3, %v5542_v53, 0.0 }
 0x76c   :  { %713 = vadd.xlane.f32.xlu0 %v712_v55 }
 0x77c   :  { %5384 = vrot.lane.b32.xlu1 %v6039_v17, %s5859_s16 }
 0x780   :  { %809 = vrot.lane.b32.xlu1 %v6033_v16, %s5860_s18 }
 0x782   :  { %5379 = vrot.lane.b32.xlu0 %v6039_v17, %s5861_s19 }
 0x786   :  { %811 = vrot.lane.b32.xlu0 %v6031_v14, %s5860_s18 }
 0x7f8   :  { %v717_v56 = vpop.xlane.xlu1 %716 }
 0x7f9   :  { %5543 = vrcp.f32 %v717_v56  ;;  %v714_v59 = vpop.xlane.xlu0 %713 }
 0x7fa   :  { %5545 = vrcp.f32 %v714_v59 }
 0x7fc   :  { %v5385_v60 = vpop.permute.xlu1 %5384 }
 0x7fd   :  { %v5380_v61 = vpop.permute.xlu0 %5379  ;;  %v5387_v62 = vunpack.i.h.bf16 %v5385_v60  ;;  %v5386_v63 = vunpack.i.l.bf16 %v5385_v60 }
 0x7fe   :  { %v5382_v0 = vunpack.i.h.bf16 %v5380_v61  ;;  %v5381_v1 = vunpack.i.l.bf16 %v5380_v61 }
 0x7ff   :  { %v5146_v3 = vpack.c.bf16 %v5387_v62, %v5386_v63  ;;  %v114_v63 = vld [vmem:[#allocation8 + $0x8] sm:$0xff] }
 0x800   :  { %v5142_v2 = vpack.c.bf16 %v5382_v0, %v5381_v1  ;;  %v810_v8 = vpop.permute.xlu1 %809 }
 0x801   :  { %v812_v12 = vpop.permute.xlu0 %811 }
 0x802   :  { %5143 = vmatprep.subr.bf16.mxu1 %v5142_v2 }
 0x803   :  { %v5544_v16 = vpop.eup %5543  ;;  %5145 = vmatpush3.bf16.msra.mxu1 %v5142_v2 }
 0x804   :  { %v5546_v4 = vpop.eup %5545  ;;  %5148 = vmatprep.subr.msk.bf16.mxu1 %vm6045_vm2, %v5146_v3  ;;  %v721_v6 = vmul.f32 %v5544_v16, %v5540_v52 }
 0x805   :  { %v719_v14 = vmul.f32 %v5546_v4, %v5542_v53 }
 0x807   :  { %4846 = vmatprep.mubr.msk.f32.mxu1 %vm299_vm3, %v719_v14 }
 0x808   :  { %4847 = vmatmul.mubr.msk.f32.vlgmr.msra.gmra.mrb[6].mxu1 %vm299_vm3, %v721_v6 }
 0x809   :  { %4853 = vmatprep.mubr.msk.f32.mxu1 %vm215_vm1, %v810_v8 }
 0x80c   :  { %5151 = vmatpush3.bf16.xpose.msk.msra.mxu1 %vm6045_vm2, %v5146_v3 }
 0x813   :  { %4854 = vmatmul.mubr.msk.f32.vlgmr.msra.gmra.mrb[8].mxu1 %vm215_vm1, %v812_v12  ;;  %v115_v12 = vld [vmem:[#allocation8 + $0x10] sm:$0xff] }
 0x8db   :  { %v4848_v13 = vpop.f32.mrb[6].mxu1 }
 0x8dc   :  { %v800_v15 = vpop.f32.mrb[7].mxu1 }
 0x8e6   :  { %v4855_v18 = vpop.f32.mrb[8].mxu1 }
 0x8e7   :  { %v897_v19 = vadd.f32 %v4855_v18, %v6055_v23  ;;  %v891_v20 = vpop.f32.mrb[9].mxu1 }
 0x8e8   :  { %v892_v22 = vadd.f32 %v891_v20, %v6057_v24 }
 0x8e9   :  { %v903_v25 = vsel %vm299_vm3, %v897_v19, -inf }
 0x8ea   :  { %904 = vmax.xlane.f32.xlu0 %v903_v25  ;;  %v900_v26 = vsel %vm299_vm3, %v892_v22, -inf  ;;  %v103_v25 = vld [vmem:[%s6704_s1] sm:$0xff] }
 0x8eb   :  { %901 = vmax.xlane.f32.xlu1 %v900_v26  ;;  %4882 = vmatprep.mubr.msk.f32.mxu1 %vm127_vm0, %v103_v25 }
 0x977   :  { %v905_v27 = vpop.xlane.xlu0 %904 }
 0x978   :  { %v907_v28 = vsub.f32 %v897_v19, %v905_v27  ;;  %v902_v29 = vpop.xlane.xlu1 %901 }
 0x979   :  { %v906_v30 = vsub.f32 %v892_v22, %v902_v29 }
 0x97a   :  { %v910_v31 = vmul.f32 1.442695, %v907_v28  ;;  %v6180_v28 = vsub.s32 1, %v6019_v9 }
 0x97b   :  { %v908_v32 = vmul.f32 1.442695, %v906_v30 }
 0x97c   :  { %5547 = vpow2.f32 %v910_v31  ;;  %v1098_v29 = vrot.slane %v6027_v11, %v6180_v28  ;;  %v104_v11 = vld [vmem:[%s6704_s1 + $0x8] sm:$0xff] }
 0x97d   :  { %5549 = vpow2.f32 %v908_v32 }
 0x986   :  { %v5548_v33 = vpop.eup %5547 }
 0x987   :  { %v5550_v34 = vpop.eup %5549  ;;  %v915_v23 = vsel %vm299_vm3, %v5548_v33, 0.0 }
 0x988   :  { %916 = vadd.xlane.f32.xlu1 %v915_v23  ;;  %v912_v24 = vsel %vm299_vm3, %v5550_v34, 0.0 }
 0x989   :  { %913 = vadd.xlane.f32.xlu0 %v912_v24 }
 0x999   :  { %1011 = vrot.lane.b32.xlu1 %v6109_v39, %s5848_s22 }
 0x99d   :  { %1013 = vrot.lane.b32.xlu1 %v6107_v38, %s5848_s22 }
 0x99f   :  { %5389 = vrot.lane.b32.xlu0 %v6039_v17, %s5862_s20 }
 0x9a1   :  { %1021 = vrot.lane.b32.xlu1 %v4848_v13, %s5863_s23  ;;  %v116_v13 = vld [vmem:[#allocation8 + $0x18] sm:$0xff] }
 0x9a2   :  { %v5160_v27 = vpack.c.bf16 %v116_v13, %v115_v12 }
 0x9a3   :  { %1019 = vrot.lane.b32.xlu0 %v800_v15, %s5863_s23  ;;  %v5398_v15 = vpack.i.bf16 %v116_v13, %v115_v12 }
 0xa15   :  { %v917_v35 = vpop.xlane.xlu1 %916 }
 0xa16   :  { %5551 = vrcp.f32 %v917_v35  ;;  %v914_v36 = vpop.xlane.xlu0 %913 }
 0xa17   :  { %5553 = vrcp.f32 %v914_v36 }
 0xa19   :  { %v1012_v46 = vpop.permute.xlu1 %1011 }
 0xa1a   :  { %v5390_v37 = vpop.permute.xlu0 %5389  ;;  %v1033_v51 = vsel %vm215_vm1, %v6083_v58, %v1012_v46  ;;  %v113_v58 = vld [vmem:[#allocation8] sm:$0xff] }
 0xa1b   :  { %v5392_v40 = vunpack.i.h.bf16 %v5390_v37  ;;  %v5391_v41 = vunpack.i.l.bf16 %v5390_v37  ;;  %v5393_v0 = vpack.i.bf16 %v114_v63, %v113_v58  ;;  %v5156_v26 = vpack.c.bf16 %v114_v63, %v113_v58 }
 0xa1d   :  { %v5152_v39 = vpack.c.bf16 %v5392_v40, %v5391_v41  ;;  %v1014_v47 = vpop.permute.xlu1 %1013 }
 0xa1e   :  { %v1020_v49 = vpop.permute.xlu0 %1019  ;;  %v1034_v50 = vsel %vm215_vm1, %v6081_v57, %v1014_v47  ;;  %v6192_v47 = vld [vmem:[%s6711_s8] sm:$0x7f] }
 0xa1f   :  { %5153 = vmatprep.subr.bf16.mxu0 %v5152_v39  ;;  %v1035_v54 = vsel %vm299_vm3, %v1033_v51, %v1020_v49  ;;  %v1086_v49 = vrot.slane %v6192_v47, %v6180_v28 }
 0xa20   :  { %v5552_v42 = vpop.eup %5551  ;;  %5155 = vmatpush3.bf16.msra.mxu0 %v5152_v39 }
 0xa21   :  { %v5554_v38 = vpop.eup %5553  ;;  %v921_v44 = vmul.f32 %v5552_v42, %v5548_v33  ;;  %v1022_v48 = vpop.permute.xlu1 %1021  ;;  %5157 = vmatprep.subr.bf16.mxu0 %v5156_v26 }
 0xa22   :  { %v919_v43 = vmul.f32 %v5554_v38, %v5550_v34  ;;  %v1036_v52 = vsel %vm299_vm3, %v1034_v50, %v1022_v48  ;;  %v1091_v48 = vsub.s32 2, %v6019_v9 }
 0xa24   :  { %4860 = vmatprep.mubr.msk.f32.mxu0 %vm299_vm3, %v919_v43 }
 0xa25   :  { %4861 = vmatmul.mubr.msk.f32.vlgmr.msra.gmra.mrb[6].mxu0 %vm299_vm3, %v921_v44 }
 0xa26   :  { %5159 = vmatpush3.bf16.msra.mxu0 %v5156_v26 }
 0xa27   :  { %5161 = vmatprep.subr.bf16.mxu0 %v5160_v27 }
 0xa2a   :  { %5163 = vmatpush3.bf16.msra.mxu0 %v5160_v27 }
 0xaf8   :  { %v4862_v17 = vpop.f32.mrb[6].mxu0 }
 0xaf9   :  { %1029 = vrot.lane.b32.xlu1 %v4862_v17, %s5864_s24  ;;  %v1000_v45 = vpop.f32.mrb[7].mxu0 }
 0xafa   :  { %1027 = vrot.lane.b32.xlu0 %v1000_v45, %s5864_s24 }
 0xb6b   :  { %v1030_v53 = vpop.permute.xlu1 %1029 }
 0xb6c   :  { %v1039_v55 = vsel %vm1037_vm4, %v1036_v52, %v1030_v53  ;;  %v1028_v56 = vpop.permute.xlu0 %1027  ;;  %v1092_v52 = vrot.slane %v6192_v47, %v1091_v48 }
 0xb6d   :  { %v1038_v59 = vsel %vm1037_vm4, %v1035_v54, %v1028_v56  ;;  %v1041_v60 = vadd.f32 %v1039_v55, %v6015_v7 }
 0xb6e   :  { %v1040_v61 = vadd.f32 %v1038_v59, %v6008_v5 }
 0xb6f   :  { %v1045_v62 = vsel %vm127_vm0, %v1041_v60, 0.0 }
 0xb70   :  { %1046 = vadd.xlane.f32.xlu1 %v1045_v62  ;;  %v1042_v57 = vsel %vm127_vm0, %v1040_v61, 0.0 }
 0xb71   :  { %1043 = vadd.xlane.f32.xlu0 %v1042_v57 }
 0xb81   :  { %5394 = vrot.lane.b32.xlu1 %v5393_v0, %s5852_s0 }
 0xb85   :  { %1197 = vrot.lane.b32.xlu1 %v1098_v29, %s5852_s0 }
 0xbfd   :  { %v1047_v1 = vpop.xlane.xlu1 %1046 }
 0xbfe   :  { %v1050_v2 = vmul.f32 0.03125, %v1047_v1  ;;  %v1044_v3 = vpop.xlane.xlu0 %1043 }
 0xbff   :  { %v1049_v16 = vmul.f32 0.03125, %v1044_v3 }
 0xc00   :  { %v6164_v4 = vsub.f32 %v1041_v60, %v1050_v2 }
 0xc01   :  { %v6166_v7 = vsub.f32 %v1040_v61, %v1049_v16  ;;  %v5395_v18 = vpop.permute.xlu1 %5394 }
 0xc02   :  { %v1054_v6 = vmul.f32 %v6164_v4, %v6164_v4  ;;  %v5397_v19 = vunpack.i.h.bf16 %v5395_v18  ;;  %v5396_v20 = vunpack.i.l.bf16 %v5395_v18 }
 0xc03   :  { %v1053_v5 = vmul.f32 %v6166_v7, %v6166_v7 }
 0xc04   :  { %v1058_v8 = vsel %vm127_vm0, %v1054_v6, 0.0  ;;  %v5164_v22 = vpack.c.bf16 %v5397_v19, %v5396_v20 }
 0xc05   :  { %v1055_v14 = vsel %vm127_vm0, %v1053_v5, 0.0  ;;  %v1198_v61 = vpop.permute.xlu1 %1197  ;;  %v6226_v5 = vld [vmem:[#allocation5] sm:$0xff] }
 0xc06   :  { %1056 = vadd.xlane.f32.xlu0 %v1055_v14  ;;  %5165 = vmatprep.subr.bf16.mxu1 %v5164_v22 }
 0xc07   :  { %5167 = vmatpush3.bf16.msra.mxu1 %v5164_v22 }
 0xc0a   :  { %1059 = vadd.xlane.f32.xlu0 %v1058_v8 }
 0xc20   :  { %5399 = vrot.lane.b32.xlu0 %v5398_v15, %s5852_s0 }
 0xc93   :  { %v1057_v30 = vpop.xlane.xlu0 %1056 }
 0xc94   :  { %v1061_v31 = vmul.f32 0.03125, %v1057_v30 }
 0xc96   :  { %v1063_v32 = vadd.f32 1e-12, %v1061_v31 }
 0xc97   :  { %v1060_v33 = vpop.xlane.xlu0 %1059 }
 0xc98   :  { %5555 = vrsqrt.f32 %v1063_v32  ;;  %v1062_v34 = vmul.f32 0.03125, %v1060_v33  ;;  %vm1067_vm5 = vcmp.eq.f32.partialorder %v1063_v32, inf  ;;  %v1070_v39 = vand.u32 2147483648, %v1063_v32 }
 0xc99   :  { %vm1069_vm6 = vcmp.eq.f32.partialorder %v1063_v32, 0.0 }
 0xc9a   :  { %v1064_v23 = vadd.f32 1e-12, %v1062_v34 }
 0xc9b   :  { %v5400_v24 = vpop.permute.xlu0 %5399 }
 0xc9c   :  { %v5402_v35 = vunpack.i.h.bf16 %v5400_v24  ;;  %v5401_v36 = vunpack.i.l.bf16 %v5400_v24  ;;  %5557 = vrsqrt.f32 %v1064_v23  ;;  %vm1074_vm7 = vcmp.eq.f32.partialorder %v1064_v23, inf }
 0xc9d   :  { %v1077_v17 = vand.u32 2147483648, %v1064_v23  ;;  %vm1076_vm8 = vcmp.eq.f32.partialorder %v1064_v23, 0.0 }
 0xc9e   :  { %v5168_v37 = vpack.c.bf16 %v5402_v35, %v5401_v36 }
 0xca0   :  { %5169 = vmatprep.subr.bf16.mxu1 %v5168_v37 }
 0xca1   :  { %5171 = vmatpush3.bf16.msra.mxu1 %v5168_v37 }
 0xca2   :  { %v5556_v40 = vpop.eup %5555 }
 0xca3   :  { %v1066_v41 = vmul.f32 %v5556_v40, %v1063_v32 }
 0xca4   :  { %4883 = vmatmul.mubr.msk.f32.vlgmr.msra.gmra.mrb[10].mxu1 %vm127_vm0, %v104_v11 }
 0xca5   :  { %v1068_v42 = vsel %vm1067_vm5, %v1063_v32, %v1066_v41 }
 0xca6   :  { %v1071_v38 = vsel %vm1069_vm6, %v1070_v39, %v1068_v42  ;;  %v5558_v43 = vpop.eup %5557 }
 0xca7   :  { %5559 = vrcp.f32 %v1071_v38  ;;  %v1073_v44 = vmul.f32 %v5558_v43, %v1064_v23 }
 0xca9   :  { %v1075_v45 = vsel %vm1074_vm7, %v1064_v23, %v1073_v44 }
 0xcaa   :  { %v1078_v46 = vsel %vm1076_vm8, %v1077_v17, %v1075_v45 }
 0xcab   :  { %5561 = vrcp.f32 %v1078_v46 }
 0xcb1   :  { %v5560_v50 = vpop.eup %5559 }
 0xcb2   :  { %v1080_v51 = vmul.f32 %v5560_v50, %v6166_v7  ;;  %v6224_v7 = vld [vmem:[#allocation5 + $0x8] sm:$0xff] }
 0xcb4   :  { %v1087_v53 = vmul.f32 %v1086_v49, %v1080_v51 }
 0xcb5   :  { %v5562_v54 = vpop.eup %5561 }
 0xcb6   :  { %v6201_v55 = vadd.f32 %v1092_v52, %v1087_v53  ;;  %v1082_v56 = vmul.f32 %v5562_v54, %v6164_v4 }
 0xcb8   :  { %4871 = vmatprep.mubr.msk.f32.mxu0 %vm127_vm0, %v6201_v55  ;;  %v1088_v59 = vmul.f32 %v1086_v49, %v1082_v56 }
 0xcba   :  { %v6206_v60 = vadd.f32 %v1092_v52, %v1088_v59 }
 0xcbc   :  { %4872 = vmatmul.mubr.msk.f32.vlgmr.msra.gmra.mrb[8].mxu0 %vm127_vm0, %v6206_v60 }
 0xd77   :  { %v4884_v62 = vpop.f32.mrb[10].mxu1 }
 0xd78   :  { %v1278_v57 = vadd.f32 %v4884_v62, %v1198_v61  ;;  %v1272_v58 = vpop.f32.mrb[11].mxu1 }
 0xd79   :  { %v1273_v63 = vadd.f32 %v1272_v58, %v1198_v61 }
 0xd7b   :  { %v5172_v0 = vpack.c.bf16 %v1278_v57, %v1273_v63  ;;  %v6210_v1 = vpack.i.bf16 %v1278_v57, %v1273_v63 }
 0xd7d   :  { %5174 = vmatprep.subr.msk.bf16.mxu0 %vm6045_vm2, %v5172_v0 }
 0xd7e   :  { %5177 = vmatpush3.bf16.xpose.msk.msra.mxu0 %vm6045_vm2, %v5172_v0 }
 0xd8f   :  { %v4873_v2 = vpop.f32.mrb[8].mxu0 }
 0xd90   :  { %v1171_v3 = vpop.f32.mrb[9].mxu0  ;;  %v6218_v4 = vadd.f32 %v4873_v2, %v1098_v29 }
 0xd91   :  { %v6216_v16 = vadd.f32 %v1171_v3, %v1098_v29 }
 0xd93   :  { %4889 = vmatprep.mubr.msk.f32.mxu0 %vm215_vm1, %v6216_v16 }
 0xd94   :  { %4890 = vmatmul.mubr.msk.f32.vlgmr.msra.gmra.mrb[10].mxu0 %vm215_vm1, %v6218_v4 }
 0xe67   :  { %v4891_v14 = vpop.f32.mrb[10].mxu0 }
 0xe68   :  { %v1365_v6 = vadd.f32 %v4891_v14, %v6224_v7  ;;  %v1359_v8 = vpop.f32.mrb[11].mxu0 }
 0xe69   :  { %v1360_v12 = vadd.f32 %v1359_v8, %v6226_v5 }
 0xe6a   :  { %v1371_v13 = vsel %vm299_vm3, %v1365_v6, -inf }
 0xe6b   :  { %1372 = vmax.xlane.f32.xlu0 %v1371_v13  ;;  %v1368_v15 = vsel %vm299_vm3, %v1360_v12, -inf }
 0xe6c   :  { %1369 = vmax.xlane.f32.xlu1 %v1368_v15 }
 0xef8   :  { %v1373_v18 = vpop.xlane.xlu0 %1372 }
 0xef9   :  { %v1375_v19 = vsub.f32 %v1365_v6, %v1373_v18  ;;  %v1370_v20 = vpop.xlane.xlu1 %1369 }
 0xefa   :  { %v1374_v22 = vsub.f32 %v1360_v12, %v1370_v20 }
 0xefb   :  { %v1378_v25 = vmul.f32 1.442695, %v1375_v19 }
 0xefc   :  { %v1376_v26 = vmul.f32 1.442695, %v1374_v22 }
 0xefd   :  { %5563 = vpow2.f32 %v1378_v25 }
 0xefe   :  { %5565 = vpow2.f32 %v1376_v26 }
 0xf07   :  { %v5564_v27 = vpop.eup %5563 }
 0xf08   :  { %v5566_v29 = vpop.eup %5565  ;;  %v1383_v30 = vsel %vm299_vm3, %v5564_v27, 0.0 }
 0xf09   :  { %1384 = vadd.xlane.f32.xlu1 %v1383_v30  ;;  %v1380_v31 = vsel %vm299_vm3, %v5566_v29, 0.0 }
 0xf0a   :  { %1381 = vadd.xlane.f32.xlu0 %v1380_v31 }
 0xf1a   :  { %5409 = vrot.lane.b32.xlu1 %v6210_v1, %s5855_s10 }
 0xf1e   :  { %1477 = vrot.lane.b32.xlu1 %v6216_v16, %s5855_s10 }
 0xf20   :  { %5404 = vrot.lane.b32.xlu0 %v6210_v1, %s5852_s0 }
 0xf24   :  { %1479 = vrot.lane.b32.xlu0 %v6218_v4, %s5855_s10 }
 0xf96   :  { %v1385_v32 = vpop.xlane.xlu1 %1384 }
 0xf97   :  { %5567 = vrcp.f32 %v1385_v32  ;;  %v1382_v33 = vpop.xlane.xlu0 %1381 }
 0xf98   :  { %5569 = vrcp.f32 %v1382_v33 }
 0xf9a   :  { %v5410_v34 = vpop.permute.xlu1 %5409 }
 0xf9b   :  { %v5405_v23 = vpop.permute.xlu0 %5404  ;;  %v5412_v24 = vunpack.i.h.bf16 %v5410_v34  ;;  %v5411_v35 = vunpack.i.l.bf16 %v5410_v34 }
 0xf9c   :  { %v5407_v36 = vunpack.i.h.bf16 %v5405_v23  ;;  %v5406_v37 = vunpack.i.l.bf16 %v5405_v23 }
 0xf9d   :  { %v5182_v40 = vpack.c.bf16 %v5412_v24, %v5411_v35 }
 0xf9e   :  { %v5178_v11 = vpack.c.bf16 %v5407_v36, %v5406_v37  ;;  %v1478_v43 = vpop.permute.xlu1 %1477 }
 0xf9f   :  { %v1480_v44 = vpop.permute.xlu0 %1479 }
 0xfa0   :  { %5179 = vmatprep.subr.bf16.mxu1 %v5178_v11 }
 0xfa1   :  { %v5568_v41 = vpop.eup %5567  ;;  %5181 = vmatpush3.bf16.msra.mxu1 %v5178_v11 }
 0xfa2   :  { %v5570_v39 = vpop.eup %5569  ;;  %5184 = vmatprep.subr.msk.bf16.mxu1 %vm6045_vm2, %v5182_v40  ;;  %v1389_v38 = vmul.f32 %v5568_v41, %v5564_v27 }
 0xfa3   :  { %v1387_v42 = vmul.f32 %v5570_v39, %v5566_v29 }
 0xfa5   :  { %4896 = vmatprep.mubr.msk.f32.mxu1 %vm299_vm3, %v1387_v42 }
 0xfa6   :  { %4897 = vmatmul.mubr.msk.f32.vlgmr.msra.gmra.mrb[12].mxu1 %vm299_vm3, %v1389_v38 }
 0xfa7   :  { %4903 = vmatprep.mubr.msk.f32.mxu1 %vm215_vm1, %v1478_v43 }
 0xfaa   :  { %5187 = vmatpush3.bf16.xpose.msk.msra.mxu1 %vm6045_vm2, %v5182_v40 }
 0xfb1   :  { %4904 = vmatmul.mubr.msk.f32.vlgmr.msra.gmra.mrb[14].mxu1 %vm215_vm1, %v1480_v44 }
0x1079   :  { %v6250_v17 = vpop.f32.mrb[12].mxu1 }
0x107a   :  { %v6252_v45 = vpop.f32.mrb[13].mxu1 }
0x1084   :  { %v4905_v46 = vpop.f32.mrb[14].mxu1 }
0x1085   :  { %v1565_v49 = vadd.f32 %v4905_v46, %v6224_v7  ;;  %v1559_v50 = vpop.f32.mrb[15].mxu1 }
0x1086   :  { %v1560_v51 = vadd.f32 %v1559_v50, %v6226_v5 }
0x1087   :  { %v1571_v52 = vsel %vm299_vm3, %v1565_v49, -inf }
0x1088   :  { %1572 = vmax.xlane.f32.xlu0 %v1571_v52  ;;  %v1568_v53 = vsel %vm299_vm3, %v1560_v51, -inf }
0x1089   :  { %1569 = vmax.xlane.f32.xlu1 %v1568_v53 }
0x1115   :  { %v1573_v54 = vpop.xlane.xlu0 %1572 }
0x1116   :  { %v1575_v56 = vsub.f32 %v1565_v49, %v1573_v54  ;;  %v1570_v59 = vpop.xlane.xlu1 %1569 }
0x1117   :  { %v1574_v61 = vsub.f32 %v1560_v51, %v1570_v59 }
0x1118   :  { %v1578_v62 = vmul.f32 1.442695, %v1575_v56 }
0x1119   :  { %v1576_v57 = vmul.f32 1.442695, %v1574_v61 }
0x111a   :  { %5571 = vpow2.f32 %v1578_v62 }
0x111b   :  { %5573 = vpow2.f32 %v1576_v57 }
0x1124   :  { %v5572_v58 = vpop.eup %5571 }
0x1125   :  { %v5574_v63 = vpop.eup %5573  ;;  %v1583_v0 = vsel %vm299_vm3, %v5572_v58, 0.0 }
0x1126   :  { %1584 = vadd.xlane.f32.xlu1 %v1583_v0  ;;  %v1580_v2 = vsel %vm299_vm3, %v5574_v63, 0.0 }
0x1127   :  { %1581 = vadd.xlane.f32.xlu0 %v1580_v2 }
0x1137   :  { %5419 = vrot.lane.b32.xlu1 %v6210_v1, %s5858_s15 }
0x113b   :  { %1677 = vrot.lane.b32.xlu1 %v6216_v16, %s5858_s15 }
0x113d   :  { %5414 = vrot.lane.b32.xlu0 %v6210_v1, %s5854_s3 }
0x1141   :  { %1679 = vrot.lane.b32.xlu0 %v6218_v4, %s5858_s15 }
0x11b3   :  { %v1585_v3 = vpop.xlane.xlu1 %1584 }
0x11b4   :  { %5575 = vrcp.f32 %v1585_v3  ;;  %v1582_v14 = vpop.xlane.xlu0 %1581 }
0x11b5   :  { %5577 = vrcp.f32 %v1582_v14 }
0x11b7   :  { %v5420_v6 = vpop.permute.xlu1 %5419 }
0x11b8   :  { %v5415_v8 = vpop.permute.xlu0 %5414  ;;  %v5422_v12 = vunpack.i.h.bf16 %v5420_v6  ;;  %v5421_v13 = vunpack.i.l.bf16 %v5420_v6 }
0x11b9   :  { %v5417_v15 = vunpack.i.h.bf16 %v5415_v8  ;;  %v5416_v18 = vunpack.i.l.bf16 %v5415_v8 }
0x11ba   :  { %v5192_v20 = vpack.c.bf16 %v5422_v12, %v5421_v13 }
0x11bb   :  { %v5188_v19 = vpack.c.bf16 %v5417_v15, %v5416_v18  ;;  %v1678_v29 = vpop.permute.xlu1 %1677 }
0x11bc   :  { %v1680_v30 = vpop.permute.xlu0 %1679 }
0x11bd   :  { %5189 = vmatprep.subr.bf16.mxu0 %v5188_v19 }
0x11be   :  { %v5576_v22 = vpop.eup %5575  ;;  %5191 = vmatpush3.bf16.msra.mxu0 %v5188_v19 }
0x11bf   :  { %v5578_v25 = vpop.eup %5577  ;;  %5194 = vmatprep.subr.msk.bf16.mxu0 %vm6045_vm2, %v5192_v20  ;;  %v1589_v27 = vmul.f32 %v5576_v22, %v5572_v58 }
0x11c0   :  { %v1587_v26 = vmul.f32 %v5578_v25, %v5574_v63 }
0x11c2   :  { %4910 = vmatprep.mubr.msk.f32.mxu0 %vm299_vm3, %v1587_v26 }
0x11c3   :  { %4911 = vmatmul.mubr.msk.f32.vlgmr.msra.gmra.mrb[12].mxu0 %vm299_vm3, %v1589_v27 }
0x11c4   :  { %4917 = vmatprep.mubr.msk.f32.mxu0 %vm215_vm1, %v1678_v29 }
0x11c7   :  { %5197 = vmatpush3.bf16.xpose.msk.msra.mxu0 %vm6045_vm2, %v5192_v20 }
0x11ce   :  { %4918 = vmatmul.mubr.msk.f32.vlgmr.msra.gmra.mrb[14].mxu0 %vm215_vm1, %v1680_v30 }
0x1296   :  { %v6276_v31 = vpop.f32.mrb[12].mxu0 }
0x1297   :  { %v6278_v32 = vpop.f32.mrb[13].mxu0 }
0x12a1   :  { %v4919_v33 = vpop.f32.mrb[14].mxu0 }
0x12a2   :  { %v1765_v34 = vadd.f32 %v4919_v33, %v6224_v7  ;;  %v1759_v23 = vpop.f32.mrb[15].mxu0 }
0x12a3   :  { %v1760_v24 = vadd.f32 %v1759_v23, %v6226_v5 }
0x12a4   :  { %v1771_v35 = vsel %vm299_vm3, %v1765_v34, -inf }
0x12a5   :  { %1772 = vmax.xlane.f32.xlu0 %v1771_v35  ;;  %v1768_v36 = vsel %vm299_vm3, %v1760_v24, -inf }
0x12a6   :  { %1769 = vmax.xlane.f32.xlu1 %v1768_v36 }
0x1332   :  { %v1773_v37 = vpop.xlane.xlu0 %1772 }
0x1333   :  { %v1775_v11 = vsub.f32 %v1765_v34, %v1773_v37  ;;  %v1770_v40 = vpop.xlane.xlu1 %1769 }
0x1334   :  { %v1774_v41 = vsub.f32 %v1760_v24, %v1770_v40 }
0x1335   :  { %v1778_v39 = vmul.f32 1.442695, %v1775_v11 }
0x1336   :  { %v1776_v42 = vmul.f32 1.442695, %v1774_v41 }
0x1337   :  { %5579 = vpow2.f32 %v1778_v39 }
0x1338   :  { %5581 = vpow2.f32 %v1776_v42 }
0x1341   :  { %v5580_v38 = vpop.eup %5579 }
0x1342   :  { %v5582_v43 = vpop.eup %5581  ;;  %v1783_v44 = vsel %vm299_vm3, %v5580_v38, 0.0 }
0x1343   :  { %1784 = vadd.xlane.f32.xlu1 %v1783_v44  ;;  %v1780_v46 = vsel %vm299_vm3, %v5582_v43, 0.0 }
0x1344   :  { %1781 = vadd.xlane.f32.xlu0 %v1780_v46 }
0x1354   :  { %5429 = vrot.lane.b32.xlu1 %v6210_v1, %s5860_s18 }
0x1358   :  { %1877 = vrot.lane.b32.xlu1 %v6216_v16, %s5860_s18 }
0x135a   :  { %5424 = vrot.lane.b32.xlu0 %v6210_v1, %s5857_s2 }
0x135e   :  { %1879 = vrot.lane.b32.xlu0 %v6218_v4, %s5860_s18 }
0x13d0   :  { %v1785_v49 = vpop.xlane.xlu1 %1784 }
0x13d1   :  { %5583 = vrcp.f32 %v1785_v49  ;;  %v1782_v50 = vpop.xlane.xlu0 %1781 }
0x13d2   :  { %5585 = vrcp.f32 %v1782_v50 }
0x13d4   :  { %v5430_v51 = vpop.permute.xlu1 %5429 }
0x13d5   :  { %v5425_v52 = vpop.permute.xlu0 %5424  ;;  %v5432_v53 = vunpack.i.h.bf16 %v5430_v51  ;;  %v5431_v54 = vunpack.i.l.bf16 %v5430_v51 }
0x13d6   :  { %v5427_v56 = vunpack.i.h.bf16 %v5425_v52  ;;  %v5426_v59 = vunpack.i.l.bf16 %v5425_v52 }
0x13d7   :  { %v5202_v62 = vpack.c.bf16 %v5432_v53, %v5431_v54 }
0x13d8   :  { %v5198_v61 = vpack.c.bf16 %v5427_v56, %v5426_v59  ;;  %v1878_v63 = vpop.permute.xlu1 %1877 }
0x13d9   :  { %v1880_v0 = vpop.permute.xlu0 %1879 }
0x13da   :  { %5199 = vmatprep.subr.bf16.mxu1 %v5198_v61 }
0x13db   :  { %v5584_v16 = vpop.eup %5583  ;;  %5201 = vmatpush3.bf16.msra.mxu1 %v5198_v61 }
0x13dc   :  { %v5586_v57 = vpop.eup %5585  ;;  %5204 = vmatprep.subr.msk.bf16.mxu1 %vm6045_vm2, %v5202_v62  ;;  %v1789_v58 = vmul.f32 %v5584_v16, %v5580_v38 }
0x13dd   :  { %v1787_v4 = vmul.f32 %v5586_v57, %v5582_v43 }
0x13df   :  { %4924 = vmatprep.mubr.msk.f32.mxu1 %vm299_vm3, %v1787_v4 }
0x13e0   :  { %4925 = vmatmul.mubr.msk.f32.vlgmr.msra.gmra.mrb[16].mxu1 %vm299_vm3, %v1789_v58 }
0x13e1   :  { %4931 = vmatprep.mubr.msk.f32.mxu1 %vm215_vm1, %v1878_v63 }
0x13e4   :  { %5207 = vmatpush3.bf16.xpose.msk.msra.mxu1 %vm6045_vm2, %v5202_v62 }
0x13eb   :  { %4932 = vmatmul.mubr.msk.f32.vlgmr.msra.gmra.mrb[18].mxu1 %vm215_vm1, %v1880_v0  ;;  %v118_v0 = vld [vmem:[#allocation10 + $0x8] sm:$0xff] }
0x14b3   :  { %v4926_v2 = vpop.f32.mrb[16].mxu1 }
0x14b4   :  { %v1868_v3 = vpop.f32.mrb[17].mxu1 }
0x14be   :  { %v4933_v14 = vpop.f32.mrb[18].mxu1 }
0x14bf   :  { %v1965_v6 = vadd.f32 %v4933_v14, %v6224_v7  ;;  %v1959_v8 = vpop.f32.mrb[19].mxu1  ;;  %v120_v14 = vld [vmem:[#allocation10 + $0x18] sm:$0xff] }
0x14c0   :  { %v1960_v12 = vadd.f32 %v1959_v8, %v6226_v5 }
0x14c1   :  { %v1971_v13 = vsel %vm299_vm3, %v1965_v6, -inf }
0x14c2   :  { %1972 = vmax.xlane.f32.xlu0 %v1971_v13  ;;  %v1968_v15 = vsel %vm299_vm3, %v1960_v12, -inf }
0x14c3   :  { %1969 = vmax.xlane.f32.xlu1 %v1968_v15 }
0x154f   :  { %v1973_v18 = vpop.xlane.xlu0 %1972 }
0x1550   :  { %v1975_v19 = vsub.f32 %v1965_v6, %v1973_v18  ;;  %v1970_v20 = vpop.xlane.xlu1 %1969 }
0x1551   :  { %v1974_v22 = vsub.f32 %v1960_v12, %v1970_v20 }
0x1552   :  { %v1978_v25 = vmul.f32 1.442695, %v1975_v19 }
0x1553   :  { %v1976_v26 = vmul.f32 1.442695, %v1974_v22 }
0x1554   :  { %5587 = vpow2.f32 %v1978_v25 }
0x1555   :  { %5589 = vpow2.f32 %v1976_v26 }
0x155e   :  { %v5588_v27 = vpop.eup %5587 }
0x155f   :  { %v5590_v29 = vpop.eup %5589  ;;  %v1983_v7 = vsel %vm299_vm3, %v5588_v27, 0.0 }
0x1560   :  { %1984 = vadd.xlane.f32.xlu1 %v1983_v7  ;;  %v1980_v5 = vsel %vm299_vm3, %v5590_v29, 0.0 }
0x1561   :  { %1981 = vadd.xlane.f32.xlu0 %v1980_v5 }
0x1571   :  { %2079 = vrot.lane.b32.xlu1 %v6278_v32, %s5848_s22 }
0x1575   :  { %2081 = vrot.lane.b32.xlu1 %v6276_v31, %s5848_s22 }
0x1577   :  { %5434 = vrot.lane.b32.xlu0 %v6210_v1, %s5859_s16 }
0x1579   :  { %2089 = vrot.lane.b32.xlu1 %v4926_v2, %s5863_s23  ;;  %v119_v2 = vld [vmem:[#allocation10 + $0x10] sm:$0xff] }
0x157a   :  { %v5216_v6 = vpack.c.bf16 %v120_v14, %v119_v2 }
0x157b   :  { %2087 = vrot.lane.b32.xlu0 %v1868_v3, %s5863_s23 }
0x15ed   :  { %v1985_v30 = vpop.xlane.xlu1 %1984 }
0x15ee   :  { %5591 = vrcp.f32 %v1985_v30  ;;  %v1982_v33 = vpop.xlane.xlu0 %1981 }
0x15ef   :  { %5593 = vrcp.f32 %v1982_v33 }
0x15f1   :  { %v2080_v40 = vpop.permute.xlu1 %2079 }
0x15f2   :  { %v5435_v34 = vpop.permute.xlu0 %5434  ;;  %v2101_v43 = vsel %vm215_vm1, %v6252_v45, %v2080_v40 }
0x15f3   :  { %v5437_v23 = vunpack.i.h.bf16 %v5435_v34  ;;  %v5436_v24 = vunpack.i.l.bf16 %v5435_v34  ;;  %v2151_v34 = vsub.s32 3, %v6019_v9 }
0x15f5   :  { %v5208_v35 = vpack.c.bf16 %v5437_v23, %v5436_v24  ;;  %v2082_v41 = vpop.permute.xlu1 %2081  ;;  %v2157_v23 = vsub.s32 4, %v6019_v9  ;;  %v2152_v24 = vrot.slane %v6192_v47, %v2151_v34 }
0x15f6   :  { %v2088_v42 = vpop.permute.xlu0 %2087  ;;  %v2102_v38 = vsel %vm215_vm1, %v6250_v17, %v2082_v41 }
0x15f7   :  { %5209 = vmatprep.subr.bf16.mxu0 %v5208_v35  ;;  %v2103_v49 = vsel %vm299_vm3, %v2101_v43, %v2088_v42 }
0x15f8   :  { %v5592_v32 = vpop.eup %5591  ;;  %5211 = vmatpush3.bf16.msra.mxu0 %v5208_v35 }
0x15f9   :  { %v5594_v36 = vpop.eup %5593  ;;  %v1989_v37 = vmul.f32 %v5592_v32, %v5588_v27  ;;  %v2090_v39 = vpop.permute.xlu1 %2089 }
0x15fa   :  { %v1987_v31 = vmul.f32 %v5594_v36, %v5590_v29  ;;  %v2104_v44 = vsel %vm299_vm3, %v2102_v38, %v2090_v39  ;;  %v2158_v36 = vrot.slane %v6192_v47, %v2157_v23  ;;  %v2164_v39 = vrot.slane %v6192_v47, %v6022_v10 }
0x15fc   :  { %4938 = vmatprep.mubr.msk.f32.mxu0 %vm299_vm3, %v1987_v31 }
0x15fd   :  { %4939 = vmatmul.mubr.msk.f32.vlgmr.msra.gmra.mrb[16].mxu0 %vm299_vm3, %v1989_v37 }
0x16d0   :  { %v4940_v1 = vpop.f32.mrb[16].mxu0 }
0x16d1   :  { %2097 = vrot.lane.b32.xlu1 %v4940_v1, %s5864_s24  ;;  %v2068_v11 = vpop.f32.mrb[17].mxu0 }
0x16d2   :  { %2095 = vrot.lane.b32.xlu0 %v2068_v11, %s5864_s24 }
0x1743   :  { %v2098_v46 = vpop.permute.xlu1 %2097 }
0x1744   :  { %v2106_v50 = vsel %vm1037_vm4, %v2104_v44, %v2098_v46  ;;  %v2096_v51 = vpop.permute.xlu0 %2095 }
0x1745   :  { %v2105_v52 = vsel %vm1037_vm4, %v2103_v49, %v2096_v51  ;;  %v2108_v53 = vadd.f32 %v2106_v50, %v6206_v60 }
0x1746   :  { %v2107_v54 = vadd.f32 %v2105_v52, %v6201_v55  ;;  %v117_v55 = vld [vmem:[#allocation10] sm:$0xff] }
0x1747   :  { %v2112_v56 = vsel %vm127_vm0, %v2108_v53, 0.0  ;;  %v5212_v3 = vpack.c.bf16 %v118_v0, %v117_v55 }
0x1748   :  { %2113 = vadd.xlane.f32.xlu1 %v2112_v56  ;;  %v2109_v17 = vsel %vm127_vm0, %v2107_v54, 0.0 }
0x1749   :  { %2110 = vadd.xlane.f32.xlu0 %v2109_v17  ;;  %5213 = vmatprep.subr.bf16.mxu0 %v5212_v3 }
0x174a   :  { %5215 = vmatpush3.bf16.msra.mxu0 %v5212_v3 }
0x174b   :  { %5217 = vmatprep.subr.bf16.mxu0 %v5216_v6 }
0x174e   :  { %5219 = vmatpush3.bf16.msra.mxu0 %v5216_v6 }
0x17d5   :  { %v2114_v45 = vpop.xlane.xlu1 %2113 }
0x17d6   :  { %v2116_v59 = vmul.f32 0.03125, %v2114_v45  ;;  %v2111_v61 = vpop.xlane.xlu0 %2110 }
0x17d7   :  { %v2115_v62 = vmul.f32 0.03125, %v2111_v61 }
0x17d8   :  { %v2118_v16 = vsub.f32 %v2108_v53, %v2116_v59 }
0x17d9   :  { %v2117_v57 = vsub.f32 %v2107_v54, %v2115_v62 }
0x17da   :  { %v2120_v63 = vmul.f32 %v2118_v16, %v2118_v16 }
0x17db   :  { %v2119_v4 = vmul.f32 %v2117_v57, %v2117_v57 }
0x17dc   :  { %v2124_v60 = vsel %vm127_vm0, %v2120_v63, 0.0 }
0x17dd   :  { %v2121_v58 = vsel %vm127_vm0, %v2119_v4, 0.0  ;;  %v2302_v4 = vld [vmem:[#allocation7 + $0x28] sm:$0xff] }
0x17de   :  { %2122 = vadd.xlane.f32.xlu0 %v2121_v58  ;;  %v2303_v58 = vld [vmem:[#allocation7 + $0x30] sm:$0xff] }
0x17e2   :  { %2125 = vadd.xlane.f32.xlu0 %v2124_v60  ;;  %v2304_v60 = vld [vmem:[#allocation7 + $0x38] sm:$0xff] }
0x17e3   :  { %v5224_v55 = vpack.c.bf16 %v2304_v60, %v2303_v58 }
0x186b   :  { %v2123_v8 = vpop.xlane.xlu0 %2122 }
0x186c   :  { %v2127_v12 = vmul.f32 0.03125, %v2123_v8 }
0x186e   :  { %v2129_v13 = vadd.f32 1e-12, %v2127_v12 }
0x186f   :  { %v2126_v15 = vpop.xlane.xlu0 %2125 }
0x1870   :  { %5595 = vrsqrt.f32 %v2129_v13  ;;  %v2128_v18 = vmul.f32 0.03125, %v2126_v15  ;;  %vm2133_vm9 = vcmp.eq.f32.partialorder %v2129_v13, inf  ;;  %v2136_v25 = vand.u32 2147483648, %v2129_v13 }
0x1871   :  { %vm2135_vm10 = vcmp.eq.f32.partialorder %v2129_v13, 0.0 }
0x1872   :  { %v2130_v19 = vadd.f32 1e-12, %v2128_v18 }
0x1874   :  { %5597 = vrsqrt.f32 %v2130_v19  ;;  %vm2140_vm11 = vcmp.eq.f32.partialorder %v2130_v19, inf  ;;  %v2143_v5 = vand.u32 2147483648, %v2130_v19  ;;  %vm2142_vm12 = vcmp.eq.f32.partialorder %v2130_v19, 0.0 }
0x187a   :  { %v5596_v20 = vpop.eup %5595 }
0x187b   :  { %v2132_v22 = vmul.f32 %v5596_v20, %v2129_v13 }
0x187d   :  { %v2134_v26 = vsel %vm2133_vm9, %v2129_v13, %v2132_v22 }
0x187e   :  { %v2137_v27 = vsel %vm2135_vm10, %v2136_v25, %v2134_v26  ;;  %v5598_v29 = vpop.eup %5597 }
0x187f   :  { %5599 = vrcp.f32 %v2137_v27  ;;  %v2139_v7 = vmul.f32 %v5598_v29, %v2130_v19  ;;  %v2290_v29 = vsub.s32 5, %v6019_v9 }
0x1881   :  { %v2141_v30 = vsel %vm2140_vm11, %v2130_v19, %v2139_v7  ;;  %v2296_v7 = vsub.s32 6, %v6019_v9 }
0x1882   :  { %v2144_v33 = vsel %vm2142_vm12, %v2143_v5, %v2141_v30  ;;  %v2291_v5 = vrot.slane %v6192_v47, %v2290_v29 }
0x1883   :  { %5601 = vrcp.f32 %v2144_v33 }
0x1889   :  { %v5600_v35 = vpop.eup %5599 }
0x188a   :  { %v2146_v32 = vmul.f32 %v5600_v35, %v2117_v57  ;;  %v2301_v57 = vld [vmem:[#allocation7 + $0x20] sm:$0xff] }
0x188b   :  { %v5220_v63 = vpack.c.bf16 %v2302_v4, %v2301_v57 }
0x188c   :  { %v2153_v31 = vmul.f32 %v2152_v24, %v2146_v32  ;;  %v2297_v32 = vrot.slane %v6192_v47, %v2296_v7 }
0x188d   :  { %v5602_v37 = vpop.eup %5601  ;;  %5221 = vmatprep.subr.bf16.mxu1 %v5220_v63 }
0x188e   :  { %v2159_v1 = vadd.f32 %v2158_v36, %v2153_v31  ;;  %v2148_v11 = vmul.f32 %v5602_v37, %v2118_v16  ;;  %5223 = vmatpush3.bf16.msra.mxu1 %v5220_v63 }
0x188f   :  { %5225 = vmatprep.subr.bf16.mxu1 %v5224_v55 }
0x1890   :  { %4949 = vmatprep.mubr.msk.f32.mxu0 %vm127_vm0, %v2159_v1  ;;  %v2154_v40 = vmul.f32 %v2152_v24, %v2148_v11  ;;  %v6369_v11 = vld [vmem:[%s6710_s7 + $0x2] sm:$0x3] }
0x1891   :  { %v2322_v47 = vrot.slane %v6369_v11, %v6022_v10 }
0x1892   :  { %v2160_v41 = vadd.f32 %v2158_v36, %v2154_v40  ;;  %5227 = vmatpush3.bf16.msra.mxu1 %v5224_v55 }
0x1894   :  { %4950 = vmatmul.mubr.msk.f32.vlgmr.msra.gmra.mrb[18].mxu0 %vm127_vm0, %v2160_v41 }
0x1967   :  { %v4951_v42 = vpop.f32.mrb[18].mxu0 }
0x1968   :  { %v2243_v38 = vadd.f32 %v4951_v42, %v2164_v39  ;;  %v2237_v43 = vpop.f32.mrb[19].mxu0 }
0x1969   :  { %v2238_v44 = vadd.f32 %v2237_v43, %v2164_v39 }
0x196a   :  { %v2247_v46 = vadd.f32 %v2243_v38, %v2160_v41 }
0x196b   :  { %v2246_v49 = vadd.f32 %v2238_v44, %v2159_v1 }
0x196c   :  { %v2251_v50 = vsel %vm127_vm0, %v2247_v46, 0.0 }
0x196d   :  { %2252 = vadd.xlane.f32.xlu0 %v2251_v50  ;;  %v2248_v51 = vsel %vm127_vm0, %v2246_v49, 0.0 }
0x196e   :  { %2249 = vadd.xlane.f32.xlu1 %v2248_v51 }
0x19fa   :  { %v2253_v52 = vpop.xlane.xlu0 %2252 }
0x19fb   :  { %v2255_v53 = vmul.f32 0.03125, %v2253_v52  ;;  %v2250_v54 = vpop.xlane.xlu1 %2249 }
0x19fc   :  { %v2254_v56 = vmul.f32 0.03125, %v2250_v54 }
0x19fd   :  { %v2257_v17 = vsub.f32 %v2247_v46, %v2255_v53 }
0x19fe   :  { %v2256_v45 = vsub.f32 %v2246_v49, %v2254_v56 }
0x19ff   :  { %v2259_v59 = vmul.f32 %v2257_v17, %v2257_v17 }
0x1a00   :  { %v2258_v61 = vmul.f32 %v2256_v45, %v2256_v45 }
0x1a01   :  { %v2263_v62 = vsel %vm127_vm0, %v2259_v59, 0.0  ;;  %v6400_v59 = vld [vmem:[#allocation2 + $0x8] sm:$0xff] }
0x1a02   :  { %2264 = vadd.xlane.f32.xlu0 %v2263_v62  ;;  %v2260_v16 = vsel %vm127_vm0, %v2258_v61, 0.0 }
0x1a03   :  { %2261 = vadd.xlane.f32.xlu1 %v2260_v16 }
0x1a8f   :  { %v2265_v0 = vpop.xlane.xlu0 %2264 }
0x1a90   :  { %v2267_v2 = vmul.f32 0.03125, %v2265_v0  ;;  %v2262_v3 = vpop.xlane.xlu1 %2261 }
0x1a91   :  { %v2266_v14 = vmul.f32 0.03125, %v2262_v3 }
0x1a92   :  { %v2269_v6 = vadd.f32 1e-12, %v2267_v2 }
0x1a93   :  { %v2268_v8 = vadd.f32 1e-12, %v2266_v14 }
0x1a94   :  { %5603 = vrsqrt.f32 %v2269_v6  ;;  %vm2279_vm13 = vcmp.eq.f32.partialorder %v2269_v6, inf  ;;  %v2282_v18 = vand.u32 2147483648, %v2269_v6  ;;  %vm2281_vm14 = vcmp.eq.f32.partialorder %v2269_v6, 0.0 }
0x1a95   :  { %5605 = vrsqrt.f32 %v2268_v8  ;;  %vm2272_vm15 = vcmp.eq.f32.partialorder %v2268_v8, inf  ;;  %v2275_v22 = vand.u32 2147483648, %v2268_v8  ;;  %vm2274_vm5 = vcmp.eq.f32.partialorder %v2268_v8, 0.0 }
0x1a9e   :  { %v5604_v12 = vpop.eup %5603 }
0x1a9f   :  { %v5606_v13 = vpop.eup %5605  ;;  %v2278_v15 = vmul.f32 %v5604_v12, %v2269_v6 }
0x1aa0   :  { %v2271_v19 = vmul.f32 %v5606_v13, %v2268_v8 }
0x1aa1   :  { %v2280_v20 = vsel %vm2279_vm13, %v2269_v6, %v2278_v15 }
0x1aa2   :  { %v2283_v25 = vsel %vm2281_vm14, %v2282_v18, %v2280_v20  ;;  %v2273_v26 = vsel %vm2272_vm15, %v2268_v8, %v2271_v19 }
0x1aa3   :  { %5607 = vrcp.f32 %v2283_v25  ;;  %v2276_v27 = vsel %vm2274_vm5, %v2275_v22, %v2273_v26 }
0x1aa4   :  { %5609 = vrcp.f32 %v2276_v27 }
0x1aad   :  { %v5608_v30 = vpop.eup %5607 }
0x1aae   :  { %v5610_v33 = vpop.eup %5609  ;;  %v2287_v24 = vmul.f32 %v5608_v30, %v2257_v17  ;;  %v6397_v17 = vld [vmem:[#allocation2] sm:$0xff] }
0x1aaf   :  { %v2285_v35 = vmul.f32 %v5610_v33, %v2256_v45 }
0x1ab0   :  { %v2293_v36 = vmul.f32 %v2291_v5, %v2287_v24 }
0x1ab1   :  { %v2292_v31 = vmul.f32 %v2291_v5, %v2285_v35 }
0x1ab2   :  { %v6360_v1 = vadd.f32 %v2297_v32, %v2293_v36 }
0x1ab3   :  { %v6358_v37 = vadd.f32 %v2297_v32, %v2292_v31 }
0x1ab5   :  { %4960 = vmatprep.mubr.msk.f32.mxu1 %vm127_vm0, %v6358_v37 }
0x1ab6   :  { %4961 = vmatmul.mubr.msk.f32.vlgmr.msra.gmra.mrb[20].mxu1 %vm127_vm0, %v6360_v1 }
0x1b89   :  { %v4962_v40 = vpop.f32.mrb[20].mxu1 }
0x1b8a   :  { %v6373_v41 = vadd.f32 %v4962_v40, %v2322_v47  ;;  %v2395_v39 = vpop.f32.mrb[21].mxu1 }
0x1b8b   :  { %v6375_v42 = vadd.f32 %v2395_v39, %v2322_v47 }
0x1b8d   :  { %4967 = vmatprep.mubr.msk.f32.mxu0 %vm215_vm1, %v6375_v42  ;;  %v6381_v38 = vpack.i.bf16 %v6373_v41, %v6375_v42 }
0x1b8f   :  { %5439 = vrot.lane.b32.xlu1 %v6381_v38, %s5852_s0 }
0x1b93   :  { %5444 = vrot.lane.b32.xlu1 %v6381_v38, %s5853_s13 }
0x1b97   :  { %2602 = vrot.lane.b32.xlu1 %v6375_v42, %s5855_s10 }
0x1b9b   :  { %2604 = vrot.lane.b32.xlu1 %v6373_v41, %s5855_s10 }
0x1c01   :  { %v5440_v43 = vpop.permute.xlu1 %5439 }
0x1c02   :  { %v5442_v44 = vunpack.i.h.bf16 %v5440_v43  ;;  %v5441_v46 = vunpack.i.l.bf16 %v5440_v43 }
0x1c04   :  { %v5228_v49 = vpack.c.bf16 %v5442_v44, %v5441_v46 }
0x1c05   :  { %v5445_v50 = vpop.permute.xlu1 %5444 }
0x1c06   :  { %v5447_v51 = vunpack.i.h.bf16 %v5445_v50  ;;  %v5446_v52 = vunpack.i.l.bf16 %v5445_v50  ;;  %5230 = vmatprep.subr.msk.bf16.mxu0 %vm6045_vm2, %v5228_v49 }
0x1c07   :  { %5233 = vmatpush3.bf16.xpose.msk.msra.mxu0 %vm6045_vm2, %v5228_v49 }
0x1c08   :  { %v5234_v53 = vpack.c.bf16 %v5447_v51, %v5446_v52 }
0x1c09   :  { %v2603_v26 = vpop.permute.xlu1 %2602 }
0x1c0a   :  { %5235 = vmatprep.subr.bf16.mxu1 %v5234_v53 }
0x1c0b   :  { %5237 = vmatpush3.bf16.msra.mxu1 %v5234_v53 }
0x1c0d   :  { %v2605_v27 = vpop.permute.xlu1 %2604 }
0x1c0e   :  { %4968 = vmatmul.mubr.msk.f32.vlgmr.msra.gmra.mrb[20].mxu0 %vm215_vm1, %v6373_v41 }
0x1ce1   :  { %v4969_v54 = vpop.f32.mrb[20].mxu0 }
0x1ce2   :  { %v2484_v56 = vpop.f32.mrb[21].mxu0  ;;  %v2490_v61 = vadd.f32 %v6400_v59, %v4969_v54 }
0x1ce3   :  { %v2485_v45 = vadd.f32 %v6397_v17, %v2484_v56 }
0x1ce4   :  { %v2496_v16 = vsel %vm299_vm3, %v2490_v61, -inf }
0x1ce5   :  { %v2493_v62 = vsel %vm299_vm3, %v2485_v45, -inf }
0x1ce6   :  { %2494 = vmax.xlane.f32.xlu0 %v2493_v62 }
0x1cea   :  { %2497 = vmax.xlane.f32.xlu0 %v2496_v16 }
0x1d73   :  { %v2495_v57 = vpop.xlane.xlu0 %2494 }
0x1d74   :  { %v2499_v4 = vsub.f32 %v2485_v45, %v2495_v57 }
0x1d76   :  { %v2501_v60 = vmul.f32 1.442695, %v2499_v4 }
0x1d77   :  { %v2498_v58 = vpop.xlane.xlu0 %2497 }
0x1d78   :  { %v2500_v63 = vsub.f32 %v2490_v61, %v2498_v58 }
0x1d7a   :  { %v2503_v55 = vmul.f32 1.442695, %v2500_v63 }
0x1d7c   :  { %5611 = vpow2.f32 %v2503_v55 }
0x1d7d   :  { %5613 = vpow2.f32 %v2501_v60 }
0x1d86   :  { %v5612_v0 = vpop.eup %5611 }
0x1d87   :  { %v2508_v2 = vsel %vm299_vm3, %v5612_v0, 0.0  ;;  %v5614_v3 = vpop.eup %5613 }
0x1d88   :  { %2509 = vadd.xlane.f32.xlu0 %v2508_v2  ;;  %v2505_v14 = vsel %vm299_vm3, %v5614_v3, 0.0 }
0x1d8c   :  { %2506 = vadd.xlane.f32.xlu0 %v2505_v14 }
0x1da2   :  { %5449 = vrot.lane.b32.xlu0 %v6381_v38, %s5854_s3 }
0x1e15   :  { %v2510_v6 = vpop.xlane.xlu0 %2509 }
0x1e16   :  { %5615 = vrcp.f32 %v2510_v6 }
0x1e19   :  { %v2507_v8 = vpop.xlane.xlu0 %2506 }
0x1e1a   :  { %5617 = vrcp.f32 %v2507_v8 }
0x1e1d   :  { %v5450_v12 = vpop.permute.xlu0 %5449 }
0x1e1e   :  { %v5452_v13 = vunpack.i.h.bf16 %v5450_v12  ;;  %v5451_v15 = vunpack.i.l.bf16 %v5450_v12 }
0x1e20   :  { %v5238_v18 = vpack.c.bf16 %v5452_v13, %v5451_v15  ;;  %v5616_v19 = vpop.eup %5615 }
0x1e21   :  { %v2514_v25 = vmul.f32 %v5616_v19, %v5612_v0 }
0x1e22   :  { %5240 = vmatprep.subr.msk.bf16.mxu1 %vm6045_vm2, %v5238_v18 }
0x1e24   :  { %v5618_v20 = vpop.eup %5617 }
0x1e25   :  { %v2512_v22 = vmul.f32 %v5618_v20, %v5614_v3 }
0x1e27   :  { %4974 = vmatprep.mubr.msk.f32.mxu1 %vm299_vm3, %v2512_v22 }
0x1e28   :  { %4975 = vmatmul.mubr.msk.f32.vlgmr.msra.gmra.mrb[22].mxu1 %vm299_vm3, %v2514_v25 }
0x1e29   :  { %5243 = vmatpush3.bf16.xpose.msk.msra.mxu1 %vm6045_vm2, %v5238_v18  ;;  %4981 = vmatprep.mubr.msk.f32.mxu1 %vm215_vm1, %v2603_v26 }
0x1e30   :  { %4982 = vmatmul.mubr.msk.f32.vlgmr.msra.gmra.mrb[24].mxu1 %vm215_vm1, %v2605_v27 }
0x1efb   :  { %v6417_v5 = vpop.f32.mrb[22].mxu1 }
0x1efc   :  { %v6419_v30 = vpop.f32.mrb[23].mxu1 }
0x1f03   :  { %v4983_v33 = vpop.f32.mrb[24].mxu1 }
0x1f04   :  { %v2690_v24 = vadd.f32 %v6400_v59, %v4983_v33  ;;  %v2684_v35 = vpop.f32.mrb[25].mxu1 }
0x1f05   :  { %v2685_v32 = vadd.f32 %v6397_v17, %v2684_v35 }
0x1f06   :  { %v2696_v36 = vsel %vm299_vm3, %v2690_v24, -inf }
0x1f07   :  { %2697 = vmax.xlane.f32.xlu0 %v2696_v36  ;;  %v2693_v31 = vsel %vm299_vm3, %v2685_v32, -inf }
0x1f08   :  { %2694 = vmax.xlane.f32.xlu1 %v2693_v31 }
0x1f19   :  { %5459 = vrot.lane.b32.xlu1 %v6381_v38, %s5857_s2 }
0x1f1d   :  { %5454 = vrot.lane.b32.xlu0 %v6381_v38, %s5856_s14 }
0x1f21   :  { %2804 = vrot.lane.b32.xlu0 %v6373_v41, %s5858_s15 }
0x1f94   :  { %v2698_v47 = vpop.xlane.xlu0 %2697 }
0x1f95   :  { %v2700_v40 = vsub.f32 %v2690_v24, %v2698_v47  ;;  %v2695_v39 = vpop.xlane.xlu1 %2694 }
0x1f96   :  { %v2699_v43 = vsub.f32 %v2685_v32, %v2695_v39 }
0x1f97   :  { %v2703_v44 = vmul.f32 1.442695, %v2700_v40 }
0x1f98   :  { %v2701_v46 = vmul.f32 1.442695, %v2699_v43  ;;  %v5455_v49 = vpop.permute.xlu0 %5454 }
0x1f99   :  { %5619 = vpow2.f32 %v2703_v44  ;;  %v5457_v50 = vunpack.i.h.bf16 %v5455_v49  ;;  %v5456_v51 = vunpack.i.l.bf16 %v5455_v49  ;;  %v5460_v52 = vpop.permute.xlu1 %5459 }
0x1f9a   :  { %v5462_v53 = vunpack.i.h.bf16 %v5460_v52  ;;  %v5461_v54 = vunpack.i.l.bf16 %v5460_v52  ;;  %5621 = vpow2.f32 %v2701_v46 }
0x1f9b   :  { %v5244_v56 = vpack.c.bf16 %v5457_v50, %v5456_v51 }
0x1f9c   :  { %v5248_v45 = vpack.c.bf16 %v5462_v53, %v5461_v54  ;;  %v2805_v3 = vpop.permute.xlu0 %2804 }
0x1f9d   :  { %5245 = vmatprep.subr.bf16.mxu0 %v5244_v56 }
0x1f9e   :  { %5247 = vmatpush3.bf16.msra.mxu0 %v5244_v56 }
0x1f9f   :  { %5250 = vmatprep.subr.msk.bf16.mxu0 %vm6045_vm2, %v5248_v45 }
0x1fa3   :  { %v5620_v61 = vpop.eup %5619 }
0x1fa4   :  { %v2708_v62 = vsel %vm299_vm3, %v5620_v61, 0.0  ;;  %v5622_v16 = vpop.eup %5621 }
0x1fa5   :  { %2709 = vadd.xlane.f32.xlu1 %v2708_v62  ;;  %v2705_v57 = vsel %vm299_vm3, %v5622_v16, 0.0 }
0x1fa9   :  { %2706 = vadd.xlane.f32.xlu1 %v2705_v57 }
0x1fba   :  { %2802 = vrot.lane.b32.xlu1 %v6375_v42, %s5858_s15 }
0x2032   :  { %v2710_v4 = vpop.xlane.xlu1 %2709 }
0x2033   :  { %5623 = vrcp.f32 %v2710_v4 }
0x2036   :  { %v2707_v58 = vpop.xlane.xlu1 %2706 }
0x2037   :  { %5625 = vrcp.f32 %v2707_v58 }
0x203a   :  { %v2803_v2 = vpop.permute.xlu1 %2802 }
0x203d   :  { %v5624_v63 = vpop.eup %5623 }
0x203e   :  { %v2714_v0 = vmul.f32 %v5624_v63, %v5620_v61 }
0x2041   :  { %v5626_v60 = vpop.eup %5625 }
0x2042   :  { %v2712_v55 = vmul.f32 %v5626_v60, %v5622_v16 }
0x2044   :  { %4988 = vmatprep.mubr.msk.f32.mxu0 %vm299_vm3, %v2712_v55 }
0x2045   :  { %4989 = vmatmul.mubr.msk.f32.vlgmr.msra.gmra.mrb[22].mxu0 %vm299_vm3, %v2714_v0 }
0x2046   :  { %5253 = vmatpush3.bf16.xpose.msk.msra.mxu0 %vm6045_vm2, %v5248_v45  ;;  %4995 = vmatprep.mubr.msk.f32.mxu0 %vm215_vm1, %v2803_v2  ;;  %v5701_v45 = vld [vmem:[%s6704_s1] sm:$0xff] }
0x204d   :  { %4996 = vmatmul.mubr.msk.f32.vlgmr.msra.gmra.mrb[24].mxu0 %vm215_vm1, %v2805_v3 }
0x2118   :  { %v6443_v14 = vpop.f32.mrb[22].mxu0 }
0x2119   :  { %v6445_v6 = vpop.f32.mrb[23].mxu0 }
0x2120   :  { %v4997_v8 = vpop.f32.mrb[24].mxu0 }
0x2121   :  { %v2890_v12 = vadd.f32 %v6400_v59, %v4997_v8  ;;  %v2884_v13 = vpop.f32.mrb[25].mxu0 }
0x2122   :  { %v2885_v15 = vadd.f32 %v6397_v17, %v2884_v13 }
0x2123   :  { %v2896_v18 = vsel %vm299_vm3, %v2890_v12, -inf }
0x2124   :  { %2897 = vmax.xlane.f32.xlu0 %v2896_v18  ;;  %v2893_v19 = vsel %vm299_vm3, %v2885_v15, -inf }
0x2125   :  { %2894 = vmax.xlane.f32.xlu1 %v2893_v19 }
0x21b1   :  { %v2898_v20 = vpop.xlane.xlu0 %2897 }
0x21b2   :  { %v2900_v22 = vsub.f32 %v2890_v12, %v2898_v20  ;;  %v2895_v25 = vpop.xlane.xlu1 %2894 }
0x21b3   :  { %v2899_v26 = vsub.f32 %v2885_v15, %v2895_v25 }
0x21b4   :  { %v2903_v27 = vmul.f32 1.442695, %v2900_v22 }
0x21b5   :  { %v2901_v33 = vmul.f32 1.442695, %v2899_v26 }
0x21b6   :  { %5627 = vpow2.f32 %v2903_v27 }
0x21b7   :  { %5629 = vpow2.f32 %v2901_v33 }
0x21c0   :  { %v5628_v24 = vpop.eup %5627 }
0x21c1   :  { %v5630_v35 = vpop.eup %5629  ;;  %v2908_v32 = vsel %vm299_vm3, %v5628_v24, 0.0 }
0x21c2   :  { %2909 = vadd.xlane.f32.xlu1 %v2908_v32  ;;  %v2905_v36 = vsel %vm299_vm3, %v5630_v35, 0.0 }
0x21c3   :  { %2906 = vadd.xlane.f32.xlu0 %v2905_v36 }
0x21d3   :  { %5469 = vrot.lane.b32.xlu1 %v6381_v38, %s5859_s16 }
0x21d7   :  { %3002 = vrot.lane.b32.xlu1 %v6375_v42, %s5860_s18 }
0x21d9   :  { %5464 = vrot.lane.b32.xlu0 %v6381_v38, %s5861_s19 }
0x21dd   :  { %3004 = vrot.lane.b32.xlu0 %v6373_v41, %s5860_s18 }
0x224f   :  { %v2910_v31 = vpop.xlane.xlu1 %2909 }
0x2250   :  { %5631 = vrcp.f32 %v2910_v31  ;;  %v2907_v47 = vpop.xlane.xlu0 %2906 }
0x2251   :  { %5633 = vrcp.f32 %v2907_v47 }
0x2253   :  { %v5470_v40 = vpop.permute.xlu1 %5469 }
0x2254   :  { %v5465_v39 = vpop.permute.xlu0 %5464  ;;  %v5472_v43 = vunpack.i.h.bf16 %v5470_v40  ;;  %v5471_v44 = vunpack.i.l.bf16 %v5470_v40 }
0x2255   :  { %v5467_v46 = vunpack.i.h.bf16 %v5465_v39  ;;  %v5466_v49 = vunpack.i.l.bf16 %v5465_v39 }
0x2256   :  { %v5258_v51 = vpack.c.bf16 %v5472_v43, %v5471_v44 }
0x2257   :  { %v5254_v50 = vpack.c.bf16 %v5467_v46, %v5466_v49  ;;  %v3003_v54 = vpop.permute.xlu1 %3002 }
0x2258   :  { %v3005_v56 = vpop.permute.xlu0 %3004 }
0x2259   :  { %5255 = vmatprep.subr.bf16.mxu1 %v5254_v50 }
0x225a   :  { %v5632_v42 = vpop.eup %5631  ;;  %5257 = vmatpush3.bf16.msra.mxu1 %v5254_v50 }
0x225b   :  { %v5634_v52 = vpop.eup %5633  ;;  %5260 = vmatprep.subr.msk.bf16.mxu1 %vm6045_vm2, %v5258_v51  ;;  %v2914_v53 = vmul.f32 %v5632_v42, %v5628_v24 }
0x225c   :  { %v2912_v41 = vmul.f32 %v5634_v52, %v5630_v35 }
0x225e   :  { %5002 = vmatprep.mubr.msk.f32.mxu1 %vm299_vm3, %v2912_v41  ;;  %v2307_v41 = vld [vmem:[#allocation8 + $0x28] sm:$0xff] }
0x225f   :  { %5003 = vmatmul.mubr.msk.f32.vlgmr.msra.gmra.mrb[26].mxu1 %vm299_vm3, %v2914_v53 }
0x2260   :  { %5009 = vmatprep.mubr.msk.f32.mxu1 %vm215_vm1, %v3003_v54  ;;  %v6505_v54 = vrot.slane %v6369_v11, %v6180_v28 }
0x2263   :  { %5263 = vmatpush3.bf16.xpose.msk.msra.mxu1 %vm6045_vm2, %v5258_v51 }
0x226a   :  { %5010 = vmatmul.mubr.msk.f32.vlgmr.msra.gmra.mrb[28].mxu1 %vm215_vm1, %v3005_v56 }
0x226b   :  { %5038 = vmatprep.mubr.msk.f32.mxu1 %vm127_vm0, %v5701_v45 }
0x2332   :  { %v5004_v61 = vpop.f32.mrb[26].mxu1 }
0x2333   :  { %v2993_v62 = vpop.f32.mrb[27].mxu1 }
0x233d   :  { %v5011_v16 = vpop.f32.mrb[28].mxu1 }
0x233e   :  { %v3090_v57 = vadd.f32 %v6400_v59, %v5011_v16  ;;  %v3084_v4 = vpop.f32.mrb[29].mxu1 }
0x233f   :  { %v3085_v58 = vadd.f32 %v6397_v17, %v3084_v4 }
0x2340   :  { %v3096_v63 = vsel %vm299_vm3, %v3090_v57, -inf }
0x2341   :  { %3097 = vmax.xlane.f32.xlu0 %v3096_v63  ;;  %v3093_v60 = vsel %vm299_vm3, %v3085_v58, -inf  ;;  %v2309_v63 = vld [vmem:[#allocation8 + $0x38] sm:$0xff] }
0x2342   :  { %3094 = vmax.xlane.f32.xlu1 %v3093_v60 }
0x23ce   :  { %v3098_v55 = vpop.xlane.xlu0 %3097 }
0x23cf   :  { %v3100_v0 = vsub.f32 %v3090_v57, %v3098_v55  ;;  %v3095_v2 = vpop.xlane.xlu1 %3094 }
0x23d0   :  { %v3099_v3 = vsub.f32 %v3085_v58, %v3095_v2  ;;  %v2308_v58 = vld [vmem:[#allocation8 + $0x30] sm:$0xff] }
0x23d1   :  { %v3103_v8 = vmul.f32 1.442695, %v3100_v0  ;;  %v5483_v60 = vpack.i.bf16 %v2309_v63, %v2308_v58 }
0x23d2   :  { %v3101_v12 = vmul.f32 1.442695, %v3099_v3 }
0x23d3   :  { %5635 = vpow2.f32 %v3103_v8 }
0x23d4   :  { %5637 = vpow2.f32 %v3101_v12  ;;  %v5272_v12 = vpack.c.bf16 %v2309_v63, %v2308_v58  ;;  %v6559_v58 = vld [vmem:[#allocation5] sm:$0xff] }
0x23dd   :  { %v5636_v13 = vpop.eup %5635 }
0x23de   :  { %v5638_v15 = vpop.eup %5637  ;;  %v3108_v59 = vsel %vm299_vm3, %v5636_v13, 0.0 }
0x23df   :  { %3109 = vadd.xlane.f32.xlu1 %v3108_v59  ;;  %v3105_v17 = vsel %vm299_vm3, %v5638_v15, 0.0 }
0x23e0   :  { %3106 = vadd.xlane.f32.xlu0 %v3105_v17 }
0x23f0   :  { %3204 = vrot.lane.b32.xlu1 %v6445_v6, %s5848_s22 }
0x23f4   :  { %3206 = vrot.lane.b32.xlu1 %v6443_v14, %s5848_s22 }
0x23f6   :  { %5474 = vrot.lane.b32.xlu0 %v6381_v38, %s5862_s20 }
0x23f8   :  { %3214 = vrot.lane.b32.xlu1 %v5004_v61, %s5863_s23 }
0x23fa   :  { %3212 = vrot.lane.b32.xlu0 %v2993_v62, %s5863_s23 }
0x246c   :  { %v3110_v18 = vpop.xlane.xlu1 %3109 }
0x246d   :  { %5639 = vrcp.f32 %v3110_v18  ;;  %v3107_v19 = vpop.xlane.xlu0 %3106 }
0x246e   :  { %5641 = vrcp.f32 %v3107_v19 }
0x2470   :  { %v3205_v35 = vpop.permute.xlu1 %3204 }
0x2471   :  { %v5475_v20 = vpop.permute.xlu0 %5474  ;;  %v3226_v40 = vsel %vm215_vm1, %v6419_v30, %v3205_v35  ;;  %v2306_v30 = vld [vmem:[#allocation8 + $0x20] sm:$0xff] }
0x2472   :  { %v5477_v22 = vunpack.i.h.bf16 %v5475_v20  ;;  %v5476_v25 = vunpack.i.l.bf16 %v5475_v20  ;;  %v5478_v53 = vpack.i.bf16 %v2307_v41, %v2306_v30  ;;  %v5268_v8 = vpack.c.bf16 %v2307_v41, %v2306_v30 }
0x2474   :  { %v5264_v26 = vpack.c.bf16 %v5477_v22, %v5476_v25  ;;  %v3207_v32 = vpop.permute.xlu1 %3206 }
0x2475   :  { %v3213_v31 = vpop.permute.xlu0 %3212  ;;  %v3227_v47 = vsel %vm215_vm1, %v6417_v5, %v3207_v32 }
0x2476   :  { %5265 = vmatprep.subr.bf16.mxu0 %v5264_v26  ;;  %v3228_v44 = vsel %vm299_vm3, %v3226_v40, %v3213_v31  ;;  %v6524_v40 = vld [vmem:[%s6711_s8 + $0x8] sm:$0x7f] }
0x2477   :  { %v5640_v6 = vpop.eup %5639  ;;  %5267 = vmatpush3.bf16.msra.mxu0 %v5264_v26 }
0x2478   :  { %v5642_v27 = vpop.eup %5641  ;;  %v3114_v33 = vmul.f32 %v5640_v6, %v5636_v13  ;;  %v3215_v36 = vpop.permute.xlu1 %3214  ;;  %5269 = vmatprep.subr.bf16.mxu0 %v5268_v8 }
0x2479   :  { %v3112_v14 = vmul.f32 %v5642_v27, %v5638_v15  ;;  %v3229_v39 = vsel %vm299_vm3, %v3227_v47, %v3215_v36 }
0x247b   :  { %5016 = vmatprep.mubr.msk.f32.mxu0 %vm299_vm3, %v3112_v14 }
0x247c   :  { %5017 = vmatmul.mubr.msk.f32.vlgmr.msra.gmra.mrb[26].mxu0 %vm299_vm3, %v3114_v33  ;;  %v5702_v33 = vld [vmem:[%s6704_s1 + $0x8] sm:$0xff]  ;;  %s5865_s1 = smov [#allocation11]  }
0x247d   :  { %5271 = vmatpush3.bf16.msra.mxu0 %v5268_v8  ;;  %s4492_s8 = sshll.u32 %s5865_s1, 4  ;;  %s4493_s8 = int_to_ptr.vmem [resolvable:$true] %s4492_s8 }
0x247e   :  { %5273 = vmatprep.subr.bf16.mxu0 %v5272_v12  ;;  %p5820_p13 = scmp.lt.s32.totalorder %s4493_s8, %s4493_s8 }
0x2481   :  { %5275 = vmatpush3.bf16.msra.mxu0 %v5272_v12 }
0x254f   :  { %v5018_v38 = vpop.f32.mrb[26].mxu0 }
0x2550   :  { %3222 = vrot.lane.b32.xlu1 %v5018_v38, %s5864_s24  ;;  %v3193_v24 = vpop.f32.mrb[27].mxu0 }
0x2551   :  { %3220 = vrot.lane.b32.xlu0 %v3193_v24, %s5864_s24 }
0x25c2   :  { %v3223_v43 = vpop.permute.xlu1 %3222 }
0x25c3   :  { %v3231_v46 = vsel %vm1037_vm4, %v3229_v39, %v3223_v43  ;;  %v3221_v49 = vpop.permute.xlu0 %3220  ;;  %v3277_v39 = vrot.slane %v6524_v40, %v6180_v28 }
0x25c4   :  { %v3233_v50 = vadd.f32 %v3231_v46, %v6360_v1  ;;  %v3230_v51 = vsel %vm1037_vm4, %v3228_v44, %v3221_v49  ;;  %v3283_v46 = vrot.slane %v6524_v40, %v1091_v48 }
0x25c5   :  { %v3232_v42 = vadd.f32 %v3230_v51, %v6358_v37 }
0x25c6   :  { %v3237_v52 = vsel %vm127_vm0, %v3233_v50, 0.0 }
0x25c7   :  { %3238 = vadd.xlane.f32.xlu1 %v3237_v52  ;;  %v3234_v5 = vsel %vm127_vm0, %v3232_v42, 0.0 }
0x25c8   :  { %3235 = vadd.xlane.f32.xlu0 %v3234_v5 }
0x25d8   :  { %5479 = vrot.lane.b32.xlu1 %v5478_v53, %s5852_s0 }
0x25dc   :  { %3388 = vrot.lane.b32.xlu1 %v6505_v54, %s5852_s0 }
0x2654   :  { %v3239_v1 = vpop.xlane.xlu1 %3238 }
0x2655   :  { %v3241_v37 = vmul.f32 0.03125, %v3239_v1  ;;  %v3236_v56 = vpop.xlane.xlu0 %3235 }
0x2656   :  { %v3240_v45 = vmul.f32 0.03125, %v3236_v56 }
0x2657   :  { %v6510_v61 = vsub.f32 %v3233_v50, %v3241_v37 }
0x2658   :  { %v3242_v62 = vsub.f32 %v3232_v42, %v3240_v45  ;;  %v5480_v55 = vpop.permute.xlu1 %5479 }
0x2659   :  { %v3245_v4 = vmul.f32 %v6510_v61, %v6510_v61  ;;  %v5482_v0 = vunpack.i.h.bf16 %v5480_v55  ;;  %v5481_v2 = vunpack.i.l.bf16 %v5480_v55 }
0x265a   :  { %v3244_v16 = vmul.f32 %v3242_v62, %v3242_v62 }
0x265b   :  { %v3249_v11 = vsel %vm127_vm0, %v3245_v4, 0.0  ;;  %v5276_v3 = vpack.c.bf16 %v5482_v0, %v5481_v2 }
0x265c   :  { %v3246_v57 = vsel %vm127_vm0, %v3244_v16, 0.0  ;;  %v3389_v28 = vpop.permute.xlu1 %3388 }
0x265d   :  { %3247 = vadd.xlane.f32.xlu0 %v3246_v57  ;;  %5277 = vmatprep.subr.bf16.mxu1 %v5276_v3  ;;  %v6556_v57 = vld [vmem:[#allocation5 + $0x8] sm:$0xff] }
0x265e   :  { %5279 = vmatpush3.bf16.msra.mxu1 %v5276_v3 }
0x2661   :  { %3250 = vadd.xlane.f32.xlu0 %v3249_v11 }
0x2677   :  { %5484 = vrot.lane.b32.xlu0 %v5483_v60, %s5852_s0 }
0x26ea   :  { %v3248_v13 = vpop.xlane.xlu0 %3247 }
0x26eb   :  { %v3252_v15 = vmul.f32 0.03125, %v3248_v13 }
0x26ed   :  { %v3254_v59 = vadd.f32 1e-12, %v3252_v15 }
0x26ee   :  { %v3251_v17 = vpop.xlane.xlu0 %3250 }
0x26ef   :  { %5643 = vrsqrt.f32 %v3254_v59  ;;  %v3253_v18 = vmul.f32 0.03125, %v3251_v17  ;;  %vm3258_vm6 = vcmp.eq.f32.partialorder %v3254_v59, inf  ;;  %v3261_v14 = vand.u32 2147483648, %v3254_v59 }
0x26f0   :  { %vm3260_vm7 = vcmp.eq.f32.partialorder %v3254_v59, 0.0 }
0x26f1   :  { %v3255_v19 = vadd.f32 1e-12, %v3253_v18 }
0x26f2   :  { %v5485_v20 = vpop.permute.xlu0 %5484 }
0x26f3   :  { %v5487_v22 = vunpack.i.h.bf16 %v5485_v20  ;;  %v5486_v25 = vunpack.i.l.bf16 %v5485_v20  ;;  %5645 = vrsqrt.f32 %v3255_v19  ;;  %vm3265_vm8 = vcmp.eq.f32.partialorder %v3255_v19, inf }
0x26f4   :  { %v3268_v36 = vand.u32 2147483648, %v3255_v19  ;;  %vm3267_vm9 = vcmp.eq.f32.partialorder %v3255_v19, 0.0 }
0x26f5   :  { %v5280_v26 = vpack.c.bf16 %v5487_v22, %v5486_v25 }
0x26f7   :  { %5281 = vmatprep.subr.bf16.mxu1 %v5280_v26 }
0x26f8   :  { %5283 = vmatpush3.bf16.msra.mxu1 %v5280_v26 }
0x26f9   :  { %v5644_v6 = vpop.eup %5643 }
0x26fa   :  { %v3257_v27 = vmul.f32 %v5644_v6, %v3254_v59 }
0x26fb   :  { %5039 = vmatmul.mubr.msk.f32.vlgmr.msra.gmra.mrb[30].mxu1 %vm127_vm0, %v5702_v33 }
0x26fc   :  { %v3259_v38 = vsel %vm3258_vm6, %v3254_v59, %v3257_v27 }
0x26fd   :  { %v3262_v24 = vsel %vm3260_vm7, %v3261_v14, %v3259_v38  ;;  %v5646_v35 = vpop.eup %5645 }
0x26fe   :  { %5647 = vrcp.f32 %v3262_v24  ;;  %v3264_v32 = vmul.f32 %v5646_v35, %v3255_v19 }
0x2700   :  { %v3266_v31 = vsel %vm3265_vm8, %v3255_v19, %v3264_v32 }
0x2701   :  { %v3269_v47 = vsel %vm3267_vm9, %v3268_v36, %v3266_v31 }
0x2702   :  { %5649 = vrcp.f32 %v3269_v47 }
0x2708   :  { %v5648_v43 = vpop.eup %5647 }
0x2709   :  { %v3271_v44 = vmul.f32 %v5648_v43, %v3242_v62 }
0x270b   :  { %v3278_v49 = vmul.f32 %v3277_v39, %v3271_v44 }
0x270c   :  { %v5650_v50 = vpop.eup %5649 }
0x270d   :  { %v6531_v51 = vadd.f32 %v3283_v46, %v3278_v49  ;;  %v3273_v42 = vmul.f32 %v5650_v50, %v6510_v61 }
0x270f   :  { %5027 = vmatprep.mubr.msk.f32.mxu0 %vm127_vm0, %v6531_v51  ;;  %v3279_v52 = vmul.f32 %v3277_v39, %v3273_v42 }
0x2711   :  { %v6536_v5 = vadd.f32 %v3283_v46, %v3279_v52 }
0x2713   :  { %5028 = vmatmul.mubr.msk.f32.vlgmr.msra.gmra.mrb[28].mxu0 %vm127_vm0, %v6536_v5 }
0x27ce   :  { %v5040_v30 = vpop.f32.mrb[30].mxu1 }
0x27cf   :  { %v3463_v41 = vadd.f32 %v5040_v30, %v3389_v28  ;;  %v3457_v53 = vpop.f32.mrb[31].mxu1 }
0x27d0   :  { %v3458_v48 = vadd.f32 %v3457_v53, %v3389_v28 }
0x27d2   :  { %v5284_v1 = vpack.c.bf16 %v3463_v41, %v3458_v48  ;;  %v6540_v37 = vpack.i.bf16 %v3463_v41, %v3458_v48 }
0x27d4   :  { %5286 = vmatprep.subr.msk.bf16.mxu0 %vm6045_vm2, %v5284_v1 }
0x27d5   :  { %5289 = vmatpush3.bf16.xpose.msk.msra.mxu0 %vm6045_vm2, %v5284_v1 }
0x27e6   :  { %v5029_v56 = vpop.f32.mrb[28].mxu0 }
0x27e7   :  { %v3362_v45 = vpop.f32.mrb[29].mxu0  ;;  %v6550_v62 = vadd.f32 %v5029_v56, %v6505_v54 }
0x27e8   :  { %v6547_v61 = vadd.f32 %v3362_v45, %v6505_v54 }
0x27ea   :  { %5045 = vmatprep.mubr.msk.f32.mxu0 %vm215_vm1, %v6547_v61 }
0x27eb   :  { %5046 = vmatmul.mubr.msk.f32.vlgmr.msra.gmra.mrb[30].mxu0 %vm215_vm1, %v6550_v62 }
0x28be   :  { %v5047_v16 = vpop.f32.mrb[30].mxu0 }
0x28bf   :  { %v3550_v4 = vadd.f32 %v6556_v57, %v5047_v16  ;;  %v3544_v11 = vpop.f32.mrb[31].mxu0 }
0x28c0   :  { %v3545_v63 = vadd.f32 %v6559_v58, %v3544_v11 }
0x28c1   :  { %v3556_v60 = vsel %vm299_vm3, %v3550_v4, -inf }
0x28c2   :  { %3557 = vmax.xlane.f32.xlu0 %v3556_v60  ;;  %v3553_v54 = vsel %vm299_vm3, %v3545_v63, -inf }
0x28c3   :  { %3554 = vmax.xlane.f32.xlu1 %v3553_v54 }
0x294f   :  { %v3558_v55 = vpop.xlane.xlu0 %3557 }
0x2950   :  { %v3560_v0 = vsub.f32 %v3550_v4, %v3558_v55  ;;  %v3555_v2 = vpop.xlane.xlu1 %3554 }
0x2951   :  { %v3559_v3 = vsub.f32 %v3545_v63, %v3555_v2 }
0x2952   :  { %v3563_v8 = vmul.f32 1.442695, %v3560_v0 }
0x2953   :  { %v3561_v12 = vmul.f32 1.442695, %v3559_v3 }
0x2954   :  { %5651 = vpow2.f32 %v3563_v8 }
0x2955   :  { %5653 = vpow2.f32 %v3561_v12 }
0x295e   :  { %v5652_v13 = vpop.eup %5651 }
0x295f   :  { %v5654_v15 = vpop.eup %5653  ;;  %v3568_v59 = vsel %vm299_vm3, %v5652_v13, 0.0 }
0x2960   :  { %3569 = vadd.xlane.f32.xlu1 %v3568_v59  ;;  %v3565_v17 = vsel %vm299_vm3, %v5654_v15, 0.0 }
0x2961   :  { %3566 = vadd.xlane.f32.xlu0 %v3565_v17 }
0x2971   :  { %5494 = vrot.lane.b32.xlu1 %v6540_v37, %s5855_s10 }
0x2975   :  { %3662 = vrot.lane.b32.xlu1 %v6547_v61, %s5855_s10 }
0x2977   :  { %5489 = vrot.lane.b32.xlu0 %v6540_v37, %s5852_s0  ;;  %s5815_s0 = scalar_lea.vmem %s4493_s8, 256 }
0x2978   :  { %p5816_p12 = scmp.ne.s32.totalorder %s4493_s8, %s5815_s0  ;;  %p5821_p0 = scmp.lt.s32.totalorder %s5815_s0, %s5815_s0 }
0x297a   :  { %p5822_p1 = por %p5821_p0, %p5820_p13 }
0x297b   :  { %3664 = vrot.lane.b32.xlu0 %v6550_v62, %s5855_s10 }
0x297c   :  { %p5823_p2 = pnand %p5822_p1, %p5816_p12 }
0x29ed   :  { %v3570_v18 = vpop.xlane.xlu1 %3569 }
0x29ee   :  { %5655 = vrcp.f32 %v3570_v18  ;;  %v3567_v19 = vpop.xlane.xlu0 %3566 }
0x29ef   :  { %5657 = vrcp.f32 %v3567_v19 }
0x29f1   :  { %v5495_v20 = vpop.permute.xlu1 %5494 }
0x29f2   :  { %v5490_v22 = vpop.permute.xlu0 %5489  ;;  %v5497_v25 = vunpack.i.h.bf16 %v5495_v20  ;;  %v5496_v26 = vunpack.i.l.bf16 %v5495_v20 }
0x29f3   :  { %v5492_v6 = vunpack.i.h.bf16 %v5490_v22  ;;  %v5491_v27 = vunpack.i.l.bf16 %v5490_v22 }
0x29f4   :  { %v5294_v33 = vpack.c.bf16 %v5497_v25, %v5496_v26 }
0x29f5   :  { %v5290_v14 = vpack.c.bf16 %v5492_v6, %v5491_v27  ;;  %v3663_v36 = vpop.permute.xlu1 %3662 }
0x29f6   :  { %v3665_v31 = vpop.permute.xlu0 %3664 }
0x29f7   :  { %5291 = vmatprep.subr.bf16.mxu1 %v5290_v14 }
0x29f8   :  { %v5656_v38 = vpop.eup %5655  ;;  %5293 = vmatpush3.bf16.msra.mxu1 %v5290_v14 }
0x29f9   :  { %v5658_v24 = vpop.eup %5657  ;;  %5296 = vmatprep.subr.msk.bf16.mxu1 %vm6045_vm2, %v5294_v33  ;;  %v3574_v32 = vmul.f32 %v5656_v38, %v5652_v13 }
0x29fa   :  { %v3572_v35 = vmul.f32 %v5658_v24, %v5654_v15 }
0x29fc   :  { %5052 = vmatprep.mubr.msk.f32.mxu1 %vm299_vm3, %v3572_v35 }
0x29fd   :  { %5053 = vmatmul.mubr.msk.f32.vlgmr.msra.gmra.mrb[32].mxu1 %vm299_vm3, %v3574_v32 }
0x29fe   :  { %5059 = vmatprep.mubr.msk.f32.mxu1 %vm215_vm1, %v3663_v36 }
0x2a01   :  { %5299 = vmatpush3.bf16.xpose.msk.msra.mxu1 %vm6045_vm2, %v5294_v33 }
0x2a08   :  { %5060 = vmatmul.mubr.msk.f32.vlgmr.msra.gmra.mrb[34].mxu1 %vm215_vm1, %v3665_v31 }
0x2ad0   :  { %v6582_v47 = vpop.f32.mrb[32].mxu1 }
0x2ad1   :  { %v6584_v39 = vpop.f32.mrb[33].mxu1 }
0x2adb   :  { %v5061_v43 = vpop.f32.mrb[34].mxu1 }
0x2adc   :  { %v3750_v44 = vadd.f32 %v6556_v57, %v5061_v43  ;;  %v3744_v46 = vpop.f32.mrb[35].mxu1 }
0x2add   :  { %v3745_v49 = vadd.f32 %v6559_v58, %v3744_v46 }
0x2ade   :  { %v3756_v50 = vsel %vm299_vm3, %v3750_v44, -inf }
0x2adf   :  { %3757 = vmax.xlane.f32.xlu0 %v3756_v50  ;;  %v3753_v42 = vsel %vm299_vm3, %v3745_v49, -inf }
0x2ae0   :  { %3754 = vmax.xlane.f32.xlu1 %v3753_v42 }
0x2b6c   :  { %v3758_v52 = vpop.xlane.xlu0 %3757 }
0x2b6d   :  { %v3760_v28 = vsub.f32 %v3750_v44, %v3758_v52  ;;  %v3755_v30 = vpop.xlane.xlu1 %3754 }
0x2b6e   :  { %v3759_v41 = vsub.f32 %v3745_v49, %v3755_v30 }
0x2b6f   :  { %v3763_v53 = vmul.f32 1.442695, %v3760_v28 }
0x2b70   :  { %v3761_v48 = vmul.f32 1.442695, %v3759_v41 }
0x2b71   :  { %5659 = vpow2.f32 %v3763_v53 }
0x2b72   :  { %5661 = vpow2.f32 %v3761_v48 }
0x2b7b   :  { %v5660_v1 = vpop.eup %5659 }
0x2b7c   :  { %v5662_v56 = vpop.eup %5661  ;;  %v3768_v45 = vsel %vm299_vm3, %v5660_v1, 0.0 }
0x2b7d   :  { %3769 = vadd.xlane.f32.xlu1 %v3768_v45  ;;  %v3765_v16 = vsel %vm299_vm3, %v5662_v56, 0.0 }
0x2b7e   :  { %3766 = vadd.xlane.f32.xlu0 %v3765_v16 }
0x2b8e   :  { %5504 = vrot.lane.b32.xlu1 %v6540_v37, %s5858_s15 }
0x2b92   :  { %3862 = vrot.lane.b32.xlu1 %v6547_v61, %s5858_s15 }
0x2b94   :  { %5499 = vrot.lane.b32.xlu0 %v6540_v37, %s5854_s3 }
0x2b98   :  { %3864 = vrot.lane.b32.xlu0 %v6550_v62, %s5858_s15 }
0x2c0a   :  { %v3770_v4 = vpop.xlane.xlu1 %3769 }
0x2c0b   :  { %5663 = vrcp.f32 %v3770_v4  ;;  %v3767_v11 = vpop.xlane.xlu0 %3766 }
0x2c0c   :  { %5665 = vrcp.f32 %v3767_v11 }
0x2c0e   :  { %v5505_v63 = vpop.permute.xlu1 %5504 }
0x2c0f   :  { %v5500_v60 = vpop.permute.xlu0 %5499  ;;  %v5507_v54 = vunpack.i.h.bf16 %v5505_v63  ;;  %v5506_v55 = vunpack.i.l.bf16 %v5505_v63 }
0x2c10   :  { %v5502_v0 = vunpack.i.h.bf16 %v5500_v60  ;;  %v5501_v2 = vunpack.i.l.bf16 %v5500_v60 }
0x2c11   :  { %v5304_v8 = vpack.c.bf16 %v5507_v54, %v5506_v55 }
0x2c12   :  { %v5300_v3 = vpack.c.bf16 %v5502_v0, %v5501_v2  ;;  %v3863_v17 = vpop.permute.xlu1 %3862 }
0x2c13   :  { %v3865_v18 = vpop.permute.xlu0 %3864 }
0x2c14   :  { %5301 = vmatprep.subr.bf16.mxu0 %v5300_v3 }
0x2c15   :  { %v5664_v12 = vpop.eup %5663  ;;  %5303 = vmatpush3.bf16.msra.mxu0 %v5300_v3 }
0x2c16   :  { %v5666_v13 = vpop.eup %5665  ;;  %5306 = vmatprep.subr.msk.bf16.mxu0 %vm6045_vm2, %v5304_v8  ;;  %v3774_v59 = vmul.f32 %v5664_v12, %v5660_v1 }
0x2c17   :  { %v3772_v15 = vmul.f32 %v5666_v13, %v5662_v56 }
0x2c19   :  { %5066 = vmatprep.mubr.msk.f32.mxu0 %vm299_vm3, %v3772_v15 }
0x2c1a   :  { %5067 = vmatmul.mubr.msk.f32.vlgmr.msra.gmra.mrb[32].mxu0 %vm299_vm3, %v3774_v59 }
0x2c1b   :  { %5073 = vmatprep.mubr.msk.f32.mxu0 %vm215_vm1, %v3863_v17 }
0x2c1e   :  { %5309 = vmatpush3.bf16.xpose.msk.msra.mxu0 %vm6045_vm2, %v5304_v8 }
0x2c25   :  { %5074 = vmatmul.mubr.msk.f32.vlgmr.msra.gmra.mrb[34].mxu0 %vm215_vm1, %v3865_v18 }
0x2ced   :  { %v6608_v19 = vpop.f32.mrb[32].mxu0 }
0x2cee   :  { %v6610_v20 = vpop.f32.mrb[33].mxu0 }
0x2cf8   :  { %v5075_v22 = vpop.f32.mrb[34].mxu0 }
0x2cf9   :  { %v3950_v25 = vadd.f32 %v6556_v57, %v5075_v22  ;;  %v3944_v26 = vpop.f32.mrb[35].mxu0 }
0x2cfa   :  { %v3945_v6 = vadd.f32 %v6559_v58, %v3944_v26 }
0x2cfb   :  { %v3956_v27 = vsel %vm299_vm3, %v3950_v25, -inf }
0x2cfc   :  { %3957 = vmax.xlane.f32.xlu0 %v3956_v27  ;;  %v3953_v14 = vsel %vm299_vm3, %v3945_v6, -inf }
0x2cfd   :  { %3954 = vmax.xlane.f32.xlu1 %v3953_v14 }
0x2d89   :  { %v3958_v33 = vpop.xlane.xlu0 %3957 }
0x2d8a   :  { %v3960_v38 = vsub.f32 %v3950_v25, %v3958_v33  ;;  %v3955_v24 = vpop.xlane.xlu1 %3954 }
0x2d8b   :  { %v3959_v35 = vsub.f32 %v3945_v6, %v3955_v24 }
0x2d8c   :  { %v3963_v32 = vmul.f32 1.442695, %v3960_v38 }
0x2d8d   :  { %v3961_v36 = vmul.f32 1.442695, %v3959_v35 }
0x2d8e   :  { %5667 = vpow2.f32 %v3963_v32 }
0x2d8f   :  { %5669 = vpow2.f32 %v3961_v36 }
0x2d98   :  { %v5668_v31 = vpop.eup %5667 }
0x2d99   :  { %v5670_v43 = vpop.eup %5669  ;;  %v3968_v44 = vsel %vm299_vm3, %v5668_v31, 0.0 }
0x2d9a   :  { %3969 = vadd.xlane.f32.xlu1 %v3968_v44  ;;  %v3965_v46 = vsel %vm299_vm3, %v5670_v43, 0.0 }
0x2d9b   :  { %3966 = vadd.xlane.f32.xlu0 %v3965_v46 }
0x2dab   :  { %5514 = vrot.lane.b32.xlu1 %v6540_v37, %s5860_s18 }
0x2daf   :  { %4062 = vrot.lane.b32.xlu1 %v6547_v61, %s5860_s18 }
0x2db1   :  { %5509 = vrot.lane.b32.xlu0 %v6540_v37, %s5857_s2 }
0x2db5   :  { %4064 = vrot.lane.b32.xlu0 %v6550_v62, %s5860_s18 }
0x2e27   :  { %v3970_v49 = vpop.xlane.xlu1 %3969 }
0x2e28   :  { %5671 = vrcp.f32 %v3970_v49  ;;  %v3967_v50 = vpop.xlane.xlu0 %3966 }
0x2e29   :  { %5673 = vrcp.f32 %v3967_v50 }
0x2e2b   :  { %v5515_v42 = vpop.permute.xlu1 %5514 }
0x2e2c   :  { %v5510_v52 = vpop.permute.xlu0 %5509  ;;  %v5517_v28 = vunpack.i.h.bf16 %v5515_v42  ;;  %v5516_v30 = vunpack.i.l.bf16 %v5515_v42 }
0x2e2d   :  { %v5512_v41 = vunpack.i.h.bf16 %v5510_v52  ;;  %v5511_v53 = vunpack.i.l.bf16 %v5510_v52 }
0x2e2e   :  { %v5314_v1 = vpack.c.bf16 %v5517_v28, %v5516_v30 }
0x2e2f   :  { %v5310_v48 = vpack.c.bf16 %v5512_v41, %v5511_v53  ;;  %v4063_v16 = vpop.permute.xlu1 %4062 }
0x2e30   :  { %v4065_v4 = vpop.permute.xlu0 %4064 }
0x2e31   :  { %5311 = vmatprep.subr.bf16.mxu1 %v5310_v48 }
0x2e32   :  { %v5672_v61 = vpop.eup %5671  ;;  %5313 = vmatpush3.bf16.msra.mxu1 %v5310_v48 }
0x2e33   :  { %v5674_v56 = vpop.eup %5673  ;;  %5316 = vmatprep.subr.msk.bf16.mxu1 %vm6045_vm2, %v5314_v1  ;;  %v3974_v45 = vmul.f32 %v5672_v61, %v5668_v31 }
0x2e34   :  { %v3972_v62 = vmul.f32 %v5674_v56, %v5670_v43 }
0x2e36   :  { %5080 = vmatprep.mubr.msk.f32.mxu1 %vm299_vm3, %v3972_v62 }
0x2e37   :  { %5081 = vmatmul.mubr.msk.f32.vlgmr.msra.gmra.mrb[36].mxu1 %vm299_vm3, %v3974_v45 }
0x2e38   :  { %5087 = vmatprep.mubr.msk.f32.mxu1 %vm215_vm1, %v4063_v16 }
0x2e3b   :  { %5319 = vmatpush3.bf16.xpose.msk.msra.mxu1 %vm6045_vm2, %v5314_v1 }
0x2e42   :  { %5088 = vmatmul.mubr.msk.f32.vlgmr.msra.gmra.mrb[38].mxu1 %vm215_vm1, %v4065_v4 }
0x2f0a   :  { %v5082_v11 = vpop.f32.mrb[36].mxu1 }
0x2f0b   :  { %v4053_v63 = vpop.f32.mrb[37].mxu1 }
0x2f15   :  { %v5089_v60 = vpop.f32.mrb[38].mxu1 }
0x2f16   :  { %v4150_v54 = vadd.f32 %v6556_v57, %v5089_v60  ;;  %v4144_v55 = vpop.f32.mrb[39].mxu1 }
0x2f17   :  { %v4145_v0 = vadd.f32 %v6559_v58, %v4144_v55 }
0x2f18   :  { %v4156_v2 = vsel %vm299_vm3, %v4150_v54, -inf }
0x2f19   :  { %4157 = vmax.xlane.f32.xlu0 %v4156_v2  ;;  %v4153_v3 = vsel %vm299_vm3, %v4145_v0, -inf }
0x2f1a   :  { %4154 = vmax.xlane.f32.xlu1 %v4153_v3 }
0x2fa6   :  { %v4158_v8 = vpop.xlane.xlu0 %4157 }
0x2fa7   :  { %v4160_v21 = vsub.f32 %v4150_v54, %v4158_v8  ;;  %v4155_v12 = vpop.xlane.xlu1 %4154  ;;  %v2314_v54 = vld [vmem:[#allocation10 + $0x38] sm:$0xff] }
0x2fa8   :  { %v4159_v13 = vsub.f32 %v4145_v0, %v4155_v12 }
0x2fa9   :  { %v4163_v15 = vmul.f32 1.442695, %v4160_v21 }
0x2faa   :  { %v4161_v59 = vmul.f32 1.442695, %v4159_v13 }
0x2fab   :  { %5675 = vpow2.f32 %v4163_v15 }
0x2fac   :  { %5677 = vpow2.f32 %v4161_v59 }
0x2fb5   :  { %v5676_v17 = vpop.eup %5675 }
0x2fb6   :  { %v5678_v18 = vpop.eup %5677  ;;  %v4168_v57 = vsel %vm299_vm3, %v5676_v17, 0.0 }
0x2fb7   :  { %4169 = vadd.xlane.f32.xlu1 %v4168_v57  ;;  %v4165_v58 = vsel %vm299_vm3, %v5678_v18, 0.0 }
0x2fb8   :  { %4166 = vadd.xlane.f32.xlu0 %v4165_v58 }
0x2fc8   :  { %4264 = vrot.lane.b32.xlu1 %v6610_v20, %s5848_s22 }
0x2fcc   :  { %4266 = vrot.lane.b32.xlu1 %v6608_v19, %s5848_s22 }
0x2fce   :  { %5519 = vrot.lane.b32.xlu0 %v6540_v37, %s5859_s16 }
0x2fd0   :  { %4274 = vrot.lane.b32.xlu1 %v5082_v11, %s5863_s23  ;;  %v2312_v11 = vld [vmem:[#allocation10 + $0x28] sm:$0xff] }
0x2fd2   :  { %4272 = vrot.lane.b32.xlu0 %v4053_v63, %s5863_s23  ;;  %v2313_v63 = vld [vmem:[#allocation10 + $0x30] sm:$0xff] }
0x2fd3   :  { %v5328_v55 = vpack.c.bf16 %v2314_v54, %v2313_v63 }
0x3044   :  { %v4170_v22 = vpop.xlane.xlu1 %4169 }
0x3045   :  { %5679 = vrcp.f32 %v4170_v22  ;;  %v4167_v25 = vpop.xlane.xlu0 %4166 }
0x3046   :  { %5681 = vrcp.f32 %v4167_v25 }
0x3048   :  { %v4265_v35 = vpop.permute.xlu1 %4264 }
0x3049   :  { %v5520_v26 = vpop.permute.xlu0 %5519  ;;  %v4286_v44 = vsel %vm215_vm1, %v6584_v39, %v4265_v35 }
0x304a   :  { %v5522_v6 = vunpack.i.h.bf16 %v5520_v26  ;;  %v5521_v27 = vunpack.i.l.bf16 %v5520_v26 }
0x304c   :  { %v5320_v14 = vpack.c.bf16 %v5522_v6, %v5521_v27  ;;  %v4267_v32 = vpop.permute.xlu1 %4266  ;;  %v4337_v6 = vrot.slane %v6524_v40, %v2151_v34 }
0x304d   :  { %v4273_v31 = vpop.permute.xlu0 %4272  ;;  %v4287_v43 = vsel %vm215_vm1, %v6582_v47, %v4267_v32  ;;  %v4349_v32 = vrot.slane %v6524_v40, %v6022_v10 }
0x304e   :  { %5321 = vmatprep.subr.bf16.mxu0 %v5320_v14  ;;  %v4288_v50 = vsel %vm299_vm3, %v4286_v44, %v4273_v31 }
0x304f   :  { %v5680_v20 = vpop.eup %5679  ;;  %5323 = vmatpush3.bf16.msra.mxu0 %v5320_v14 }
0x3050   :  { %v5682_v33 = vpop.eup %5681  ;;  %v4174_v38 = vmul.f32 %v5680_v20, %v5676_v17  ;;  %v4275_v36 = vpop.permute.xlu1 %4274  ;;  %v4343_v20 = vrot.slane %v6524_v40, %v2157_v23 }
0x3051   :  { %v4172_v19 = vmul.f32 %v5682_v33, %v5678_v18  ;;  %v4289_v46 = vsel %vm299_vm3, %v4287_v43, %v4275_v36 }
0x3053   :  { %5094 = vmatprep.mubr.msk.f32.mxu0 %vm299_vm3, %v4172_v19 }
0x3054   :  { %5095 = vmatmul.mubr.msk.f32.vlgmr.msra.gmra.mrb[36].mxu0 %vm299_vm3, %v4174_v38 }
0x3127   :  { %v5096_v37 = vpop.f32.mrb[36].mxu0 }
0x3128   :  { %4282 = vrot.lane.b32.xlu1 %v5096_v37, %s5864_s24  ;;  %v4253_v24 = vpop.f32.mrb[37].mxu0 }
0x3129   :  { %4280 = vrot.lane.b32.xlu0 %v4253_v24, %s5864_s24 }
0x319a   :  { %v4283_v49 = vpop.permute.xlu1 %4282 }
0x319b   :  { %v4291_v42 = vsel %vm1037_vm4, %v4289_v46, %v4283_v49  ;;  %v4281_v52 = vpop.permute.xlu0 %4280 }
0x319c   :  { %v4293_v28 = vadd.f32 %v4291_v42, %v6536_v5  ;;  %v4290_v30 = vsel %vm1037_vm4, %v4288_v50, %v4281_v52 }
0x319d   :  { %v4292_v41 = vadd.f32 %v4290_v30, %v6531_v51  ;;  %v2311_v51 = vld [vmem:[#allocation10 + $0x20] sm:$0xff] }
0x319e   :  { %v4297_v53 = vsel %vm127_vm0, %v4293_v28, 0.0  ;;  %v5324_v60 = vpack.c.bf16 %v2312_v11, %v2311_v51 }
0x319f   :  { %4298 = vadd.xlane.f32.xlu1 %v4297_v53  ;;  %v4294_v47 = vsel %vm127_vm0, %v4292_v41, 0.0 }
0x31a0   :  { %4295 = vadd.xlane.f32.xlu0 %v4294_v47  ;;  %5325 = vmatprep.subr.bf16.mxu0 %v5324_v60 }
0x31a1   :  { %5327 = vmatpush3.bf16.msra.mxu0 %v5324_v60 }
0x31a2   :  { %5329 = vmatprep.subr.bf16.mxu0 %v5328_v55 }
0x31a5   :  { %5331 = vmatpush3.bf16.msra.mxu0 %v5328_v55 }
0x322c   :  { %v4299_v39 = vpop.xlane.xlu1 %4298 }
0x322d   :  { %v4301_v48 = vmul.f32 0.03125, %v4299_v39  ;;  %v4296_v1 = vpop.xlane.xlu0 %4295 }
0x322e   :  { %v4300_v61 = vmul.f32 0.03125, %v4296_v1 }
0x322f   :  { %v4303_v56 = vsub.f32 %v4293_v28, %v4301_v48 }
0x3230   :  { %v4302_v62 = vsub.f32 %v4292_v41, %v4300_v61 }
0x3231   :  { %v4305_v5 = vmul.f32 %v4303_v56, %v4303_v56 }
0x3232   :  { %v4304_v45 = vmul.f32 %v4302_v62, %v4302_v62 }
0x3233   :  { %v4309_v4 = vsel %vm127_vm0, %v4305_v5, 0.0 }
0x3234   :  { %v4306_v16 = vsel %vm127_vm0, %v4304_v45, 0.0 }
0x3235   :  { %4307 = vadd.xlane.f32.xlu0 %v4306_v16 }
0x3239   :  { %4310 = vadd.xlane.f32.xlu0 %v4309_v4 }
0x32c2   :  { %v4308_v0 = vpop.xlane.xlu0 %4307 }
0x32c3   :  { %v4312_v2 = vmul.f32 0.03125, %v4308_v0 }
0x32c5   :  { %v4314_v3 = vadd.f32 1e-12, %v4312_v2  ;;  %v4476_v2 = vrot.slane %v6524_v40, %v2290_v29 }
0x32c6   :  { %v4311_v8 = vpop.xlane.xlu0 %4310 }
0x32c7   :  { %5683 = vrsqrt.f32 %v4314_v3  ;;  %v4313_v21 = vmul.f32 0.03125, %v4311_v8  ;;  %vm4318_vm1 = vcmp.eq.f32.partialorder %v4314_v3, inf  ;;  %v4321_v59 = vand.u32 2147483648, %v4314_v3 }
0x32c8   :  { %vm4320_vm2 = vcmp.eq.f32.partialorder %v4314_v3, 0.0 }
0x32c9   :  { %v4315_v12 = vadd.f32 1e-12, %v4313_v21 }
0x32cb   :  { %5685 = vrsqrt.f32 %v4315_v12  ;;  %vm4325_vm3 = vcmp.eq.f32.partialorder %v4315_v12, inf  ;;  %v4328_v22 = vand.u32 2147483648, %v4315_v12  ;;  %vm4327_vm4 = vcmp.eq.f32.partialorder %v4315_v12, 0.0 }
0x32d1   :  { %v5684_v13 = vpop.eup %5683 }
0x32d2   :  { %v4317_v15 = vmul.f32 %v5684_v13, %v4314_v3 }
0x32d4   :  { %v4319_v17 = vsel %vm4318_vm1, %v4314_v3, %v4317_v15 }
0x32d5   :  { %v4322_v18 = vsel %vm4320_vm2, %v4321_v59, %v4319_v17  ;;  %v5686_v57 = vpop.eup %5685 }
0x32d6   :  { %5687 = vrcp.f32 %v4322_v18  ;;  %v4324_v58 = vmul.f32 %v5686_v57, %v4315_v12 }
0x32d8   :  { %v4326_v25 = vsel %vm4325_vm3, %v4315_v12, %v4324_v58  ;;  %v4482_v12 = vrot.slane %v6524_v40, %v2296_v7 }
0x32d9   :  { %v4329_v26 = vsel %vm4327_vm4, %v4328_v22, %v4326_v25 }
0x32da   :  { %5689 = vrcp.f32 %v4329_v26 }
0x32e0   :  { %v5688_v27 = vpop.eup %5687 }
0x32e1   :  { %v4331_v14 = vmul.f32 %v5688_v27, %v4302_v62 }
0x32e3   :  { %v4338_v33 = vmul.f32 %v4337_v6, %v4331_v14 }
0x32e4   :  { %v5690_v19 = vpop.eup %5689 }
0x32e5   :  { %v4344_v38 = vadd.f32 %v4343_v20, %v4338_v33  ;;  %v4333_v37 = vmul.f32 %v5690_v19, %v4303_v56 }
0x32e7   :  { %5105 = vmatprep.mubr.msk.f32.mxu0 %vm127_vm0, %v4344_v38  ;;  %v4339_v24 = vmul.f32 %v4337_v6, %v4333_v37 }
0x32e9   :  { %v4345_v35 = vadd.f32 %v4343_v20, %v4339_v24 }
0x32eb   :  { %5106 = vmatmul.mubr.msk.f32.vlgmr.msra.gmra.mrb[38].mxu0 %vm127_vm0, %v4345_v35 }
0x33be   :  { %v5107_v34 = vpop.f32.mrb[38].mxu0 }
0x33bf   :  { %v4428_v36 = vadd.f32 %v5107_v34, %v4349_v32  ;;  %v4422_v31 = vpop.f32.mrb[39].mxu0 }
0x33c0   :  { %v4423_v43 = vadd.f32 %v4422_v31, %v4349_v32 }
0x33c1   :  { %v4432_v44 = vadd.f32 %v4428_v36, %v4345_v35 }
0x33c2   :  { %v4431_v46 = vadd.f32 %v4423_v43, %v4344_v38 }
0x33c3   :  { %v4436_v23 = vsel %vm127_vm0, %v4432_v44, 0.0 }
0x33c4   :  { %4437 = vadd.xlane.f32.xlu0 %v4436_v23  ;;  %v4433_v49 = vsel %vm127_vm0, %v4431_v46, 0.0 }
0x33c5   :  { %4434 = vadd.xlane.f32.xlu1 %v4433_v49 }
0x3451   :  { %v4438_v50 = vpop.xlane.xlu0 %4437 }
0x3452   :  { %v4440_v42 = vmul.f32 0.03125, %v4438_v50  ;;  %v4435_v52 = vpop.xlane.xlu1 %4434 }
0x3453   :  { %v4439_v28 = vmul.f32 0.03125, %v4435_v52 }
0x3454   :  { %v4442_v30 = vsub.f32 %v4432_v44, %v4440_v42 }
0x3455   :  { %v4441_v41 = vsub.f32 %v4431_v46, %v4439_v28 }
0x3456   :  { %v4444_v53 = vmul.f32 %v4442_v30, %v4442_v30 }
0x3457   :  { %v4443_v10 = vmul.f32 %v4441_v41, %v4441_v41 }
0x3458   :  { %v4448_v47 = vsel %vm127_vm0, %v4444_v53, 0.0 }
0x3459   :  { %4449 = vadd.xlane.f32.xlu0 %v4448_v47  ;;  %v4445_v39 = vsel %vm127_vm0, %v4443_v10, 0.0 }
0x345a   :  { %4446 = vadd.xlane.f32.xlu1 %v4445_v39 }
0x34e6   :  { %v4450_v48 = vpop.xlane.xlu0 %4449 }
0x34e7   :  { %v4452_v1 = vmul.f32 0.03125, %v4450_v48  ;;  %v4447_v61 = vpop.xlane.xlu1 %4446 }
0x34e8   :  { %v4451_v56 = vmul.f32 0.03125, %v4447_v61 }
0x34e9   :  { %v4454_v62 = vadd.f32 1e-12, %v4452_v1 }
0x34ea   :  { %v4453_v45 = vadd.f32 1e-12, %v4451_v56 }
0x34eb   :  { %5691 = vrsqrt.f32 %v4454_v62  ;;  %vm4464_vm10 = vcmp.eq.f32.partialorder %v4454_v62, inf  ;;  %v4467_v51 = vand.u32 2147483648, %v4454_v62  ;;  %vm4466_vm11 = vcmp.eq.f32.partialorder %v4454_v62, 0.0 }
0x34ec   :  { %5693 = vrsqrt.f32 %v4453_v45  ;;  %vm4457_vm12 = vcmp.eq.f32.partialorder %v4453_v45, inf  ;;  %v4460_v60 = vand.u32 2147483648, %v4453_v45  ;;  %vm4459_vm13 = vcmp.eq.f32.partialorder %v4453_v45, 0.0 }
0x34f5   :  { %v5692_v16 = vpop.eup %5691 }
0x34f6   :  { %v5694_v5 = vpop.eup %5693  ;;  %v4463_v4 = vmul.f32 %v5692_v16, %v4454_v62 }
0x34f7   :  { %v4456_v11 = vmul.f32 %v5694_v5, %v4453_v45 }
0x34f8   :  { %v4465_v63 = vsel %vm4464_vm10, %v4454_v62, %v4463_v4 }
0x34f9   :  { %v4468_v54 = vsel %vm4466_vm11, %v4467_v51, %v4465_v63  ;;  %v4458_v55 = vsel %vm4457_vm12, %v4453_v45, %v4456_v11 }
0x34fa   :  { %5695 = vrcp.f32 %v4468_v54  ;;  %v4461_v0 = vsel %vm4459_vm13, %v4460_v60, %v4458_v55 }
0x34fb   :  { %5697 = vrcp.f32 %v4461_v0 }
0x3504   :  { %v5696_v3 = vpop.eup %5695 }
0x3505   :  { %v5698_v8 = vpop.eup %5697  ;;  %v4472_v21 = vmul.f32 %v5696_v3, %v4442_v30 }
0x3506   :  { %v4470_v13 = vmul.f32 %v5698_v8, %v4441_v41 }
0x3507   :  { %v4478_v15 = vmul.f32 %v4476_v2, %v4472_v21 }
0x3508   :  { %v4477_v59 = vmul.f32 %v4476_v2, %v4470_v13 }
0x3509   :  { %v4484_v17 = vadd.f32 %v4482_v12, %v4478_v15 }
0x350a   :  { %v4483_v18 = vadd.f32 %v4482_v12, %v4477_v59 }
0x350b   :  { %4486 = vst.msk [vmem:[#allocation11 + $0x8] sm:$0xff] %vm127_vm0, %v4484_v17 }
0x350c   :  { %4485 = vst.msk [vmem:[#allocation11] sm:$0xff] %vm127_vm0, %v4483_v18 }
0x350d   :  { %5826 = shalt.err (!%p5823_p2)
}
0x350e   :  { %s5827_s14 = scalar_lea.hbm %s6712_s9, 256 }
0x350f   :  { %p5828_p3 = scmp.ne.s32.totalorder %s6712_s9, %s5827_s14  ;;  %p5831_p4 = scmp.lt.u32.totalorder %s5827_s14, %s6712_s9 }
0x3511   :  { %p5833_p5 = pnand %p5831_p4, %p5828_p3 }
0x3513   :  { %5836 = shalt.err (!%p5833_p5)
}
0x3514   :  { %4498 = dma.vmem_to_hbm [thread:$0]  %s4493_s8, 256, %s6712_s9, [#allocation4], %s5847_s21, %s5847_s21, %s5848_s22  }
0x3515   :  { %5843 = dma.done.wait [#allocation4], 256  }
0x3516   :  { %5844 = vsyncadd [#allocation4], 4294967040 }
0x3517   :  { %4502 = vsyncpa [#allocation3], 1 }
0x3518   :  { %4503 = vsyncpa [#allocation6], 1 }
0x3519   :  { %4504 = vsyncpa [#allocation9], 1 }
0x351a   :  { %4505 = vsyncpa [#allocation4], 1 }

</bundles_post_ra>
